<compile_context>
chip_gen: v7x
topology: tpu7x:2x2x1
jax: 0.10.0
libtpu: 0.0.40
codegen_flags: <defaults>
</compile_context>

<pallas_src>
import functools

import jax
import jax.numpy as jnp
from jax.experimental import pallas as pl
from jax.experimental.pallas import tpu as pltpu

BN_EPS = 1e-5


def _full_spec(shape):
    nd = len(shape)
    return pl.BlockSpec(shape, lambda i, _nd=nd: (0,) * _nd)


# --------------------------------------------------------------------------- #
# Fused kernel: [BasicBlock x num_blocks] -> full-spatial output conv -> sigmoid
# --------------------------------------------------------------------------- #
def _fused_kernel(num_blocks, *refs):
    n_in = 1 + 6 * num_blocks + 2
    x_ref = refs[0]
    blk_refs = [refs[1 + 6 * i: 7 + 6 * i] for i in range(num_blocks)]
    wh_ref = refs[1 + 6 * num_blocks]       # (H*W, C) f32, (h, w, c) order
    bh_ref = refs[2 + 6 * num_blocks]       # (1, 1) f32
    o_ref = refs[n_in]                      # (N, 1) f32
    xp_ref = refs[n_in + 1]                 # (N, H+2, W+2, C) f32 scratch
    col_ref = refs[n_in + 2]                # (M, K_pad) bf16 scratch

    N, Hp, Wp, C = xp_ref.shape
    H, W = Hp - 2, Wp - 2
    M = N * H * W
    K = 9 * C

    # Zero scratch ONCE per kernel invocation:
    #  - xp halo must be zero (SAME padding); interior is overwritten per conv.
    #  - col K-pad tail must be zero; the first 9*C columns are overwritten.
    xp_ref[...] = jnp.zeros_like(xp_ref)
    col_ref[...] = jnp.zeros_like(col_ref)

    def conv3x3(x_mc, w_ref):
        # SAME (pad=1, stride=1) 3x3 conv: im2col into one bf16 buffer, then a
        # single MXU matmul with f32 accumulation.
        xp_ref[:, 1:H + 1, 1:W + 1, :] = x_mc.reshape(N, H, W, C)
        for k in range(9):
            dh, dw = k // 3, k % 3
            patch = xp_ref[:, dh:dh + H, dw:dw + W, :].reshape(M, C)
            col_ref[:, k * C:(k + 1) * C] = patch.astype(jnp.bfloat16)
        return jnp.dot(col_ref[...], w_ref[...],
                       preferred_element_type=jnp.float32)        # (M, C) f32

    def batch_norm(y, gamma, beta):
        # Training-mode BN: batch stats over (N, H, W), biased variance.
        # Single pass for sum / sum-of-squares; fused scale & shift (f32).
        inv_m = 1.0 / M
        mean = jnp.sum(y, axis=0, keepdims=True) * inv_m           # (1, C)
        ex2 = jnp.sum(y * y, axis=0, keepdims=True) * inv_m        # (1, C)
        var = ex2 - mean * mean
        scale = gamma * jax.lax.rsqrt(var + BN_EPS)                # EUP rsqrt
        shift = beta - mean * scale
        return y * scale + shift

    x = x_ref[...].astype(jnp.float32).reshape(M, C)
    for (w1, g1, b1, w2, g2, b2) in blk_refs:
        y = conv3x3(x, w1)
        y = jnp.maximum(batch_norm(y, g1[...], b1[...]), 0.0)
        y = conv3x3(y, w2)
        y = batch_norm(y, g2[...], b2[...])
        x = jnp.maximum(y + x, 0.0)                                # residual + ReLU

    # Energy head: Conv2d(C, 1, kernel_size=features_dim) over the full spatial
    # extent == one dot product per sample. Done as VPU multiply + reduction
    # over the resident activation, then sigmoid.
    prod = x.reshape(N, H * W, C) * wh_ref[...]                    # (N, HW, C)
    energy = jnp.sum(jnp.sum(prod, axis=1), axis=1, keepdims=True)  # (N, 1)
    o_ref[...] = jax.nn.sigmoid(energy + bh_ref[...]).astype(o_ref.dtype)


def feedback_resnet_pallas(x_nhwc, params):
    N, H, W, C = x_nhwc.shape
    blocks = params["blocks"]
    num_blocks = len(blocks)

    args = [x_nhwc]
    for blk in blocks:
        args += [blk["w1"], blk["g1"], blk["b1"], blk["w2"], blk["g2"], blk["b2"]]
    args += [params["head"]["w"], params["head"]["b"]]

    k_pad = blocks[0]["w1"].shape[0]        # 9*C rounded up to a multiple of 128

    return pl.pallas_call(
        functools.partial(_fused_kernel, num_blocks),
        out_shape=jax.ShapeDtypeStruct((N, 1), jnp.float32),
        grid=(1,),
        in_specs=[_full_spec(a.shape) for a in args],
        out_specs=_full_spec((N, 1)),
        scratch_shapes=[
            pltpu.VMEM((N, H + 2, W + 2, C), jnp.float32),   # zero-padded activation
            pltpu.VMEM((N * H * W, k_pad), jnp.bfloat16),    # im2col buffer
        ],
        compiler_params=pltpu.CompilerParams(
            dimension_semantics=("arbitrary",)),
    )(*args)


# --------------------------------------------------------------------------- #
# Parameter init (deterministic, synthetic; pre-flattened / pre-cast once)
# --------------------------------------------------------------------------- #
def init_params(key, in_channels, features_dim, num_blocks):
    C = in_channels
    K = 9 * C
    K_pad = ((K + 127) // 128) * 128        # align im2col contraction dim
    params = {"blocks": [], "head": {}}

    def conv_w(k):
        w = 0.05 * jax.random.normal(k, (3, 3, C, C), jnp.float32)   # HWIO
        w = w.reshape(K, C)                                          # (kh, kw, cin) rows
        w = jnp.pad(w, ((0, K_pad - K), (0, 0)))
        return w.astype(jnp.bfloat16)                                # pre-cast once

    for _ in range(num_blocks):
        key, k1, k2, k3, k4, k5, k6 = jax.random.split(key, 7)
        params["blocks"].append({
            "w1": conv_w(k1),
            "g1": 1.0 + 0.1 * jax.random.normal(k2, (1, C), jnp.float32),
            "b1": 0.1 * jax.random.normal(k3, (1, C), jnp.float32),
            "w2": conv_w(k4),
            "g2": 1.0 + 0.1 * jax.random.normal(k5, (1, C), jnp.float32),
            "b2": 0.1 * jax.random.normal(k6, (1, C), jnp.float32),
        })

    key, kw, kb = jax.random.split(key, 3)
    w_head = 0.05 * jax.random.normal(kw, (features_dim, features_dim, C),
                                      jnp.float32)
    params["head"]["w"] = w_head.reshape(features_dim * features_dim, C)  # (h,w) rows, c cols
    params["head"]["b"] = 0.1 * jax.random.normal(kb, (1, 1), jnp.float32)
    return params


@jax.jit
def feedback_resnet_forward(x_nhwc, params):
    # Accepts NHWC directly (channels on the TPU lane axis); the NCHW->NHWC
    # transpose is done once outside the jit'd hot path.
    return feedback_resnet_pallas(x_nhwc, params)   # (N, 1), sigmoid(energy)


if __name__ == "__main__":
    # Small shapes consistent with the module (in_channels, features_dim scaled down).
    N, C, H = 2, 32, 8          # batch, in_channels, features_dim (H == W == features_dim)
    NUM_BLOCKS = 2

    key = jax.random.PRNGKey(0)
    kx, kp = jax.random.split(key)
    x_nchw = jax.random.normal(kx, (N, C, H, H), jnp.float32)   # PyTorch NCHW
    x_nhwc = jnp.transpose(x_nchw, (0, 2, 3, 1))                # once, outside jit
    params = init_params(kp, in_channels=C, features_dim=H, num_blocks=NUM_BLOCKS)

    out = feedback_resnet_forward(x_nhwc, params)
    out = jax.block_until_ready(out)

    assert out.shape == (N, 1), out.shape
    assert bool(jnp.all(jnp.isfinite(out)))
    assert bool(jnp.all((out > 0.0) & (out < 1.0)))   # sigmoid range
    print("KERNEL_OK")
</pallas_src>

<mosaic_0001>
module attributes {stable_mosaic.version = 11 : i64} {
  func.func @_fused_kernel(%arg0: i32, %arg1: memref<2x8x8x32xf32, #tpu.memory_space<vmem>>, %arg2: memref<384x32xbf16, #tpu.memory_space<vmem>>, %arg3: memref<1x32xf32, #tpu.memory_space<vmem>>, %arg4: memref<1x32xf32, #tpu.memory_space<vmem>>, %arg5: memref<384x32xbf16, #tpu.memory_space<vmem>>, %arg6: memref<1x32xf32, #tpu.memory_space<vmem>>, %arg7: memref<1x32xf32, #tpu.memory_space<vmem>>, %arg8: memref<384x32xbf16, #tpu.memory_space<vmem>>, %arg9: memref<1x32xf32, #tpu.memory_space<vmem>>, %arg10: memref<1x32xf32, #tpu.memory_space<vmem>>, %arg11: memref<384x32xbf16, #tpu.memory_space<vmem>>, %arg12: memref<1x32xf32, #tpu.memory_space<vmem>>, %arg13: memref<1x32xf32, #tpu.memory_space<vmem>>, %arg14: memref<64x32xf32, #tpu.memory_space<vmem>>, %arg15: memref<1x1xf32, #tpu.memory_space<vmem>>, %arg16: memref<2x1xf32, #tpu.memory_space<vmem>>, %arg17: memref<2x10x10x32xf32, #tpu.memory_space<vmem>>, %arg18: memref<128x384xbf16, #tpu.memory_space<vmem>>) attributes {dimension_semantics = [#tpu.dimension_semantics<arbitrary>], iteration_bounds = array<i64: 1>, scalar_prefetch = 0 : i64, scratch_operands = 2 : i64, tpu.core_type = #tpu.core_type<tc>, window_params = [{pipeline_mode = #tpu.pipeline_mode<synchronous>, transform_indices = @transform_0, window_bounds = array<i64: 2, 8, 8, 32>}, {pipeline_mode = #tpu.pipeline_mode<synchronous>, transform_indices = @transform_1, window_bounds = array<i64: 384, 32>}, {pipeline_mode = #tpu.pipeline_mode<synchronous>, transform_indices = @transform_2, window_bounds = array<i64: 1, 32>}, {pipeline_mode = #tpu.pipeline_mode<synchronous>, transform_indices = @transform_3, window_bounds = array<i64: 1, 32>}, {pipeline_mode = #tpu.pipeline_mode<synchronous>, transform_indices = @transform_4, window_bounds = array<i64: 384, 32>}, {pipeline_mode = #tpu.pipeline_mode<synchronous>, transform_indices = @transform_5, window_bounds = array<i64: 1, 32>}, {pipeline_mode = #tpu.pipeline_mode<synchronous>, transform_indices = @transform_6, window_bounds = array<i64: 1, 32>}, {pipeline_mode = #tpu.pipeline_mode<synchronous>, transform_indices = @transform_7, window_bounds = array<i64: 384, 32>}, {pipeline_mode = #tpu.pipeline_mode<synchronous>, transform_indices = @transform_8, window_bounds = array<i64: 1, 32>}, {pipeline_mode = #tpu.pipeline_mode<synchronous>, transform_indices = @transform_9, window_bounds = array<i64: 1, 32>}, {pipeline_mode = #tpu.pipeline_mode<synchronous>, transform_indices = @transform_10, window_bounds = array<i64: 384, 32>}, {pipeline_mode = #tpu.pipeline_mode<synchronous>, transform_indices = @transform_11, window_bounds = array<i64: 1, 32>}, {pipeline_mode = #tpu.pipeline_mode<synchronous>, transform_indices = @transform_12, window_bounds = array<i64: 1, 32>}, {pipeline_mode = #tpu.pipeline_mode<synchronous>, transform_indices = @transform_13, window_bounds = array<i64: 64, 32>}, {pipeline_mode = #tpu.pipeline_mode<synchronous>, transform_indices = @transform_14, window_bounds = array<i64: 1, 1>}, {pipeline_mode = #tpu.pipeline_mode<synchronous>, transform_indices = @transform_15, window_bounds = array<i64: 2, 1>}]} {
    %cst = arith.constant 0.000000e+00 : f32
    %0 = vector.broadcast %cst : f32 to vector<2x10x10x32xf32>
    %c0 = arith.constant 0 : index
    %c0_0 = arith.constant 0 : index
    %c0_1 = arith.constant 0 : index
    %c0_2 = arith.constant 0 : index
    %1 = vector.load %arg17[%c0, %c0_0, %c0_1, %c0_2] : memref<2x10x10x32xf32, #tpu.memory_space<vmem>>, vector<2x10x10x32xf32>
    tpu.vector_store %arg17[%c0, %c0_0, %c0_1, %c0_2], %0 {strides = array<i32>} : memref<2x10x10x32xf32, #tpu.memory_space<vmem>>, vector<2x10x10x32xf32>,
    %cst_3 = arith.constant 0.000000e+00 : bf16
    %2 = vector.broadcast %cst_3 : bf16 to vector<128x384xbf16>
    %c0_4 = arith.constant 0 : index
    %c0_5 = arith.constant 0 : index
    %3 = vector.load %arg18[%c0_4, %c0_5] : memref<128x384xbf16, #tpu.memory_space<vmem>>, vector<128x384xbf16>
    tpu.vector_store %arg18[%c0_4, %c0_5], %2 {strides = array<i32>} : memref<128x384xbf16, #tpu.memory_space<vmem>>, vector<128x384xbf16>,
    %c0_6 = arith.constant 0 : index
    %c0_7 = arith.constant 0 : index
    %c0_8 = arith.constant 0 : index
    %c0_9 = arith.constant 0 : index
    %4 = vector.load %arg1[%c0_6, %c0_7, %c0_8, %c0_9] : memref<2x8x8x32xf32, #tpu.memory_space<vmem>>, vector<2x8x8x32xf32>
    %5 = vector.shape_cast %4 : vector<2x8x8x32xf32> to vector<128x32xf32>
    %6 = vector.shape_cast %5 : vector<128x32xf32> to vector<2x8x8x32xf32>
    %c0_10 = arith.constant 0 : index
    %c1 = arith.constant 1 : index
    %c1_11 = arith.constant 1 : index
    %c0_12 = arith.constant 0 : index
    %7 = vector.load %arg17[%c0_10, %c1, %c1_11, %c0_12] : memref<2x10x10x32xf32, #tpu.memory_space<vmem>>, vector<2x8x8x32xf32>
    tpu.vector_store %arg17[%c0_10, %c1, %c1_11, %c0_12], %6 {strides = array<i32>} : memref<2x10x10x32xf32, #tpu.memory_space<vmem>>, vector<2x8x8x32xf32>,
    %c0_13 = arith.constant 0 : index
    %c0_14 = arith.constant 0 : index
    %c0_15 = arith.constant 0 : index
    %c0_16 = arith.constant 0 : index
    %8 = vector.load %arg17[%c0_13, %c0_14, %c0_15, %c0_16] : memref<2x10x10x32xf32, #tpu.memory_space<vmem>>, vector<2x8x8x32xf32>
    %9 = vector.shape_cast %8 : vector<2x8x8x32xf32> to vector<128x32xf32>
    %10 = arith.truncf %9 : vector<128x32xf32> to vector<128x32xbf16>
    %c0_17 = arith.constant 0 : index
    %c0_18 = arith.constant 0 : index
    %11 = vector.load %arg18[%c0_17, %c0_18] : memref<128x384xbf16, #tpu.memory_space<vmem>>, vector<128x32xbf16>
    tpu.vector_store %arg18[%c0_17, %c0_18], %10 {strides = array<i32>} : memref<128x384xbf16, #tpu.memory_space<vmem>>, vector<128x32xbf16>,
    %c0_19 = arith.constant 0 : index
    %c0_20 = arith.constant 0 : index
    %c1_21 = arith.constant 1 : index
    %c0_22 = arith.constant 0 : index
    %12 = vector.load %arg17[%c0_19, %c0_20, %c1_21, %c0_22] : memref<2x10x10x32xf32, #tpu.memory_space<vmem>>, vector<2x8x8x32xf32>
    %13 = vector.shape_cast %12 : vector<2x8x8x32xf32> to vector<128x32xf32>
    %14 = arith.truncf %13 : vector<128x32xf32> to vector<128x32xbf16>
    %c0_23 = arith.constant 0 : index
    %c32 = arith.constant 32 : index
    %15 = vector.load %arg18[%c0_23, %c32] : memref<128x384xbf16, #tpu.memory_space<vmem>>, vector<128x32xbf16>
    tpu.vector_store %arg18[%c0_23, %c32], %14 {strides = array<i32>} : memref<128x384xbf16, #tpu.memory_space<vmem>>, vector<128x32xbf16>,
    %c0_24 = arith.constant 0 : index
    %c0_25 = arith.constant 0 : index
    %c2 = arith.constant 2 : index
    %c0_26 = arith.constant 0 : index
    %16 = vector.load %arg17[%c0_24, %c0_25, %c2, %c0_26] : memref<2x10x10x32xf32, #tpu.memory_space<vmem>>, vector<2x8x8x32xf32>
    %17 = vector.shape_cast %16 : vector<2x8x8x32xf32> to vector<128x32xf32>
    %18 = arith.truncf %17 : vector<128x32xf32> to vector<128x32xbf16>
    %c0_27 = arith.constant 0 : index
    %c64 = arith.constant 64 : index
    %19 = vector.load %arg18[%c0_27, %c64] : memref<128x384xbf16, #tpu.memory_space<vmem>>, vector<128x32xbf16>
    tpu.vector_store %arg18[%c0_27, %c64], %18 {strides = array<i32>} : memref<128x384xbf16, #tpu.memory_space<vmem>>, vector<128x32xbf16>,
    %c0_28 = arith.constant 0 : index
    %c1_29 = arith.constant 1 : index
    %c0_30 = arith.constant 0 : index
    %c0_31 = arith.constant 0 : index
    %20 = vector.load %arg17[%c0_28, %c1_29, %c0_30, %c0_31] : memref<2x10x10x32xf32, #tpu.memory_space<vmem>>, vector<2x8x8x32xf32>
    %21 = vector.shape_cast %20 : vector<2x8x8x32xf32> to vector<128x32xf32>
    %22 = arith.truncf %21 : vector<128x32xf32> to vector<128x32xbf16>
    %c0_32 = arith.constant 0 : index
    %c96 = arith.constant 96 : index
    %23 = vector.load %arg18[%c0_32, %c96] : memref<128x384xbf16, #tpu.memory_space<vmem>>, vector<128x32xbf16>
    tpu.vector_store %arg18[%c0_32, %c96], %22 {strides = array<i32>} : memref<128x384xbf16, #tpu.memory_space<vmem>>, vector<128x32xbf16>,
    %c0_33 = arith.constant 0 : index
    %c1_34 = arith.constant 1 : index
    %c1_35 = arith.constant 1 : index
    %c0_36 = arith.constant 0 : index
    %24 = vector.load %arg17[%c0_33, %c1_34, %c1_35, %c0_36] : memref<2x10x10x32xf32, #tpu.memory_space<vmem>>, vector<2x8x8x32xf32>
    %25 = vector.shape_cast %24 : vector<2x8x8x32xf32> to vector<128x32xf32>
    %26 = arith.truncf %25 : vector<128x32xf32> to vector<128x32xbf16>
    %c0_37 = arith.constant 0 : index
    %c128 = arith.constant 128 : index
    %27 = vector.load %arg18[%c0_37, %c128] : memref<128x384xbf16, #tpu.memory_space<vmem>>, vector<128x32xbf16>
    tpu.vector_store %arg18[%c0_37, %c128], %26 {strides = array<i32>} : memref<128x384xbf16, #tpu.memory_space<vmem>>, vector<128x32xbf16>,
    %c0_38 = arith.constant 0 : index
    %c1_39 = arith.constant 1 : index
    %c2_40 = arith.constant 2 : index
    %c0_41 = arith.constant 0 : index
    %28 = vector.load %arg17[%c0_38, %c1_39, %c2_40, %c0_41] : memref<2x10x10x32xf32, #tpu.memory_space<vmem>>, vector<2x8x8x32xf32>
    %29 = vector.shape_cast %28 : vector<2x8x8x32xf32> to vector<128x32xf32>
    %30 = arith.truncf %29 : vector<128x32xf32> to vector<128x32xbf16>
    %c0_42 = arith.constant 0 : index
    %c160 = arith.constant 160 : index
    %31 = vector.load %arg18[%c0_42, %c160] : memref<128x384xbf16, #tpu.memory_space<vmem>>, vector<128x32xbf16>
    tpu.vector_store %arg18[%c0_42, %c160], %30 {strides = array<i32>} : memref<128x384xbf16, #tpu.memory_space<vmem>>, vector<128x32xbf16>,
    %c0_43 = arith.constant 0 : index
    %c2_44 = arith.constant 2 : index
    %c0_45 = arith.constant 0 : index
    %c0_46 = arith.constant 0 : index
    %32 = vector.load %arg17[%c0_43, %c2_44, %c0_45, %c0_46] : memref<2x10x10x32xf32, #tpu.memory_space<vmem>>, vector<2x8x8x32xf32>
    %33 = vector.shape_cast %32 : vector<2x8x8x32xf32> to vector<128x32xf32>
    %34 = arith.truncf %33 : vector<128x32xf32> to vector<128x32xbf16>
    %c0_47 = arith.constant 0 : index
    %c192 = arith.constant 192 : index
    %35 = vector.load %arg18[%c0_47, %c192] : memref<128x384xbf16, #tpu.memory_space<vmem>>, vector<128x32xbf16>
    tpu.vector_store %arg18[%c0_47, %c192], %34 {strides = array<i32>} : memref<128x384xbf16, #tpu.memory_space<vmem>>, vector<128x32xbf16>,
    %c0_48 = arith.constant 0 : index
    %c2_49 = arith.constant 2 : index
    %c1_50 = arith.constant 1 : index
    %c0_51 = arith.constant 0 : index
    %36 = vector.load %arg17[%c0_48, %c2_49, %c1_50, %c0_51] : memref<2x10x10x32xf32, #tpu.memory_space<vmem>>, vector<2x8x8x32xf32>
    %37 = vector.shape_cast %36 : vector<2x8x8x32xf32> to vector<128x32xf32>
    %38 = arith.truncf %37 : vector<128x32xf32> to vector<128x32xbf16>
    %c0_52 = arith.constant 0 : index
    %c224 = arith.constant 224 : index
    %39 = vector.load %arg18[%c0_52, %c224] : memref<128x384xbf16, #tpu.memory_space<vmem>>, vector<128x32xbf16>
    tpu.vector_store %arg18[%c0_52, %c224], %38 {strides = array<i32>} : memref<128x384xbf16, #tpu.memory_space<vmem>>, vector<128x32xbf16>,
    %c0_53 = arith.constant 0 : index
    %c2_54 = arith.constant 2 : index
    %c2_55 = arith.constant 2 : index
    %c0_56 = arith.constant 0 : index
    %40 = vector.load %arg17[%c0_53, %c2_54, %c2_55, %c0_56] : memref<2x10x10x32xf32, #tpu.memory_space<vmem>>, vector<2x8x8x32xf32>
    %41 = vector.shape_cast %40 : vector<2x8x8x32xf32> to vector<128x32xf32>
    %42 = arith.truncf %41 : vector<128x32xf32> to vector<128x32xbf16>
    %c0_57 = arith.constant 0 : index
    %c256 = arith.constant 256 : index
    %43 = vector.load %arg18[%c0_57, %c256] : memref<128x384xbf16, #tpu.memory_space<vmem>>, vector<128x32xbf16>
    tpu.vector_store %arg18[%c0_57, %c256], %42 {strides = array<i32>} : memref<128x384xbf16, #tpu.memory_space<vmem>>, vector<128x32xbf16>,
    %c0_58 = arith.constant 0 : index
    %c0_59 = arith.constant 0 : index
    %44 = vector.load %arg18[%c0_58, %c0_59] : memref<128x384xbf16, #tpu.memory_space<vmem>>, vector<128x384xbf16>
    %c0_60 = arith.constant 0 : index
    %c0_61 = arith.constant 0 : index
    %45 = vector.load %arg2[%c0_60, %c0_61] : memref<384x32xbf16, #tpu.memory_space<vmem>>, vector<384x32xbf16>
    %cst_62 = arith.constant dense<0.000000e+00> : vector<128x32xf32>
    %46 = tpu.matmul %44, %45, %cst_62 {dimension_numbers = #tpu.dot_dimension_numbers<[1], [0], [0], [1], [0, 0, 1, 1], [], []>} : vector<128x384xbf16>, vector<384x32xbf16>, vector<128x32xf32> -> vector<128x32xf32>
    %c0_63 = arith.constant 0 : index
    %c0_64 = arith.constant 0 : index
    %47 = vector.load %arg3[%c0_63, %c0_64] : memref<1x32xf32, #tpu.memory_space<vmem>>, vector<1x32xf32>
    %c0_65 = arith.constant 0 : index
    %c0_66 = arith.constant 0 : index
    %48 = vector.load %arg4[%c0_65, %c0_66] : memref<1x32xf32, #tpu.memory_space<vmem>>, vector<1x32xf32>
    %cst_67 = arith.constant dense<0.000000e+00> : vector<32xf32>
    %49 = vector.multi_reduction <add>, %46, %cst_67 [0] : vector<128x32xf32> to vector<32xf32>
    %50 = vector.shape_cast %49 : vector<32xf32> to vector<1x32xf32>
    %cst_68 = arith.constant 7.812500e-03 : f32
    %51 = vector.broadcast %cst_68 : f32 to vector<1x32xf32>
    %52 = arith.mulf %50, %51 : vector<1x32xf32>
    %53 = arith.mulf %46, %46 : vector<128x32xf32>
    %cst_69 = arith.constant dense<0.000000e+00> : vector<32xf32>
    %54 = vector.multi_reduction <add>, %53, %cst_69 [0] : vector<128x32xf32> to vector<32xf32>
    %55 = vector.shape_cast %54 : vector<32xf32> to vector<1x32xf32>
    %cst_70 = arith.constant 7.812500e-03 : f32
    %56 = vector.broadcast %cst_70 : f32 to vector<1x32xf32>
    %57 = arith.mulf %55, %56 : vector<1x32xf32>
    %58 = arith.mulf %52, %52 : vector<1x32xf32>
    %59 = arith.subf %57, %58 : vector<1x32xf32>
    %cst_71 = arith.constant 9.99999974E-6 : f32
    %60 = vector.broadcast %cst_71 : f32 to vector<1x32xf32>
    %61 = arith.addf %59, %60 : vector<1x32xf32>
    %62 = math.rsqrt %61 : vector<1x32xf32>
    %63 = arith.mulf %47, %62 : vector<1x32xf32>
    %64 = arith.mulf %52, %63 : vector<1x32xf32>
    %65 = arith.subf %48, %64 : vector<1x32xf32>
    %66 = vector.broadcast %63 : vector<1x32xf32> to vector<128x32xf32>
    %67 = arith.mulf %46, %66 : vector<128x32xf32>
    %68 = vector.broadcast %65 : vector<1x32xf32> to vector<128x32xf32>
    %69 = arith.addf %67, %68 : vector<128x32xf32>
    %cst_72 = arith.constant 0.000000e+00 : f32
    %70 = vector.broadcast %cst_72 : f32 to vector<128x32xf32>
    %71 = arith.maximumf %69, %70 : vector<128x32xf32>
    %72 = vector.shape_cast %71 : vector<128x32xf32> to vector<2x8x8x32xf32>
    %c0_73 = arith.constant 0 : index
    %c1_74 = arith.constant 1 : index
    %c1_75 = arith.constant 1 : index
    %c0_76 = arith.constant 0 : index
    %73 = vector.load %arg17[%c0_73, %c1_74, %c1_75, %c0_76] : memref<2x10x10x32xf32, #tpu.memory_space<vmem>>, vector<2x8x8x32xf32>
    tpu.vector_store %arg17[%c0_73, %c1_74, %c1_75, %c0_76], %72 {strides = array<i32>} : memref<2x10x10x32xf32, #tpu.memory_space<vmem>>, vector<2x8x8x32xf32>,
    %c0_77 = arith.constant 0 : index
    %c0_78 = arith.constant 0 : index
    %c0_79 = arith.constant 0 : index
    %c0_80 = arith.constant 0 : index
    %74 = vector.load %arg17[%c0_77, %c0_78, %c0_79, %c0_80] : memref<2x10x10x32xf32, #tpu.memory_space<vmem>>, vector<2x8x8x32xf32>
    %75 = vector.shape_cast %74 : vector<2x8x8x32xf32> to vector<128x32xf32>
    %76 = arith.truncf %75 : vector<128x32xf32> to vector<128x32xbf16>
    %c0_81 = arith.constant 0 : index
    %c0_82 = arith.constant 0 : index
    %77 = vector.load %arg18[%c0_81, %c0_82] : memref<128x384xbf16, #tpu.memory_space<vmem>>, vector<128x32xbf16>
    tpu.vector_store %arg18[%c0_81, %c0_82], %76 {strides = array<i32>} : memref<128x384xbf16, #tpu.memory_space<vmem>>, vector<128x32xbf16>,
    %c0_83 = arith.constant 0 : index
    %c0_84 = arith.constant 0 : index
    %c1_85 = arith.constant 1 : index
    %c0_86 = arith.constant 0 : index
    %78 = vector.load %arg17[%c0_83, %c0_84, %c1_85, %c0_86] : memref<2x10x10x32xf32, #tpu.memory_space<vmem>>, vector<2x8x8x32xf32>
    %79 = vector.shape_cast %78 : vector<2x8x8x32xf32> to vector<128x32xf32>
    %80 = arith.truncf %79 : vector<128x32xf32> to vector<128x32xbf16>
    %c0_87 = arith.constant 0 : index
    %c32_88 = arith.constant 32 : index
    %81 = vector.load %arg18[%c0_87, %c32_88] : memref<128x384xbf16, #tpu.memory_space<vmem>>, vector<128x32xbf16>
    tpu.vector_store %arg18[%c0_87, %c32_88], %80 {strides = array<i32>} : memref<128x384xbf16, #tpu.memory_space<vmem>>, vector<128x32xbf16>,
    %c0_89 = arith.constant 0 : index
    %c0_90 = arith.constant 0 : index
    %c2_91 = arith.constant 2 : index
    %c0_92 = arith.constant 0 : index
    %82 = vector.load %arg17[%c0_89, %c0_90, %c2_91, %c0_92] : memref<2x10x10x32xf32, #tpu.memory_space<vmem>>, vector<2x8x8x32xf32>
    %83 = vector.shape_cast %82 : vector<2x8x8x32xf32> to vector<128x32xf32>
    %84 = arith.truncf %83 : vector<128x32xf32> to vector<128x32xbf16>
    %c0_93 = arith.constant 0 : index
    %c64_94 = arith.constant 64 : index
    %85 = vector.load %arg18[%c0_93, %c64_94] : memref<128x384xbf16, #tpu.memory_space<vmem>>, vector<128x32xbf16>
    tpu.vector_store %arg18[%c0_93, %c64_94], %84 {strides = array<i32>} : memref<128x384xbf16, #tpu.memory_space<vmem>>, vector<128x32xbf16>,
    %c0_95 = arith.constant 0 : index
    %c1_96 = arith.constant 1 : index
    %c0_97 = arith.constant 0 : index
    %c0_98 = arith.constant 0 : index
    %86 = vector.load %arg17[%c0_95, %c1_96, %c0_97, %c0_98] : memref<2x10x10x32xf32, #tpu.memory_space<vmem>>, vector<2x8x8x32xf32>
    %87 = vector.shape_cast %86 : vector<2x8x8x32xf32> to vector<128x32xf32>
    %88 = arith.truncf %87 : vector<128x32xf32> to vector<128x32xbf16>
    %c0_99 = arith.constant 0 : index
    %c96_100 = arith.constant 96 : index
    %89 = vector.load %arg18[%c0_99, %c96_100] : memref<128x384xbf16, #tpu.memory_space<vmem>>, vector<128x32xbf16>
    tpu.vector_store %arg18[%c0_99, %c96_100], %88 {strides = array<i32>} : memref<128x384xbf16, #tpu.memory_space<vmem>>, vector<128x32xbf16>,
    %c0_101 = arith.constant 0 : index
    %c1_102 = arith.constant 1 : index
    %c1_103 = arith.constant 1 : index
    %c0_104 = arith.constant 0 : index
    %90 = vector.load %arg17[%c0_101, %c1_102, %c1_103, %c0_104] : memref<2x10x10x32xf32, #tpu.memory_space<vmem>>, vector<2x8x8x32xf32>
    %91 = vector.shape_cast %90 : vector<2x8x8x32xf32> to vector<128x32xf32>
    %92 = arith.truncf %91 : vector<128x32xf32> to vector<128x32xbf16>
    %c0_105 = arith.constant 0 : index
    %c128_106 = arith.constant 128 : index
    %93 = vector.load %arg18[%c0_105, %c128_106] : memref<128x384xbf16, #tpu.memory_space<vmem>>, vector<128x32xbf16>
    tpu.vector_store %arg18[%c0_105, %c128_106], %92 {strides = array<i32>} : memref<128x384xbf16, #tpu.memory_space<vmem>>, vector<128x32xbf16>,
    %c0_107 = arith.constant 0 : index
    %c1_108 = arith.constant 1 : index
    %c2_109 = arith.constant 2 : index
    %c0_110 = arith.constant 0 : index
    %94 = vector.load %arg17[%c0_107, %c1_108, %c2_109, %c0_110] : memref<2x10x10x32xf32, #tpu.memory_space<vmem>>, vector<2x8x8x32xf32>
    %95 = vector.shape_cast %94 : vector<2x8x8x32xf32> to vector<128x32xf32>
    %96 = arith.truncf %95 : vector<128x32xf32> to vector<128x32xbf16>
    %c0_111 = arith.constant 0 : index
    %c160_112 = arith.constant 160 : index
    %97 = vector.load %arg18[%c0_111, %c160_112] : memref<128x384xbf16, #tpu.memory_space<vmem>>, vector<128x32xbf16>
    tpu.vector_store %arg18[%c0_111, %c160_112], %96 {strides = array<i32>} : memref<128x384xbf16, #tpu.memory_space<vmem>>, vector<128x32xbf16>,
    %c0_113 = arith.constant 0 : index
    %c2_114 = arith.constant 2 : index
    %c0_115 = arith.constant 0 : index
    %c0_116 = arith.constant 0 : index
    %98 = vector.load %arg17[%c0_113, %c2_114, %c0_115, %c0_116] : memref<2x10x10x32xf32, #tpu.memory_space<vmem>>, vector<2x8x8x32xf32>
    %99 = vector.shape_cast %98 : vector<2x8x8x32xf32> to vector<128x32xf32>
    %100 = arith.truncf %99 : vector<128x32xf32> to vector<128x32xbf16>
    %c0_117 = arith.constant 0 : index
    %c192_118 = arith.constant 192 : index
    %101 = vector.load %arg18[%c0_117, %c192_118] : memref<128x384xbf16, #tpu.memory_space<vmem>>, vector<128x32xbf16>
    tpu.vector_store %arg18[%c0_117, %c192_118], %100 {strides = array<i32>} : memref<128x384xbf16, #tpu.memory_space<vmem>>, vector<128x32xbf16>,
    %c0_119 = arith.constant 0 : index
    %c2_120 = arith.constant 2 : index
    %c1_121 = arith.constant 1 : index
    %c0_122 = arith.constant 0 : index
    %102 = vector.load %arg17[%c0_119, %c2_120, %c1_121, %c0_122] : memref<2x10x10x32xf32, #tpu.memory_space<vmem>>, vector<2x8x8x32xf32>
    %103 = vector.shape_cast %102 : vector<2x8x8x32xf32> to vector<128x32xf32>
    %104 = arith.truncf %103 : vector<128x32xf32> to vector<128x32xbf16>
    %c0_123 = arith.constant 0 : index
    %c224_124 = arith.constant 224 : index
    %105 = vector.load %arg18[%c0_123, %c224_124] : memref<128x384xbf16, #tpu.memory_space<vmem>>, vector<128x32xbf16>
    tpu.vector_store %arg18[%c0_123, %c224_124], %104 {strides = array<i32>} : memref<128x384xbf16, #tpu.memory_space<vmem>>, vector<128x32xbf16>,
    %c0_125 = arith.constant 0 : index
    %c2_126 = arith.constant 2 : index
    %c2_127 = arith.constant 2 : index
    %c0_128 = arith.constant 0 : index
    %106 = vector.load %arg17[%c0_125, %c2_126, %c2_127, %c0_128] : memref<2x10x10x32xf32, #tpu.memory_space<vmem>>, vector<2x8x8x32xf32>
    %107 = vector.shape_cast %106 : vector<2x8x8x32xf32> to vector<128x32xf32>
    %108 = arith.truncf %107 : vector<128x32xf32> to vector<128x32xbf16>
    %c0_129 = arith.constant 0 : index
    %c256_130 = arith.constant 256 : index
    %109 = vector.load %arg18[%c0_129, %c256_130] : memref<128x384xbf16, #tpu.memory_space<vmem>>, vector<128x32xbf16>
    tpu.vector_store %arg18[%c0_129, %c256_130], %108 {strides = array<i32>} : memref<128x384xbf16, #tpu.memory_space<vmem>>, vector<128x32xbf16>,
    %c0_131 = arith.constant 0 : index
    %c0_132 = arith.constant 0 : index
    %110 = vector.load %arg18[%c0_131, %c0_132] : memref<128x384xbf16, #tpu.memory_space<vmem>>, vector<128x384xbf16>
    %c0_133 = arith.constant 0 : index
    %c0_134 = arith.constant 0 : index
    %111 = vector.load %arg5[%c0_133, %c0_134] : memref<384x32xbf16, #tpu.memory_space<vmem>>, vector<384x32xbf16>
    %cst_135 = arith.constant dense<0.000000e+00> : vector<128x32xf32>
    %112 = tpu.matmul %110, %111, %cst_135 {dimension_numbers = #tpu.dot_dimension_numbers<[1], [0], [0], [1], [0, 0, 1, 1], [], []>} : vector<128x384xbf16>, vector<384x32xbf16>, vector<128x32xf32> -> vector<128x32xf32>
    %c0_136 = arith.constant 0 : index
    %c0_137 = arith.constant 0 : index
    %113 = vector.load %arg6[%c0_136, %c0_137] : memref<1x32xf32, #tpu.memory_space<vmem>>, vector<1x32xf32>
    %c0_138 = arith.constant 0 : index
    %c0_139 = arith.constant 0 : index
    %114 = vector.load %arg7[%c0_138, %c0_139] : memref<1x32xf32, #tpu.memory_space<vmem>>, vector<1x32xf32>
    %cst_140 = arith.constant dense<0.000000e+00> : vector<32xf32>
    %115 = vector.multi_reduction <add>, %112, %cst_140 [0] : vector<128x32xf32> to vector<32xf32>
    %116 = vector.shape_cast %115 : vector<32xf32> to vector<1x32xf32>
    %cst_141 = arith.constant 7.812500e-03 : f32
    %117 = vector.broadcast %cst_141 : f32 to vector<1x32xf32>
    %118 = arith.mulf %116, %117 : vector<1x32xf32>
    %119 = arith.mulf %112, %112 : vector<128x32xf32>
    %cst_142 = arith.constant dense<0.000000e+00> : vector<32xf32>
    %120 = vector.multi_reduction <add>, %119, %cst_142 [0] : vector<128x32xf32> to vector<32xf32>
    %121 = vector.shape_cast %120 : vector<32xf32> to vector<1x32xf32>
    %cst_143 = arith.constant 7.812500e-03 : f32
    %122 = vector.broadcast %cst_143 : f32 to vector<1x32xf32>
    %123 = arith.mulf %121, %122 : vector<1x32xf32>
    %124 = arith.mulf %118, %118 : vector<1x32xf32>
    %125 = arith.subf %123, %124 : vector<1x32xf32>
    %cst_144 = arith.constant 9.99999974E-6 : f32
    %126 = vector.broadcast %cst_144 : f32 to vector<1x32xf32>
    %127 = arith.addf %125, %126 : vector<1x32xf32>
    %128 = math.rsqrt %127 : vector<1x32xf32>
    %129 = arith.mulf %113, %128 : vector<1x32xf32>
    %130 = arith.mulf %118, %129 : vector<1x32xf32>
    %131 = arith.subf %114, %130 : vector<1x32xf32>
    %132 = vector.broadcast %129 : vector<1x32xf32> to vector<128x32xf32>
    %133 = arith.mulf %112, %132 : vector<128x32xf32>
    %134 = vector.broadcast %131 : vector<1x32xf32> to vector<128x32xf32>
    %135 = arith.addf %133, %134 : vector<128x32xf32>
    %136 = arith.addf %135, %5 : vector<128x32xf32>
    %cst_145 = arith.constant 0.000000e+00 : f32
    %137 = vector.broadcast %cst_145 : f32 to vector<128x32xf32>
    %138 = arith.maximumf %136, %137 : vector<128x32xf32>
    %139 = vector.shape_cast %138 : vector<128x32xf32> to vector<2x8x8x32xf32>
    %c0_146 = arith.constant 0 : index
    %c1_147 = arith.constant 1 : index
    %c1_148 = arith.constant 1 : index
    %c0_149 = arith.constant 0 : index
    %140 = vector.load %arg17[%c0_146, %c1_147, %c1_148, %c0_149] : memref<2x10x10x32xf32, #tpu.memory_space<vmem>>, vector<2x8x8x32xf32>
    tpu.vector_store %arg17[%c0_146, %c1_147, %c1_148, %c0_149], %139 {strides = array<i32>} : memref<2x10x10x32xf32, #tpu.memory_space<vmem>>, vector<2x8x8x32xf32>,
    %c0_150 = arith.constant 0 : index
    %c0_151 = arith.constant 0 : index
    %c0_152 = arith.constant 0 : index
    %c0_153 = arith.constant 0 : index
    %141 = vector.load %arg17[%c0_150, %c0_151, %c0_152, %c0_153] : memref<2x10x10x32xf32, #tpu.memory_space<vmem>>, vector<2x8x8x32xf32>
    %142 = vector.shape_cast %141 : vector<2x8x8x32xf32> to vector<128x32xf32>
    %143 = arith.truncf %142 : vector<128x32xf32> to vector<128x32xbf16>
    %c0_154 = arith.constant 0 : index
    %c0_155 = arith.constant 0 : index
    %144 = vector.load %arg18[%c0_154, %c0_155] : memref<128x384xbf16, #tpu.memory_space<vmem>>, vector<128x32xbf16>
    tpu.vector_store %arg18[%c0_154, %c0_155], %143 {strides = array<i32>} : memref<128x384xbf16, #tpu.memory_space<vmem>>, vector<128x32xbf16>,
    %c0_156 = arith.constant 0 : index
    %c0_157 = arith.constant 0 : index
    %c1_158 = arith.constant 1 : index
    %c0_159 = arith.constant 0 : index
    %145 = vector.load %arg17[%c0_156, %c0_157, %c1_158, %c0_159] : memref<2x10x10x32xf32, #tpu.memory_space<vmem>>, vector<2x8x8x32xf32>
    %146 = vector.shape_cast %145 : vector<2x8x8x32xf32> to vector<128x32xf32>
    %147 = arith.truncf %146 : vector<128x32xf32> to vector<128x32xbf16>
    %c0_160 = arith.constant 0 : index
    %c32_161 = arith.constant 32 : index
    %148 = vector.load %arg18[%c0_160, %c32_161] : memref<128x384xbf16, #tpu.memory_space<vmem>>, vector<128x32xbf16>
    tpu.vector_store %arg18[%c0_160, %c32_161], %147 {strides = array<i32>} : memref<128x384xbf16, #tpu.memory_space<vmem>>, vector<128x32xbf16>,
    %c0_162 = arith.constant 0 : index
    %c0_163 = arith.constant 0 : index
    %c2_164 = arith.constant 2 : index
    %c0_165 = arith.constant 0 : index
    %149 = vector.load %arg17[%c0_162, %c0_163, %c2_164, %c0_165] : memref<2x10x10x32xf32, #tpu.memory_space<vmem>>, vector<2x8x8x32xf32>
    %150 = vector.shape_cast %149 : vector<2x8x8x32xf32> to vector<128x32xf32>
    %151 = arith.truncf %150 : vector<128x32xf32> to vector<128x32xbf16>
    %c0_166 = arith.constant 0 : index
    %c64_167 = arith.constant 64 : index
    %152 = vector.load %arg18[%c0_166, %c64_167] : memref<128x384xbf16, #tpu.memory_space<vmem>>, vector<128x32xbf16>
    tpu.vector_store %arg18[%c0_166, %c64_167], %151 {strides = array<i32>} : memref<128x384xbf16, #tpu.memory_space<vmem>>, vector<128x32xbf16>,
    %c0_168 = arith.constant 0 : index
    %c1_169 = arith.constant 1 : index
    %c0_170 = arith.constant 0 : index
    %c0_171 = arith.constant 0 : index
    %153 = vector.load %arg17[%c0_168, %c1_169, %c0_170, %c0_171] : memref<2x10x10x32xf32, #tpu.memory_space<vmem>>, vector<2x8x8x32xf32>
    %154 = vector.shape_cast %153 : vector<2x8x8x32xf32> to vector<128x32xf32>
    %155 = arith.truncf %154 : vector<128x32xf32> to vector<128x32xbf16>
    %c0_172 = arith.constant 0 : index
    %c96_173 = arith.constant 96 : index
    %156 = vector.load %arg18[%c0_172, %c96_173] : memref<128x384xbf16, #tpu.memory_space<vmem>>, vector<128x32xbf16>
    tpu.vector_store %arg18[%c0_172, %c96_173], %155 {strides = array<i32>} : memref<128x384xbf16, #tpu.memory_space<vmem>>, vector<128x32xbf16>,
    %c0_174 = arith.constant 0 : index
    %c1_175 = arith.constant 1 : index
    %c1_176 = arith.constant 1 : index
    %c0_177 = arith.constant 0 : index
    %157 = vector.load %arg17[%c0_174, %c1_175, %c1_176, %c0_177] : memref<2x10x10x32xf32, #tpu.memory_space<vmem>>, vector<2x8x8x32xf32>
    %158 = vector.shape_cast %157 : vector<2x8x8x32xf32> to vector<128x32xf32>
    %159 = arith.truncf %158 : vector<128x32xf32> to vector<128x32xbf16>
    %c0_178 = arith.constant 0 : index
    %c128_179 = arith.constant 128 : index
    %160 = vector.load %arg18[%c0_178, %c128_179] : memref<128x384xbf16, #tpu.memory_space<vmem>>, vector<128x32xbf16>
    tpu.vector_store %arg18[%c0_178, %c128_179], %159 {strides = array<i32>} : memref<128x384xbf16, #tpu.memory_space<vmem>>, vector<128x32xbf16>,
    %c0_180 = arith.constant 0 : index
    %c1_181 = arith.constant 1 : index
    %c2_182 = arith.constant 2 : index
    %c0_183 = arith.constant 0 : index
    %161 = vector.load %arg17[%c0_180, %c1_181, %c2_182, %c0_183] : memref<2x10x10x32xf32, #tpu.memory_space<vmem>>, vector<2x8x8x32xf32>
    %162 = vector.shape_cast %161 : vector<2x8x8x32xf32> to vector<128x32xf32>
    %163 = arith.truncf %162 : vector<128x32xf32> to vector<128x32xbf16>
    %c0_184 = arith.constant 0 : index
    %c160_185 = arith.constant 160 : index
    %164 = vector.load %arg18[%c0_184, %c160_185] : memref<128x384xbf16, #tpu.memory_space<vmem>>, vector<128x32xbf16>
    tpu.vector_store %arg18[%c0_184, %c160_185], %163 {strides = array<i32>} : memref<128x384xbf16, #tpu.memory_space<vmem>>, vector<128x32xbf16>,
    %c0_186 = arith.constant 0 : index
    %c2_187 = arith.constant 2 : index
    %c0_188 = arith.constant 0 : index
    %c0_189 = arith.constant 0 : index
    %165 = vector.load %arg17[%c0_186, %c2_187, %c0_188, %c0_189] : memref<2x10x10x32xf32, #tpu.memory_space<vmem>>, vector<2x8x8x32xf32>
    %166 = vector.shape_cast %165 : vector<2x8x8x32xf32> to vector<128x32xf32>
    %167 = arith.truncf %166 : vector<128x32xf32> to vector<128x32xbf16>
    %c0_190 = arith.constant 0 : index
    %c192_191 = arith.constant 192 : index
    %168 = vector.load %arg18[%c0_190, %c192_191] : memref<128x384xbf16, #tpu.memory_space<vmem>>, vector<128x32xbf16>
    tpu.vector_store %arg18[%c0_190, %c192_191], %167 {strides = array<i32>} : memref<128x384xbf16, #tpu.memory_space<vmem>>, vector<128x32xbf16>,
    %c0_192 = arith.constant 0 : index
    %c2_193 = arith.constant 2 : index
    %c1_194 = arith.constant 1 : index
    %c0_195 = arith.constant 0 : index
    %169 = vector.load %arg17[%c0_192, %c2_193, %c1_194, %c0_195] : memref<2x10x10x32xf32, #tpu.memory_space<vmem>>, vector<2x8x8x32xf32>
    %170 = vector.shape_cast %169 : vector<2x8x8x32xf32> to vector<128x32xf32>
    %171 = arith.truncf %170 : vector<128x32xf32> to vector<128x32xbf16>
    %c0_196 = arith.constant 0 : index
    %c224_197 = arith.constant 224 : index
    %172 = vector.load %arg18[%c0_196, %c224_197] : memref<128x384xbf16, #tpu.memory_space<vmem>>, vector<128x32xbf16>
    tpu.vector_store %arg18[%c0_196, %c224_197], %171 {strides = array<i32>} : memref<128x384xbf16, #tpu.memory_space<vmem>>, vector<128x32xbf16>,
    %c0_198 = arith.constant 0 : index
    %c2_199 = arith.constant 2 : index
    %c2_200 = arith.constant 2 : index
    %c0_201 = arith.constant 0 : index
    %173 = vector.load %arg17[%c0_198, %c2_199, %c2_200, %c0_201] : memref<2x10x10x32xf32, #tpu.memory_space<vmem>>, vector<2x8x8x32xf32>
    %174 = vector.shape_cast %173 : vector<2x8x8x32xf32> to vector<128x32xf32>
    %175 = arith.truncf %174 : vector<128x32xf32> to vector<128x32xbf16>
    %c0_202 = arith.constant 0 : index
    %c256_203 = arith.constant 256 : index
    %176 = vector.load %arg18[%c0_202, %c256_203] : memref<128x384xbf16, #tpu.memory_space<vmem>>, vector<128x32xbf16>
    tpu.vector_store %arg18[%c0_202, %c256_203], %175 {strides = array<i32>} : memref<128x384xbf16, #tpu.memory_space<vmem>>, vector<128x32xbf16>,
    %c0_204 = arith.constant 0 : index
    %c0_205 = arith.constant 0 : index
    %177 = vector.load %arg18[%c0_204, %c0_205] : memref<128x384xbf16, #tpu.memory_space<vmem>>, vector<128x384xbf16>
    %c0_206 = arith.constant 0 : index
    %c0_207 = arith.constant 0 : index
    %178 = vector.load %arg8[%c0_206, %c0_207] : memref<384x32xbf16, #tpu.memory_space<vmem>>, vector<384x32xbf16>
    %cst_208 = arith.constant dense<0.000000e+00> : vector<128x32xf32>
    %179 = tpu.matmul %177, %178, %cst_208 {dimension_numbers = #tpu.dot_dimension_numbers<[1], [0], [0], [1], [0, 0, 1, 1], [], []>} : vector<128x384xbf16>, vector<384x32xbf16>, vector<128x32xf32> -> vector<128x32xf32>
    %c0_209 = arith.constant 0 : index
    %c0_210 = arith.constant 0 : index
    %180 = vector.load %arg9[%c0_209, %c0_210] : memref<1x32xf32, #tpu.memory_space<vmem>>, vector<1x32xf32>
    %c0_211 = arith.constant 0 : index
    %c0_212 = arith.constant 0 : index
    %181 = vector.load %arg10[%c0_211, %c0_212] : memref<1x32xf32, #tpu.memory_space<vmem>>, vector<1x32xf32>
    %cst_213 = arith.constant dense<0.000000e+00> : vector<32xf32>
    %182 = vector.multi_reduction <add>, %179, %cst_213 [0] : vector<128x32xf32> to vector<32xf32>
    %183 = vector.shape_cast %182 : vector<32xf32> to vector<1x32xf32>
    %cst_214 = arith.constant 7.812500e-03 : f32
    %184 = vector.broadcast %cst_214 : f32 to vector<1x32xf32>
    %185 = arith.mulf %183, %184 : vector<1x32xf32>
    %186 = arith.mulf %179, %179 : vector<128x32xf32>
    %cst_215 = arith.constant dense<0.000000e+00> : vector<32xf32>
    %187 = vector.multi_reduction <add>, %186, %cst_215 [0] : vector<128x32xf32> to vector<32xf32>
    %188 = vector.shape_cast %187 : vector<32xf32> to vector<1x32xf32>
    %cst_216 = arith.constant 7.812500e-03 : f32
    %189 = vector.broadcast %cst_216 : f32 to vector<1x32xf32>
    %190 = arith.mulf %188, %189 : vector<1x32xf32>
    %191 = arith.mulf %185, %185 : vector<1x32xf32>
    %192 = arith.subf %190, %191 : vector<1x32xf32>
    %cst_217 = arith.constant 9.99999974E-6 : f32
    %193 = vector.broadcast %cst_217 : f32 to vector<1x32xf32>
    %194 = arith.addf %192, %193 : vector<1x32xf32>
    %195 = math.rsqrt %194 : vector<1x32xf32>
    %196 = arith.mulf %180, %195 : vector<1x32xf32>
    %197 = arith.mulf %185, %196 : vector<1x32xf32>
    %198 = arith.subf %181, %197 : vector<1x32xf32>
    %199 = vector.broadcast %196 : vector<1x32xf32> to vector<128x32xf32>
    %200 = arith.mulf %179, %199 : vector<128x32xf32>
    %201 = vector.broadcast %198 : vector<1x32xf32> to vector<128x32xf32>
    %202 = arith.addf %200, %201 : vector<128x32xf32>
    %cst_218 = arith.constant 0.000000e+00 : f32
    %203 = vector.broadcast %cst_218 : f32 to vector<128x32xf32>
    %204 = arith.maximumf %202, %203 : vector<128x32xf32>
    %205 = vector.shape_cast %204 : vector<128x32xf32> to vector<2x8x8x32xf32>
    %c0_219 = arith.constant 0 : index
    %c1_220 = arith.constant 1 : index
    %c1_221 = arith.constant 1 : index
    %c0_222 = arith.constant 0 : index
    %206 = vector.load %arg17[%c0_219, %c1_220, %c1_221, %c0_222] : memref<2x10x10x32xf32, #tpu.memory_space<vmem>>, vector<2x8x8x32xf32>
    tpu.vector_store %arg17[%c0_219, %c1_220, %c1_221, %c0_222], %205 {strides = array<i32>} : memref<2x10x10x32xf32, #tpu.memory_space<vmem>>, vector<2x8x8x32xf32>,
    %c0_223 = arith.constant 0 : index
    %c0_224 = arith.constant 0 : index
    %c0_225 = arith.constant 0 : index
    %c0_226 = arith.constant 0 : index
    %207 = vector.load %arg17[%c0_223, %c0_224, %c0_225, %c0_226] : memref<2x10x10x32xf32, #tpu.memory_space<vmem>>, vector<2x8x8x32xf32>
    %208 = vector.shape_cast %207 : vector<2x8x8x32xf32> to vector<128x32xf32>
    %209 = arith.truncf %208 : vector<128x32xf32> to vector<128x32xbf16>
    %c0_227 = arith.constant 0 : index
    %c0_228 = arith.constant 0 : index
    %210 = vector.load %arg18[%c0_227, %c0_228] : memref<128x384xbf16, #tpu.memory_space<vmem>>, vector<128x32xbf16>
    tpu.vector_store %arg18[%c0_227, %c0_228], %209 {strides = array<i32>} : memref<128x384xbf16, #tpu.memory_space<vmem>>, vector<128x32xbf16>,
    %c0_229 = arith.constant 0 : index
    %c0_230 = arith.constant 0 : index
    %c1_231 = arith.constant 1 : index
    %c0_232 = arith.constant 0 : index
    %211 = vector.load %arg17[%c0_229, %c0_230, %c1_231, %c0_232] : memref<2x10x10x32xf32, #tpu.memory_space<vmem>>, vector<2x8x8x32xf32>
    %212 = vector.shape_cast %211 : vector<2x8x8x32xf32> to vector<128x32xf32>
    %213 = arith.truncf %212 : vector<128x32xf32> to vector<128x32xbf16>
    %c0_233 = arith.constant 0 : index
    %c32_234 = arith.constant 32 : index
    %214 = vector.load %arg18[%c0_233, %c32_234] : memref<128x384xbf16, #tpu.memory_space<vmem>>, vector<128x32xbf16>
    tpu.vector_store %arg18[%c0_233, %c32_234], %213 {strides = array<i32>} : memref<128x384xbf16, #tpu.memory_space<vmem>>, vector<128x32xbf16>,
    %c0_235 = arith.constant 0 : index
    %c0_236 = arith.constant 0 : index
    %c2_237 = arith.constant 2 : index
    %c0_238 = arith.constant 0 : index
    %215 = vector.load %arg17[%c0_235, %c0_236, %c2_237, %c0_238] : memref<2x10x10x32xf32, #tpu.memory_space<vmem>>, vector<2x8x8x32xf32>
    %216 = vector.shape_cast %215 : vector<2x8x8x32xf32> to vector<128x32xf32>
    %217 = arith.truncf %216 : vector<128x32xf32> to vector<128x32xbf16>
    %c0_239 = arith.constant 0 : index
    %c64_240 = arith.constant 64 : index
    %218 = vector.load %arg18[%c0_239, %c64_240] : memref<128x384xbf16, #tpu.memory_space<vmem>>, vector<128x32xbf16>
    tpu.vector_store %arg18[%c0_239, %c64_240], %217 {strides = array<i32>} : memref<128x384xbf16, #tpu.memory_space<vmem>>, vector<128x32xbf16>,
    %c0_241 = arith.constant 0 : index
    %c1_242 = arith.constant 1 : index
    %c0_243 = arith.constant 0 : index
    %c0_244 = arith.constant 0 : index
    %219 = vector.load %arg17[%c0_241, %c1_242, %c0_243, %c0_244] : memref<2x10x10x32xf32, #tpu.memory_space<vmem>>, vector<2x8x8x32xf32>
    %220 = vector.shape_cast %219 : vector<2x8x8x32xf32> to vector<128x32xf32>
    %221 = arith.truncf %220 : vector<128x32xf32> to vector<128x32xbf16>
    %c0_245 = arith.constant 0 : index
    %c96_246 = arith.constant 96 : index
    %222 = vector.load %arg18[%c0_245, %c96_246] : memref<128x384xbf16, #tpu.memory_space<vmem>>, vector<128x32xbf16>
    tpu.vector_store %arg18[%c0_245, %c96_246], %221 {strides = array<i32>} : memref<128x384xbf16, #tpu.memory_space<vmem>>, vector<128x32xbf16>,
    %c0_247 = arith.constant 0 : index
    %c1_248 = arith.constant 1 : index
    %c1_249 = arith.constant 1 : index
    %c0_250 = arith.constant 0 : index
    %223 = vector.load %arg17[%c0_247, %c1_248, %c1_249, %c0_250] : memref<2x10x10x32xf32, #tpu.memory_space<vmem>>, vector<2x8x8x32xf32>
    %224 = vector.shape_cast %223 : vector<2x8x8x32xf32> to vector<128x32xf32>
    %225 = arith.truncf %224 : vector<128x32xf32> to vector<128x32xbf16>
    %c0_251 = arith.constant 0 : index
    %c128_252 = arith.constant 128 : index
    %226 = vector.load %arg18[%c0_251, %c128_252] : memref<128x384xbf16, #tpu.memory_space<vmem>>, vector<128x32xbf16>
    tpu.vector_store %arg18[%c0_251, %c128_252], %225 {strides = array<i32>} : memref<128x384xbf16, #tpu.memory_space<vmem>>, vector<128x32xbf16>,
    %c0_253 = arith.constant 0 : index
    %c1_254 = arith.constant 1 : index
    %c2_255 = arith.constant 2 : index
    %c0_256 = arith.constant 0 : index
    %227 = vector.load %arg17[%c0_253, %c1_254, %c2_255, %c0_256] : memref<2x10x10x32xf32, #tpu.memory_space<vmem>>, vector<2x8x8x32xf32>
    %228 = vector.shape_cast %227 : vector<2x8x8x32xf32> to vector<128x32xf32>
    %229 = arith.truncf %228 : vector<128x32xf32> to vector<128x32xbf16>
    %c0_257 = arith.constant 0 : index
    %c160_258 = arith.constant 160 : index
    %230 = vector.load %arg18[%c0_257, %c160_258] : memref<128x384xbf16, #tpu.memory_space<vmem>>, vector<128x32xbf16>
    tpu.vector_store %arg18[%c0_257, %c160_258], %229 {strides = array<i32>} : memref<128x384xbf16, #tpu.memory_space<vmem>>, vector<128x32xbf16>,
    %c0_259 = arith.constant 0 : index
    %c2_260 = arith.constant 2 : index
    %c0_261 = arith.constant 0 : index
    %c0_262 = arith.constant 0 : index
    %231 = vector.load %arg17[%c0_259, %c2_260, %c0_261, %c0_262] : memref<2x10x10x32xf32, #tpu.memory_space<vmem>>, vector<2x8x8x32xf32>
    %232 = vector.shape_cast %231 : vector<2x8x8x32xf32> to vector<128x32xf32>
    %233 = arith.truncf %232 : vector<128x32xf32> to vector<128x32xbf16>
    %c0_263 = arith.constant 0 : index
    %c192_264 = arith.constant 192 : index
    %234 = vector.load %arg18[%c0_263, %c192_264] : memref<128x384xbf16, #tpu.memory_space<vmem>>, vector<128x32xbf16>
    tpu.vector_store %arg18[%c0_263, %c192_264], %233 {strides = array<i32>} : memref<128x384xbf16, #tpu.memory_space<vmem>>, vector<128x32xbf16>,
    %c0_265 = arith.constant 0 : index
    %c2_266 = arith.constant 2 : index
    %c1_267 = arith.constant 1 : index
    %c0_268 = arith.constant 0 : index
    %235 = vector.load %arg17[%c0_265, %c2_266, %c1_267, %c0_268] : memref<2x10x10x32xf32, #tpu.memory_space<vmem>>, vector<2x8x8x32xf32>
    %236 = vector.shape_cast %235 : vector<2x8x8x32xf32> to vector<128x32xf32>
    %237 = arith.truncf %236 : vector<128x32xf32> to vector<128x32xbf16>
    %c0_269 = arith.constant 0 : index
    %c224_270 = arith.constant 224 : index
    %238 = vector.load %arg18[%c0_269, %c224_270] : memref<128x384xbf16, #tpu.memory_space<vmem>>, vector<128x32xbf16>
    tpu.vector_store %arg18[%c0_269, %c224_270], %237 {strides = array<i32>} : memref<128x384xbf16, #tpu.memory_space<vmem>>, vector<128x32xbf16>,
    %c0_271 = arith.constant 0 : index
    %c2_272 = arith.constant 2 : index
    %c2_273 = arith.constant 2 : index
    %c0_274 = arith.constant 0 : index
    %239 = vector.load %arg17[%c0_271, %c2_272, %c2_273, %c0_274] : memref<2x10x10x32xf32, #tpu.memory_space<vmem>>, vector<2x8x8x32xf32>
    %240 = vector.shape_cast %239 : vector<2x8x8x32xf32> to vector<128x32xf32>
    %241 = arith.truncf %240 : vector<128x32xf32> to vector<128x32xbf16>
    %c0_275 = arith.constant 0 : index
    %c256_276 = arith.constant 256 : index
    %242 = vector.load %arg18[%c0_275, %c256_276] : memref<128x384xbf16, #tpu.memory_space<vmem>>, vector<128x32xbf16>
    tpu.vector_store %arg18[%c0_275, %c256_276], %241 {strides = array<i32>} : memref<128x384xbf16, #tpu.memory_space<vmem>>, vector<128x32xbf16>,
    %c0_277 = arith.constant 0 : index
    %c0_278 = arith.constant 0 : index
    %243 = vector.load %arg18[%c0_277, %c0_278] : memref<128x384xbf16, #tpu.memory_space<vmem>>, vector<128x384xbf16>
    %c0_279 = arith.constant 0 : index
    %c0_280 = arith.constant 0 : index
    %244 = vector.load %arg11[%c0_279, %c0_280] : memref<384x32xbf16, #tpu.memory_space<vmem>>, vector<384x32xbf16>
    %cst_281 = arith.constant dense<0.000000e+00> : vector<128x32xf32>
    %245 = tpu.matmul %243, %244, %cst_281 {dimension_numbers = #tpu.dot_dimension_numbers<[1], [0], [0], [1], [0, 0, 1, 1], [], []>} : vector<128x384xbf16>, vector<384x32xbf16>, vector<128x32xf32> -> vector<128x32xf32>
    %c0_282 = arith.constant 0 : index
    %c0_283 = arith.constant 0 : index
    %246 = vector.load %arg12[%c0_282, %c0_283] : memref<1x32xf32, #tpu.memory_space<vmem>>, vector<1x32xf32>
    %c0_284 = arith.constant 0 : index
    %c0_285 = arith.constant 0 : index
    %247 = vector.load %arg13[%c0_284, %c0_285] : memref<1x32xf32, #tpu.memory_space<vmem>>, vector<1x32xf32>
    %cst_286 = arith.constant dense<0.000000e+00> : vector<32xf32>
    %248 = vector.multi_reduction <add>, %245, %cst_286 [0] : vector<128x32xf32> to vector<32xf32>
    %249 = vector.shape_cast %248 : vector<32xf32> to vector<1x32xf32>
    %cst_287 = arith.constant 7.812500e-03 : f32
    %250 = vector.broadcast %cst_287 : f32 to vector<1x32xf32>
    %251 = arith.mulf %249, %250 : vector<1x32xf32>
    %252 = arith.mulf %245, %245 : vector<128x32xf32>
    %cst_288 = arith.constant dense<0.000000e+00> : vector<32xf32>
    %253 = vector.multi_reduction <add>, %252, %cst_288 [0] : vector<128x32xf32> to vector<32xf32>
    %254 = vector.shape_cast %253 : vector<32xf32> to vector<1x32xf32>
    %cst_289 = arith.constant 7.812500e-03 : f32
    %255 = vector.broadcast %cst_289 : f32 to vector<1x32xf32>
    %256 = arith.mulf %254, %255 : vector<1x32xf32>
    %257 = arith.mulf %251, %251 : vector<1x32xf32>
    %258 = arith.subf %256, %257 : vector<1x32xf32>
    %cst_290 = arith.constant 9.99999974E-6 : f32
    %259 = vector.broadcast %cst_290 : f32 to vector<1x32xf32>
    %260 = arith.addf %258, %259 : vector<1x32xf32>
    %261 = math.rsqrt %260 : vector<1x32xf32>
    %262 = arith.mulf %246, %261 : vector<1x32xf32>
    %263 = arith.mulf %251, %262 : vector<1x32xf32>
    %264 = arith.subf %247, %263 : vector<1x32xf32>
    %265 = vector.broadcast %262 : vector<1x32xf32> to vector<128x32xf32>
    %266 = arith.mulf %245, %265 : vector<128x32xf32>
    %267 = vector.broadcast %264 : vector<1x32xf32> to vector<128x32xf32>
    %268 = arith.addf %266, %267 : vector<128x32xf32>
    %269 = arith.addf %268, %138 : vector<128x32xf32>
    %cst_291 = arith.constant 0.000000e+00 : f32
    %270 = vector.broadcast %cst_291 : f32 to vector<128x32xf32>
    %271 = arith.maximumf %269, %270 : vector<128x32xf32>
    %272 = vector.shape_cast %271 : vector<128x32xf32> to vector<2x64x32xf32>
    %c0_292 = arith.constant 0 : index
    %c0_293 = arith.constant 0 : index
    %273 = vector.load %arg14[%c0_292, %c0_293] : memref<64x32xf32, #tpu.memory_space<vmem>>, vector<64x32xf32>
    %274 = vector.shape_cast %273 : vector<64x32xf32> to vector<1x64x32xf32>
    %275 = vector.broadcast %274 : vector<1x64x32xf32> to vector<2x64x32xf32>
    %276 = arith.mulf %272, %275 : vector<2x64x32xf32>
    %cst_294 = arith.constant dense<0.000000e+00> : vector<2x32xf32>
    %277 = vector.multi_reduction <add>, %276, %cst_294 [1] : vector<2x64x32xf32> to vector<2x32xf32>
    %cst_295 = arith.constant dense<0.000000e+00> : vector<2xf32>
    %278 = vector.multi_reduction <add>, %277, %cst_295 [1] : vector<2x32xf32> to vector<2xf32>
    %279 = vector.shape_cast %278 : vector<2xf32> to vector<2x1xf32>
    %c0_296 = arith.constant 0 : index
    %c0_297 = arith.constant 0 : index
    %280 = vector.load %arg15[%c0_296, %c0_297] : memref<1x1xf32, #tpu.memory_space<vmem>>, vector<1x1xf32>
    %281 = vector.broadcast %280 : vector<1x1xf32> to vector<2x1xf32>
    %282 = arith.addf %279, %281 : vector<2x1xf32>
    %283 = arith.negf %282 : vector<2x1xf32>
    %284 = math.exp %283 : vector<2x1xf32>
    %cst_298 = arith.constant 1.000000e+00 : f32
    %285 = vector.broadcast %cst_298 : f32 to vector<2x1xf32>
    %286 = arith.addf %285, %284 : vector<2x1xf32>
    %287 = arith.divf %285, %286 : vector<2x1xf32>
    %c0_299 = arith.constant 0 : index
    %c0_300 = arith.constant 0 : index
    %288 = vector.load %arg16[%c0_299, %c0_300] : memref<2x1xf32, #tpu.memory_space<vmem>>, vector<2x1xf32>
    tpu.vector_store %arg16[%c0_299, %c0_300], %287 {strides = array<i32>} : memref<2x1xf32, #tpu.memory_space<vmem>>, vector<2x1xf32>,
    return
  }
  func.func @transform_0(%arg0: i32) -> (i32, i32, i32, i32) {
    %c0_i32 = arith.constant 0 : i32
    %c0_i32_0 = arith.constant 0 : i32
    %c0_i32_1 = arith.constant 0 : i32
    %c0_i32_2 = arith.constant 0 : i32
    %c0_i32_3 = arith.constant 0 : i32
    return %c0_i32, %c0_i32_0, %c0_i32_1, %c0_i32_2 : i32, i32, i32, i32
  }
  func.func @transform_1(%arg0: i32) -> (i32, i32) {
    %c0_i32 = arith.constant 0 : i32
    %c0_i32_0 = arith.constant 0 : i32
    %c0_i32_1 = arith.constant 0 : i32
    return %c0_i32, %c0_i32_0 : i32, i32
  }
  func.func @transform_2(%arg0: i32) -> (i32, i32) {
    %c0_i32 = arith.constant 0 : i32
    %c0_i32_0 = arith.constant 0 : i32
    %c0_i32_1 = arith.constant 0 : i32
    return %c0_i32, %c0_i32_0 : i32, i32
  }
  func.func @transform_3(%arg0: i32) -> (i32, i32) {
    %c0_i32 = arith.constant 0 : i32
    %c0_i32_0 = arith.constant 0 : i32
    %c0_i32_1 = arith.constant 0 : i32
    return %c0_i32, %c0_i32_0 : i32, i32
  }
  func.func @transform_4(%arg0: i32) -> (i32, i32) {
    %c0_i32 = arith.constant 0 : i32
    %c0_i32_0 = arith.constant 0 : i32
    %c0_i32_1 = arith.constant 0 : i32
    return %c0_i32, %c0_i32_0 : i32, i32
  }
  func.func @transform_5(%arg0: i32) -> (i32, i32) {
    %c0_i32 = arith.constant 0 : i32
    %c0_i32_0 = arith.constant 0 : i32
    %c0_i32_1 = arith.constant 0 : i32
    return %c0_i32, %c0_i32_0 : i32, i32
  }
  func.func @transform_6(%arg0: i32) -> (i32, i32) {
    %c0_i32 = arith.constant 0 : i32
    %c0_i32_0 = arith.constant 0 : i32
    %c0_i32_1 = arith.constant 0 : i32
    return %c0_i32, %c0_i32_0 : i32, i32
  }
  func.func @transform_7(%arg0: i32) -> (i32, i32) {
    %c0_i32 = arith.constant 0 : i32
    %c0_i32_0 = arith.constant 0 : i32
    %c0_i32_1 = arith.constant 0 : i32
    return %c0_i32, %c0_i32_0 : i32, i32
  }
  func.func @transform_8(%arg0: i32) -> (i32, i32) {
    %c0_i32 = arith.constant 0 : i32
    %c0_i32_0 = arith.constant 0 : i32
    %c0_i32_1 = arith.constant 0 : i32
    return %c0_i32, %c0_i32_0 : i32, i32
  }
  func.func @transform_9(%arg0: i32) -> (i32, i32) {
    %c0_i32 = arith.constant 0 : i32
    %c0_i32_0 = arith.constant 0 : i32
    %c0_i32_1 = arith.constant 0 : i32
    return %c0_i32, %c0_i32_0 : i32, i32
  }
  func.func @transform_10(%arg0: i32) -> (i32, i32) {
    %c0_i32 = arith.constant 0 : i32
    %c0_i32_0 = arith.constant 0 : i32
    %c0_i32_1 = arith.constant 0 : i32
    return %c0_i32, %c0_i32_0 : i32, i32
  }
  func.func @transform_11(%arg0: i32) -> (i32, i32) {
    %c0_i32 = arith.constant 0 : i32
    %c0_i32_0 = arith.constant 0 : i32
    %c0_i32_1 = arith.constant 0 : i32
    return %c0_i32, %c0_i32_0 : i32, i32
  }
  func.func @transform_12(%arg0: i32) -> (i32, i32) {
    %c0_i32 = arith.constant 0 : i32
    %c0_i32_0 = arith.constant 0 : i32
    %c0_i32_1 = arith.constant 0 : i32
    return %c0_i32, %c0_i32_0 : i32, i32
  }
  func.func @transform_13(%arg0: i32) -> (i32, i32) {
    %c0_i32 = arith.constant 0 : i32
    %c0_i32_0 = arith.constant 0 : i32
    %c0_i32_1 = arith.constant 0 : i32
    return %c0_i32, %c0_i32_0 : i32, i32
  }
  func.func @transform_14(%arg0: i32) -> (i32, i32) {
    %c0_i32 = arith.constant 0 : i32
    %c0_i32_0 = arith.constant 0 : i32
    %c0_i32_1 = arith.constant 0 : i32
    return %c0_i32, %c0_i32_0 : i32, i32
  }
  func.func @transform_15(%arg0: i32) -> (i32, i32) {
    %c0_i32 = arith.constant 0 : i32
    %c0_i32_0 = arith.constant 0 : i32
    %c0_i32_1 = arith.constant 0 : i32
    return %c0_i32, %c0_i32_0 : i32, i32
  }
}

</mosaic_0001>

<bundles_post_ra>
// kernel: feedback_resnet_forward.1
= control target key start
LH: loop header
LB: loop body
LE: loop exit
PB: predicated region body
PF: predicated region fallthrough
CT: control target
= control target key end

     0   :  { %vm53_vm0 = vcmask 261120   ;;  %vm55_vm1 = vcmask 254976   ;;  %v5195_v0 = vmov 0.0   ;;  %v5196_v4 = vmov 0   ;;  %s5198_s22 = smov 64   ;;  %s5199_s23 = smov 96   ;;  %s7843_s0 = inlined_call_operand.vmem [shape: f32[2,8,8,32], index: 0, kind: input, shape index: {}]   ;;  %s7844_s1 = inlined_call_operand.vmem [shape: bf16[384,32], index: 1, kind: input, shape index: {}]   ;;  %s7845_s4 = inlined_call_operand.vmem [shape: bf16[384,32], index: 4, kind: input, shape index: {}]   ;;  %s7846_s2 = inlined_call_operand.vmem [shape: f32[1,32], index: 2, kind: input, shape index: {}]   ;;  %s7847_s3 = inlined_call_operand.vmem [shape: f32[1,32], index: 3, kind: input, shape index: {}]   ;;  %s7848_s7 = inlined_call_operand.vmem [shape: bf16[384,32], index: 7, kind: input, shape index: {}]   ;;  %s7849_s5 = inlined_call_operand.vmem [shape: f32[1,32], index: 5, kind: input, shape index: {}]   ;;  %s7850_s6 = inlined_call_operand.vmem [shape: f32[1,32], index: 6, kind: input, shape index: {}]   ;;  %s7851_s10 = inlined_call_operand.vmem [shape: bf16[384,32], index: 10, kind: input, shape index: {}]   ;;  %s7852_s8 = inlined_call_operand.vmem [shape: f32[1,32], index: 8, kind: input, shape index: {}]   ;;  %s7853_s9 = inlined_call_operand.vmem [shape: f32[1,32], index: 9, kind: input, shape index: {}]   ;;  %s7854_s14 = inlined_call_operand.<no memory space> [shape: f32[1,1], index: 14, kind: input, shape index: {}]   ;;  %s7855_s11 = inlined_call_operand.vmem [shape: f32[1,32], index: 11, kind: input, shape index: {}]   ;;  %s7856_s12 = inlined_call_operand.vmem [shape: f32[1,32], index: 12, kind: input, shape index: {}]   ;;  %s7857_s13 = inlined_call_operand.vmem [shape: f32[64,32], index: 13, kind: input, shape index: {}]   ;;  %s7858_s15 = inlined_call_operand.vmem [shape: f32[2,1], index: 15, kind: output, shape index: {}]  }
   0x1   :  { %57 = vst.msk [vmem:[#allocation2 + $0x10] sm:$0xff] %vm53_vm0, %v5195_v0  ;;  %59 = vst.msk [vmem:[#allocation2 + $0x20] sm:$0xff] %vm53_vm0, %v5195_v0  ;;  %v5287_v1 = vld [vmem:[%s7843_s0] sm:$0xff]  ;;  %v5292_v2 = vld [vmem:[%s7843_s0 + $0x8] sm:$0xff]  ;;  %vm240_vm2 = vcmask 523520   ;;  %vm305_vm3 = vcmask 785920  }
   0x2   :  { %58 = vst.msk [vmem:[#allocation2 + $0x18] sm:$0x3] %vm55_vm1, %v5195_v0  ;;  %60 = vst.msk [vmem:[#allocation2 + $0x28] sm:$0x3] %vm55_vm1, %v5195_v0  ;;  %v5333_v3 = vld [vmem:[%s7843_s0 + $0x10] sm:$0xff]  ;;  %v5344_v5 = vld [vmem:[%s7843_s0 + $0x18] sm:$0xff] }
   0x3   :  { %7893 = vst [vmem:[#allocation5_spill] sm:$0xff] %v5287_v1  ;;  %54 = vst.msk [vmem:[#allocation2] sm:$0xff] %vm53_vm0, %v5195_v0  ;;  %v5349_v6 = vld [vmem:[%s7843_s0 + $0x20] sm:$0xff]  ;;  %v5354_v7 = vld [vmem:[%s7843_s0 + $0x28] sm:$0xff]  ;;  %vm370_vm4 = vcmask 1048320   ;;  %vm4508_vm5 = vcmask 1041409  }
   0x4   :  { %56 = vst.msk [vmem:[#allocation2 + $0x8] sm:$0x3] %vm55_vm1, %v5195_v0  ;;  %62 = vst.msk [vmem:[#allocation2 + $0x38] sm:$0x3] %vm55_vm1, %v5195_v0  ;;  %v5365_v8 = vld [vmem:[%s7843_s0 + $0x30] sm:$0xff]  ;;  %v5370_v9 = vld [vmem:[%s7843_s0 + $0x38] sm:$0xff] }
   0x5   :  { %61 = vst.msk [vmem:[#allocation2 + $0x30] sm:$0xff] %vm53_vm0, %v5195_v0  ;;  %63 = vst.msk [vmem:[#allocation2 + $0x40] sm:$0xff] %vm53_vm0, %v5195_v0  ;;  %v5375_v10 = vld [vmem:[%s7843_s0 + $0x40] sm:$0xff]  ;;  %v5384_v11 = vld [vmem:[%s7843_s0 + $0x48] sm:$0xff]  ;;  %vm4528_vm6 = vcmask 1024  }
   0x6   :  { %64 = vst.msk [vmem:[#allocation2 + $0x48] sm:$0x3] %vm55_vm1, %v5195_v0  ;;  %66 = vst.msk [vmem:[#allocation2 + $0x58] sm:$0x3] %vm55_vm1, %v5195_v0  ;;  %v5391_v12 = vld [vmem:[%s7843_s0 + $0x50] sm:$0xff]  ;;  %v5396_v13 = vld [vmem:[%s7843_s0 + $0x58] sm:$0xff] }
   0x7   :  { %65 = vst.msk [vmem:[#allocation2 + $0x50] sm:$0xff] %vm53_vm0, %v5195_v0  ;;  %67 = vst.msk [vmem:[#allocation2 + $0x60] sm:$0xff] %vm53_vm0, %v5195_v0  ;;  %v5407_v14 = vld [vmem:[%s7843_s0 + $0x60] sm:$0xff]  ;;  %v5412_v15 = vld [vmem:[%s7843_s0 + $0x68] sm:$0xff] }
   0x8   :  { %68 = vst.msk [vmem:[#allocation2 + $0x68] sm:$0x3] %vm55_vm1, %v5195_v0  ;;  %70 = vst.msk [vmem:[#allocation2 + $0x78] sm:$0x3] %vm55_vm1, %v5195_v0  ;;  %v5417_v16 = vld [vmem:[%s7843_s0 + $0x70] sm:$0xff]  ;;  %v5428_v17 = vld [vmem:[%s7843_s0 + $0x78] sm:$0xff] }
   0x9   :  { %69 = vst.msk [vmem:[#allocation2 + $0x70] sm:$0xff] %vm53_vm0, %v5195_v0  ;;  %71 = vst.msk [vmem:[#allocation2 + $0x80] sm:$0xff] %vm53_vm0, %v5195_v0  ;;  %v5085_v18 = vld [vmem:[%s7844_s1 + $0x40] sm:$0xff]   ;;  %s5197_s0 = smov 32  }
   0xa   :  { %72 = vst.msk [vmem:[#allocation2 + $0x88] sm:$0x3] %vm55_vm1, %v5195_v0  ;;  %74 = vst.msk [vmem:[#allocation2 + $0x98] sm:$0x3] %vm55_vm1, %v5195_v0  ;;  %4632 = vmatprep.subr.bf16.mxu0 %v5085_v18 }
   0xb   :  { %73 = vst.msk [vmem:[#allocation2 + $0x90] sm:$0xff] %vm53_vm0, %v5195_v0  ;;  %75 = vst.msk [vmem:[#allocation2 + $0xa0] sm:$0xff] %vm53_vm0, %v5195_v0  ;;  %v184_v19 = vld [vmem:[#allocation2 + $0x1] sm:$0xff] }
   0xc   :  { %76 = vst.msk [vmem:[#allocation2 + $0xa8] sm:$0x3] %vm55_vm1, %v5195_v0  ;;  %78 = vst.msk [vmem:[#allocation2 + $0xb8] sm:$0x3] %vm55_vm1, %v5195_v0  ;;  %v249_v20 = vld [vmem:[#allocation2 + $0x2] sm:$0xff] }
   0xd   :  { %77 = vst.msk [vmem:[#allocation2 + $0xb0] sm:$0xff] %vm53_vm0, %v5195_v0  ;;  %79 = vst.msk [vmem:[#allocation2 + $0xc0] sm:$0xff] %vm53_vm0, %v5195_v0 }
   0xe   :  { %80 = vst.msk [vmem:[#allocation2 + $0xc8] sm:$0x3] %vm55_vm1, %v5195_v0  ;;  %82 = vst.msk [vmem:[#allocation2 + $0xd8] sm:$0x3] %vm55_vm1, %v5195_v0 }
   0xf   :  { %81 = vst.msk [vmem:[#allocation2 + $0xd0] sm:$0xff] %vm53_vm0, %v5195_v0  ;;  %83 = vst.msk [vmem:[#allocation2 + $0xe0] sm:$0xff] %vm53_vm0, %v5195_v0 }
  0x10   :  { %84 = vst.msk [vmem:[#allocation2 + $0xe8] sm:$0x3] %vm55_vm1, %v5195_v0  ;;  %86 = vst.msk [vmem:[#allocation2 + $0xf8] sm:$0x3] %vm55_vm1, %v5195_v0 }
  0x11   :  { %85 = vst.msk [vmem:[#allocation2 + $0xf0] sm:$0xff] %vm53_vm0, %v5195_v0  ;;  %87 = vst.msk [vmem:[#allocation2 + $0x100] sm:$0xff] %vm53_vm0, %v5195_v0 }
  0x12   :  { %88 = vst.msk [vmem:[#allocation2 + $0x108] sm:$0x3] %vm55_vm1, %v5195_v0  ;;  %90 = vst.msk [vmem:[#allocation2 + $0x118] sm:$0x3] %vm55_vm1, %v5195_v0 }
  0x13   :  { %89 = vst.msk [vmem:[#allocation2 + $0x110] sm:$0xff] %vm53_vm0, %v5195_v0  ;;  %91 = vst.msk [vmem:[#allocation2 + $0x120] sm:$0xff] %vm53_vm0, %v5195_v0 }
  0x14   :  { %92 = vst.msk [vmem:[#allocation2 + $0x128] sm:$0x3] %vm55_vm1, %v5195_v0  ;;  %94 = vst.msk [vmem:[#allocation2 + $0x138] sm:$0x3] %vm55_vm1, %v5195_v0 }
  0x15   :  { %93 = vst.msk [vmem:[#allocation2 + $0x130] sm:$0xff] %vm53_vm0, %v5195_v0  ;;  %96 = vst [vmem:[#allocation3 + $0x8] sm:$0xff] %v5196_v4 }
  0x16   :  { %95 = vst [vmem:[#allocation3] sm:$0xff] %v5196_v4  ;;  %97 = vst [vmem:[#allocation3 + $0x10] sm:$0xff] %v5196_v4 }
  0x17   :  { %98 = vst [vmem:[#allocation3 + $0x18] sm:$0xff] %v5196_v4  ;;  %99 = vst [vmem:[#allocation3 + $0x20] sm:$0xff] %v5196_v4 }
  0x18   :  { %100 = vst [vmem:[#allocation3 + $0x28] sm:$0xff] %v5196_v4  ;;  %101 = vst [vmem:[#allocation3 + $0x30] sm:$0xff] %v5196_v4 }
  0x19   :  { %102 = vst [vmem:[#allocation3 + $0x38] sm:$0xff] %v5196_v4  ;;  %103 = vst [vmem:[#allocation3 + $0x40] sm:$0xff] %v5196_v4 }
  0x1a   :  { %104 = vst [vmem:[#allocation3 + $0x48] sm:$0xff] %v5196_v4  ;;  %105 = vst [vmem:[#allocation3 + $0x50] sm:$0xff] %v5196_v4 }
  0x1b   :  { %106 = vst [vmem:[#allocation3 + $0x58] sm:$0xff] %v5196_v4  ;;  %107 = vst [vmem:[#allocation3 + $0x60] sm:$0xff] %v5196_v4 }
  0x1c   :  { %108 = vst [vmem:[#allocation3 + $0x68] sm:$0xff] %v5196_v4  ;;  %109 = vst [vmem:[#allocation3 + $0x70] sm:$0xff] %v5196_v4 }
  0x1d   :  { %110 = vst [vmem:[#allocation3 + $0x78] sm:$0xff] %v5196_v4  ;;  %111 = vst [vmem:[#allocation3 + $0x80] sm:$0xff] %v5196_v4 }
  0x1e   :  { %112 = vst [vmem:[#allocation3 + $0x88] sm:$0xff] %v5196_v4  ;;  %113 = vst [vmem:[#allocation3 + $0x90] sm:$0xff] %v5196_v4 }
  0x1f   :  { %114 = vst [vmem:[#allocation3 + $0x98] sm:$0xff] %v5196_v4  ;;  %115 = vst [vmem:[#allocation3 + $0xa0] sm:$0xff] %v5196_v4 }
  0x20   :  { %116 = vst [vmem:[#allocation3 + $0xa8] sm:$0xff] %v5196_v4  ;;  %117 = vst [vmem:[#allocation3 + $0xb0] sm:$0xff] %v5196_v4 }
  0x21   :  { %118 = vst [vmem:[#allocation3 + $0xb8] sm:$0xff] %v5196_v4  ;;  %136 = vst.msk [vmem:[#allocation2 + $0x11] sm:$0xff] %vm53_vm0, %v5287_v1 }
  0x22   :  { %137 = vst.msk [vmem:[#allocation2 + $0x21] sm:$0xff] %vm53_vm0, %v5292_v2  ;;  %138 = vst.msk [vmem:[#allocation2 + $0x31] sm:$0xff] %vm53_vm0, %v5333_v3 }
  0x23   :  { %139 = vst.msk [vmem:[#allocation2 + $0x41] sm:$0xff] %vm53_vm0, %v5344_v5  ;;  %140 = vst.msk [vmem:[#allocation2 + $0x51] sm:$0xff] %vm53_vm0, %v5349_v6 }
  0x24   :  { %141 = vst.msk [vmem:[#allocation2 + $0x61] sm:$0xff] %vm53_vm0, %v5354_v7  ;;  %7894 = vst [vmem:[#allocation6_spill] sm:$0xff] %v5375_v10 }
  0x25   :  { %142 = vst.msk [vmem:[#allocation2 + $0x71] sm:$0xff] %vm53_vm0, %v5365_v8  ;;  %143 = vst.msk [vmem:[#allocation2 + $0x81] sm:$0xff] %vm53_vm0, %v5370_v9 }
  0x26   :  { %144 = vst.msk [vmem:[#allocation2 + $0xb1] sm:$0xff] %vm53_vm0, %v5375_v10  ;;  %145 = vst.msk [vmem:[#allocation2 + $0xc1] sm:$0xff] %vm53_vm0, %v5384_v11 }
  0x27   :  { %146 = vst.msk [vmem:[#allocation2 + $0xd1] sm:$0xff] %vm53_vm0, %v5391_v12  ;;  %147 = vst.msk [vmem:[#allocation2 + $0xe1] sm:$0xff] %vm53_vm0, %v5396_v13 }
  0x28   :  { %7895 = vst [vmem:[#allocation7_spill] sm:$0xff] %v5407_v14  ;;  %7896 = vst [vmem:[#allocation8_spill] sm:$0xff] %v5412_v15  ;;  %v411_v21 = vld [vmem:[#allocation2 + $0x12] sm:$0xff] }
  0x29   :  { %7897 = vst [vmem:[#allocation9_spill] sm:$0xff] %v5417_v16  ;;  %148 = vst.msk [vmem:[#allocation2 + $0xf1] sm:$0xff] %vm53_vm0, %v5407_v14  ;;  %v412_v22 = vld [vmem:[#allocation2 + $0x22] sm:$0xff]  ;;  %v5435_v25 = vld [vmem:[#allocation2 + $0x30] sm:$0xff]  ;;  %v265_v36 = vpack.c.bf16 %v411_v21, %v249_v20 }
  0x2a   :  { %149 = vst.msk [vmem:[#allocation2 + $0x101] sm:$0xff] %vm53_vm0, %v5412_v15  ;;  %150 = vst.msk [vmem:[#allocation2 + $0x111] sm:$0xff] %vm53_vm0, %v5417_v16  ;;  %v476_v23 = vld [vmem:[#allocation2 + $0x20] sm:$0xff]  ;;  %v427_v24 = vpack.c.bf16 %v412_v22, %v411_v21  ;;  %v185_v26 = vld [vmem:[#allocation2 + $0x11] sm:$0xff] }
  0x2b   :  { %7898 = vst [vmem:[#allocation10_spill] sm:$0xff] %v5428_v17  ;;  %151 = vst.msk [vmem:[#allocation2 + $0x121] sm:$0xff] %vm53_vm0, %v5428_v17  ;;  %v540_v27 = vld [vmem:[#allocation2 + $0x21] sm:$0xff]  ;;  %v492_v28 = vpack.c.bf16 %v5435_v25, %v476_v23  ;;  %v413_v29 = vld [vmem:[#allocation2 + $0x32] sm:$0xff]  ;;  %v200_v31 = vpack.c.bf16 %v185_v26, %v184_v19 }
  0x2c   :  { %v395_v30 = vpack.c.bf16 %v540_v27, %v185_v26  ;;  %443 = vrot.lane.b32.xlu0 %v427_v24, %s5197_s0  ;;  %v541_v32 = vld [vmem:[#allocation2 + $0x31] sm:$0xff]  ;;  %v5439_v33 = vld [vmem:[#allocation2 + $0x40] sm:$0xff]  ;;  %v5443_v35 = vpack.c.bf16 %v413_v29, %v412_v22 }
  0x2d   :  { %v5441_v34 = vld [vmem:[#allocation2 + $0x50] sm:$0xff]  ;;  %508 = vrot.lane.b32.xlu1 %v492_v28, %s5198_s22  ;;  %v414_v37 = vld [vmem:[#allocation2 + $0x42] sm:$0xff]  ;;  %177 = vst.msk [vmem:[#allocation3 + $0x18] sm:$0xff] %vm53_vm0, %v492_v28  ;;  %v556_v49 = vpack.c.bf16 %v541_v32, %v540_v27 }
  0x2e   :  { %v493_v38 = vpack.c.bf16 %v5441_v34, %v5439_v33  ;;  %v542_v39 = vld [vmem:[#allocation2 + $0x41] sm:$0xff]  ;;  %v5448_v40 = vld [vmem:[#allocation2 + $0x52] sm:$0xff]  ;;  %403 = vst.msk [vmem:[#allocation3 + $0x8] sm:$0xff] %vm53_vm0, %v395_v30  ;;  %628 = vst.msk [vmem:[#allocation3 + $0x10] sm:$0xff] %vm53_vm0, %v5443_v35  ;;  %v428_v56 = vpack.c.bf16 %v414_v37, %v413_v29 }
  0x2f   :  { %v5452_v41 = vld [vmem:[#allocation2 + $0x10] sm:$0xff]  ;;  %v5454_v42 = vld [vmem:[#allocation2 + $0x60] sm:$0xff]  ;;  %v5459_v44 = vpack.c.bf16 %v5448_v40, %v414_v37  ;;  %v396_v45 = vpack.c.bf16 %v542_v39, %v541_v32  ;;  %v5088_v30 = vld [vmem:[%s7844_s1 + $0x48] sm:$0xff]  }
  0x30   :  { %v5456_v43 = vld [vmem:[#allocation2 + $0x70] sm:$0xff]  ;;  %v5463_v46 = vld [vmem:[#allocation2 + $0x62] sm:$0xff]  ;;  %178 = vst.msk [vmem:[#allocation3 + $0x30] sm:$0xff] %vm53_vm0, %v493_v38  ;;  %216 = vrot.lane.b32.xlu0 %v200_v31, %s5197_s0  ;;  %v330_v51 = vpack.c.bf16 %v476_v23, %v5452_v41  ;;  %v331_v31 = vpack.c.bf16 %v5439_v33, %v5435_v25 }
  0x31   :  { %v5467_v47 = vpack.c.bf16 %v5456_v43, %v5454_v42  ;;  %v5469_v48 = vld [vmem:[#allocation2 + $0x72] sm:$0xff]  ;;  %404 = vst.msk [vmem:[#allocation3 + $0x20] sm:$0xff] %vm53_vm0, %v396_v45  ;;  %629 = vst.msk [vmem:[#allocation3 + $0x28] sm:$0xff] %vm53_vm0, %v5459_v44  ;;  %281 = vrot.lane.b32.xlu1 %v265_v36, %s5198_s22  ;;  %v5484_v52 = vld [vmem:[#allocation2 + $0xc0] sm:$0xff]  ;;  %v429_v25 = vpack.c.bf16 %v5463_v46, %v5448_v40 }
  0x32   :  { %v5475_v50 = vpack.c.bf16 %v5469_v48, %v5463_v46  ;;  %v543_v53 = vld [vmem:[#allocation2 + $0x51] sm:$0xff]  ;;  %v5488_v54 = vld [vmem:[#allocation2 + $0x61] sm:$0xff] }
  0x33   :  { %179 = vst.msk [vmem:[#allocation3 + $0x48] sm:$0xff] %vm53_vm0, %v5467_v47  ;;  %v5490_v55 = vld [vmem:[#allocation2 + $0xd0] sm:$0xff]  ;;  %v5493_v57 = vld [vmem:[#allocation2 + $0xc2] sm:$0xff]  ;;  %v397_v60 = vpack.c.bf16 %v5488_v54, %v543_v53  ;;  %v557_v29 = vpack.c.bf16 %v543_v53, %v542_v39  ;;  %v5094_v40 = vld [vmem:[%s7844_s1 + $0x58] sm:$0xff]  }
  0x34   :  { %630 = vst.msk [vmem:[#allocation3 + $0x40] sm:$0xff] %vm53_vm0, %v5475_v50  ;;  %572 = vrot.lane.b32.xlu0 %v556_v49, %s5199_s23  ;;  %v5497_v58 = vpack.c.bf16 %v5490_v55, %v5484_v52  ;;  %v5499_v59 = vld [vmem:[#allocation2 + $0xd2] sm:$0xff]  ;;  %v5503_v61 = vld [vmem:[#allocation2 + $0xe0] sm:$0xff]  ;;  %v5089_v37 = vld [vmem:[%s7844_s1 + $0x8] sm:$0xff]  }
  0x35   :  { %346 = vrot.lane.b32.xlu1 %v330_v51, %s5199_s23  ;;  %v5505_v62 = vld [vmem:[#allocation2 + $0xf0] sm:$0xff]  ;;  %v5509_v63 = vpack.c.bf16 %v5499_v59, %v5493_v57  ;;  %v5511_v0 = vld [vmem:[#allocation2 + $0xe2] sm:$0xff]  ;;  %405 = vst.msk [vmem:[#allocation3 + $0x38] sm:$0xff] %vm53_vm0, %v397_v60  ;;  %v5095_v46 = vld [vmem:[%s7844_s1 + $0x18] sm:$0xff]  }
  0x36   :  { %v5515_v4 = vpack.c.bf16 %v5505_v62, %v5503_v61  ;;  %v5517_v18 = vld [vmem:[#allocation2 + $0xf2] sm:$0xff]  ;;  %181 = vst.msk [vmem:[#allocation3 + $0x78] sm:$0xff] %vm53_vm0, %v5497_v58  ;;  %v5522_v19 = vld [vmem:[#allocation2 + $0x100] sm:$0xff] }
  0x37   :  { %v5524_v20 = vld [vmem:[#allocation2 + $0x110] sm:$0xff]  ;;  %v5528_v21 = vpack.c.bf16 %v5517_v18, %v5511_v0  ;;  %632 = vst.msk [vmem:[#allocation3 + $0x70] sm:$0xff] %vm53_vm0, %v5509_v63  ;;  %v5533_v22 = vld [vmem:[#allocation2 + $0x102] sm:$0xff] }
  0x38   :  { %445 = vrot.lane.b32.xlu0 %v428_v56, %s5197_s0  ;;  %v5537_v23 = vpack.c.bf16 %v5524_v20, %v5522_v19  ;;  %v5539_v24 = vld [vmem:[#allocation2 + $0x112] sm:$0xff]  ;;  %182 = vst.msk [vmem:[#allocation3 + $0x90] sm:$0xff] %vm53_vm0, %v5515_v4  ;;  %v5086_v27 = vld [vmem:[%s7844_s1] sm:$0xff]  }
  0x39   :  { %218 = vrot.lane.b32.xlu1 %v556_v49, %s5197_s0  ;;  %v5546_v26 = vpack.c.bf16 %v5539_v24, %v5533_v22  ;;  %633 = vst.msk [vmem:[#allocation3 + $0x88] sm:$0xff] %vm53_vm0, %v5528_v21  ;;  %v5087_v28 = vld [vmem:[%s7844_s1 + $0x80] sm:$0xff]   ;;  %4633 = vmatpush3.bf16.msra.mxu0 %v5086_v27  ;;  %v545_v32 = vld [vmem:[#allocation2 + $0x71] sm:$0xff] }
  0x3a   :  { %183 = vst.msk [vmem:[#allocation3 + $0xa8] sm:$0xff] %vm53_vm0, %v5537_v23  ;;  %v5568_v36 = vld [vmem:[#allocation2 + $0x81] sm:$0xff]  ;;  %4952 = vmatprep.subr.bf16.mxu1 %v5087_v28  ;;  %4634 = vmatprep.subr.bf16.mxu0 %v5088_v30  ;;  %v5092_v33 = vld [vmem:[%s7844_s1 + $0x10] sm:$0xff]   ;;  %v5096_v49 = vld [vmem:[%s7844_s1 + $0x98] sm:$0xff]   ;;  %v558_v27 = vpack.c.bf16 %v545_v32, %v5488_v54 }
  0x3b   :  { %634 = vst.msk [vmem:[#allocation3 + $0xa0] sm:$0xff] %vm53_vm0, %v5546_v26  ;;  %4953 = vmatpush3.bf16.msra.mxu1 %v5087_v28  ;;  %v398_v39 = vpack.c.bf16 %v5568_v36, %v545_v32  ;;  %v5093_v45 = vld [vmem:[%s7844_s1 + $0x90] sm:$0xff]   ;;  %v5097_v51 = vld [vmem:[%s7844_s1 + $0x60] sm:$0xff]  }
  0x3c   :  { %510 = vrot.lane.b32.xlu0 %v493_v38, %s5198_s22  ;;  %v5090_v38 = vld [vmem:[%s7844_s1 + $0x88] sm:$0xff]   ;;  %v5098_v53 = vld [vmem:[%s7844_s1 + $0x20] sm:$0xff]   ;;  %v5618_v30 = vld [vmem:[#allocation2 + $0xb1] sm:$0xff] }
  0x3d   :  { %283 = vrot.lane.b32.xlu1 %v5443_v35, %s5198_s22  ;;  %v5091_v35 = vld [vmem:[%s7844_s1 + $0x50] sm:$0xff]   ;;  %4635 = vmatpush3.bf16.msra.mxu0 %v5089_v37  ;;  %406 = vst.msk [vmem:[#allocation3 + $0x50] sm:$0xff] %vm53_vm0, %v398_v39  ;;  %v418_v56 = vld [vmem:[#allocation2 + $0x82] sm:$0xff]  ;;  %v5106_v39 = vld [vmem:[%s7844_s1 + $0x78] sm:$0xff]  }
  0x3e   :  { %4954 = vmatprep.subr.bf16.mxu1 %v5090_v38  ;;  %4636 = vmatprep.subr.bf16.mxu0 %v5091_v35  ;;  %v5099_v60 = vld [vmem:[%s7844_s1 + $0xa0] sm:$0xff]   ;;  %v5100_v37 = vld [vmem:[%s7844_s1 + $0x68] sm:$0xff]   ;;  %v483_v32 = vld [vmem:[#allocation2 + $0x90] sm:$0xff] }
  0x3f   :  { %4955 = vmatpush3.bf16.msra.mxu1 %v5090_v38  ;;  %v152_v28 = vld [vmem:[#allocation2] sm:$0xff]  ;;  %v5103_v38 = vld [vmem:[%s7844_s1 + $0x70] sm:$0xff]  }
  0x40   :  { %574 = vrot.lane.b32.xlu0 %v557_v29, %s5199_s23  ;;  %4956 = vmatprep.subr.bf16.mxu1 %v5093_v45  ;;  %v482_v54 = vld [vmem:[#allocation2 + $0x80] sm:$0xff] }
  0x41   :  { %348 = vrot.lane.b32.xlu1 %v331_v31, %s5199_s23  ;;  %4637 = vmatpush3.bf16.msra.mxu0 %v5092_v33  ;;  %v168_v31 = vpack.c.bf16 %v5452_v41, %v152_v28  ;;  %v430_v41 = vpack.c.bf16 %v418_v56, %v5469_v48  ;;  %v5105_v48 = vld [vmem:[%s7844_s1 + $0xb0] sm:$0xff]   ;;  %v495_v35 = vpack.c.bf16 %v483_v32, %v482_v54  ;;  %v5107_v28 = vld [vmem:[%s7844_s1 + $0x38] sm:$0xff]  }
  0x42   :  { %4638 = vmatprep.subr.bf16.mxu0 %v5094_v40  ;;  %v547_v33 = vld [vmem:[#allocation2 + $0x91] sm:$0xff] }
  0x43   :  { %4957 = vmatpush3.bf16.msra.mxu1 %v5093_v45  ;;  %176 = vst.msk [vmem:[#allocation3] sm:$0xff] %vm53_vm0, %v168_v31  ;;  %v638_v45 = vld [vmem:[#allocation3 + $0x10] sm:$0xff] }
  0x44   :  { %447 = vrot.lane.b32.xlu0 %v429_v25, %s5197_s0  ;;  %4958 = vmatprep.subr.bf16.mxu1 %v5096_v49  ;;  %v5104_v25 = vld [vmem:[%s7844_s1 + $0x30] sm:$0xff]  }
  0x45   :  { %220 = vrot.lane.b32.xlu1 %v557_v29, %s5197_s0  ;;  %4639 = vmatpush3.bf16.msra.mxu0 %v5095_v46  ;;  %v332_v29 = vpack.c.bf16 %v5454_v42, %v5441_v34  ;;  %v5102_v34 = vld [vmem:[%s7844_s1 + $0xa8] sm:$0xff]   ;;  %v322_v40 = vld [vmem:[#allocation2 + $0xb0] sm:$0xff] }
  0x46   :  { %4640 = vmatprep.subr.bf16.mxu0 %v5097_v51  ;;  %v5101_v42 = vld [vmem:[%s7844_s1 + $0x28] sm:$0xff]   ;;  %4968 = vmatprep.mubr.bf16.mxu1 %v638_v45  ;;  %v611_v46 = vld [vmem:[#allocation2 + $0x92] sm:$0xff] }
  0x47   :  { %4959 = vmatpush3.bf16.msra.mxu1 %v5096_v49  ;;  %v160_v49 = vld [vmem:[#allocation2 + $0xa0] sm:$0xff]  ;;  %v5108_v51 = vld [vmem:[%s7844_s1 + $0xb8] sm:$0xff]  }
  0x48   :  { %512 = vrot.lane.b32.xlu0 %v5467_v47, %s5198_s22  ;;  %v5624_v47 = vld [vmem:[#allocation2 + $0xc1] sm:$0xff]  ;;  %4960 = vmatprep.subr.bf16.mxu1 %v5099_v60  ;;  %v419_v31 = vld [vmem:[#allocation2 + $0xb2] sm:$0xff] }
  0x49   :  { %285 = vrot.lane.b32.xlu1 %v5459_v44, %s5198_s22  ;;  %4641 = vmatpush3.bf16.msra.mxu0 %v5098_v53  ;;  %v399_v44 = vpack.c.bf16 %v5624_v47, %v5618_v30  ;;  %v623_v53 = vpack.c.bf16 %v611_v46, %v418_v56  ;;  %v192_v56 = vld [vmem:[#allocation2 + $0xa1] sm:$0xff]  ;;  %v431_v32 = vpack.c.bf16 %v5493_v57, %v419_v31  ;;  %v619_v45 = vld [vmem:[#allocation2 + $0x132] sm:$0xff] }
  0x4a   :  { %4642 = vmatprep.subr.bf16.mxu0 %v5100_v37  ;;  %v549_v37 = vld [vmem:[#allocation2 + $0xd1] sm:$0xff] }
  0x4b   :  { %4961 = vmatpush3.bf16.msra.mxu1 %v5099_v60  ;;  %407 = vst.msk [vmem:[#allocation3 + $0x68] sm:$0xff] %vm53_vm0, %v399_v44  ;;  %v172_v60 = vpack.c.bf16 %v322_v40, %v160_v49  ;;  %631 = vst.msk [vmem:[#allocation3 + $0x58] sm:$0xff] %vm53_vm0, %v623_v53  ;;  %v560_v57 = vpack.c.bf16 %v549_v37, %v5624_v47  ;;  %v426_v47 = vld [vmem:[#allocation2 + $0x122] sm:$0xff] }
  0x4c   :  { %576 = vrot.lane.b32.xlu0 %v558_v27, %s5199_s23  ;;  %4962 = vmatprep.subr.bf16.mxu1 %v5102_v34  ;;  %v627_v49 = vpack.c.bf16 %v619_v45, %v426_v47 }
  0x4d   :  { %350 = vrot.lane.b32.xlu1 %v332_v29, %s5199_s23  ;;  %4643 = vmatpush3.bf16.msra.mxu0 %v5101_v42  ;;  %v333_v29 = vpack.c.bf16 %v482_v54, %v5456_v43  ;;  %180 = vst.msk [vmem:[#allocation3 + $0x60] sm:$0xff] %vm53_vm0, %v172_v60  ;;  %v204_v43 = vpack.c.bf16 %v5618_v30, %v192_v56  ;;  %v641_v54 = vld [vmem:[#allocation3 + $0x28] sm:$0xff] }
  0x4e   :  { %4644 = vmatprep.subr.bf16.mxu0 %v5103_v38  ;;  %v334_v30 = vpack.c.bf16 %v5484_v52, %v322_v40  ;;  %v551_v38 = vld [vmem:[#allocation2 + $0xf1] sm:$0xff]  ;;  %v653_v52 = vld [vmem:[#allocation3 + $0x88] sm:$0xff]  ;;  %v433_v40 = vpack.c.bf16 %v5533_v22, %v5517_v18  ;;  %635 = vst.msk [vmem:[#allocation3 + $0xb8] sm:$0xff] %vm53_vm0, %v627_v49  ;;  %v434_v18 = vpack.c.bf16 %v426_v47, %v5539_v24  ;;  %v490_v22 = vld [vmem:[#allocation2 + $0x120] sm:$0xff] }
  0x4f   :  { %4963 = vmatpush3.bf16.msra.mxu1 %v5102_v34 }
  0x50   :  { %449 = vrot.lane.b32.xlu0 %v430_v41, %s5197_s0  ;;  %4964 = vmatprep.subr.bf16.mxu1 %v5105_v48  ;;  %v644_v41 = vld [vmem:[#allocation3 + $0x40] sm:$0xff] }
  0x51   :  { %222 = vrot.lane.b32.xlu1 %v558_v27, %s5197_s0  ;;  %v559_v27 = vpack.c.bf16 %v547_v33, %v5568_v36  ;;  %4645 = vmatpush3.bf16.msra.mxu0 %v5104_v25  ;;  %v550_v36 = vld [vmem:[#allocation2 + $0xe1] sm:$0xff]  ;;  %v432_v25 = vpack.c.bf16 %v5511_v0, %v5499_v59  ;;  %v335_v59 = vpack.c.bf16 %v5503_v61, %v5490_v55  ;;  %v553_v0 = vld [vmem:[#allocation2 + $0x111] sm:$0xff] }
  0x52   :  { %4646 = vmatprep.subr.bf16.mxu0 %v5106_v39  ;;  %v400_v34 = vpack.c.bf16 %v550_v36, %v549_v37  ;;  %v647_v44 = vld [vmem:[#allocation3 + $0x58] sm:$0xff]  ;;  %v554_v39 = vld [vmem:[#allocation2 + $0x121] sm:$0xff] }
  0x53   :  { %4965 = vmatpush3.bf16.msra.mxu1 %v5105_v48  ;;  %v552_v48 = vld [vmem:[#allocation2 + $0x101] sm:$0xff]  ;;  %v402_v46 = vpack.c.bf16 %v554_v39, %v553_v0 }
  0x54   :  { %514 = vrot.lane.b32.xlu0 %v495_v35, %s5198_s22  ;;  %4966 = vmatprep.subr.bf16.mxu1 %v5108_v51  ;;  %408 = vst.msk [vmem:[#allocation3 + $0x80] sm:$0xff] %vm53_vm0, %v400_v34  ;;  %v650_v35 = vld [vmem:[#allocation3 + $0x70] sm:$0xff]  ;;  %v401_v33 = vpack.c.bf16 %v552_v48, %v551_v38  ;;  %v562_v55 = vpack.c.bf16 %v553_v0, %v552_v48  ;;  %v656_v61 = vld [vmem:[#allocation3 + $0xa0] sm:$0xff] }
  0x55   :  { %287 = vrot.lane.b32.xlu1 %v5475_v50, %s5198_s22  ;;  %4647 = vmatpush3.bf16.msra.mxu0 %v5107_v28  ;;  %v257_v50 = vld [vmem:[#allocation2 + $0xa2] sm:$0xff]  ;;  %410 = vst.msk [vmem:[#allocation3 + $0xb0] sm:$0xff] %vm53_vm0, %v402_v46 }
  0x56   :  { %v269_v42 = vpack.c.bf16 %v419_v31, %v257_v50  ;;  %409 = vst.msk [vmem:[#allocation3 + $0x98] sm:$0xff] %vm53_vm0, %v401_v33 }
  0x57   :  { %4967 = vmatpush3.bf16.msra.mxu1 %v5108_v51  ;;  %v491_v51 = vld [vmem:[#allocation2 + $0x130] sm:$0xff] }
  0x58   :  { %578 = vrot.lane.b32.xlu0 %v559_v27, %s5199_s23 }
  0x59   :  { %352 = vrot.lane.b32.xlu1 %v333_v29, %s5199_s23 }
  0x5a   :  { %4969 = vmatmul.mubr.bf16.vlgmr.msra.gmra.mrb[0].mxu1 %v641_v54 }
  0x5b   :  { %4972 = vmatprep.mubr.bf16.mxu1 %v644_v41 }
  0x5c   :  { %451 = vrot.lane.b32.xlu0 %v431_v32, %s5197_s0 }
  0x5d   :  { %224 = vrot.lane.b32.xlu1 %v204_v43, %s5197_s0 }
  0x60   :  { %516 = vrot.lane.b32.xlu0 %v5497_v58, %s5198_s22  ;;  %v561_v58 = vpack.c.bf16 %v551_v38, %v550_v36 }
  0x61   :  { %289 = vrot.lane.b32.xlu1 %v269_v42, %s5198_s22 }
  0x62   :  { %4973 = vmatmul.mubr.bf16.gmra.mrb[4].mxu1 %v647_v44 }
  0x63   :  { %4976 = vmatprep.mubr.bf16.mxu1 %v650_v35 }
  0x64   :  { %580 = vrot.lane.b32.xlu0 %v560_v57, %s5199_s23 }
  0x65   :  { %354 = vrot.lane.b32.xlu1 %v334_v30, %s5199_s23 }
  0x68   :  { %453 = vrot.lane.b32.xlu0 %v432_v25, %s5197_s0 }
  0x69   :  { %226 = vrot.lane.b32.xlu1 %v560_v57, %s5197_s0 }
  0x6a   :  { %4977 = vmatmul.mubr.bf16.gmra.mrb[8].mxu1 %v653_v52 }
  0x6b   :  { %4980 = vmatprep.mubr.bf16.mxu1 %v656_v61 }
  0x6c   :  { %518 = vrot.lane.b32.xlu0 %v5515_v4, %s5198_s22  ;;  %v659_v4 = vld [vmem:[#allocation3 + $0xb8] sm:$0xff] }
  0x6d   :  { %291 = vrot.lane.b32.xlu1 %v5509_v63, %s5198_s22  ;;  %v336_v63 = vpack.c.bf16 %v5522_v19, %v5505_v62  ;;  %v337_v19 = vpack.c.bf16 %v490_v22, %v5524_v20 }
  0x70   :  { %582 = vrot.lane.b32.xlu0 %v561_v58, %s5199_s23 }
  0x71   :  { %356 = vrot.lane.b32.xlu1 %v335_v59, %s5199_s23 }
  0x72   :  { %4981 = vmatmul.mubr.bf16.gmra.mrb[12].mxu1 %v659_v4 }
  0x74   :  { %455 = vrot.lane.b32.xlu0 %v433_v40, %s5197_s0 }
  0x75   :  { %228 = vrot.lane.b32.xlu1 %v561_v58, %s5197_s0 }
  0x78   :  { %520 = vrot.lane.b32.xlu0 %v5537_v23, %s5198_s22  ;;  %v499_v23 = vpack.c.bf16 %v491_v51, %v490_v22 }
  0x79   :  { %293 = vrot.lane.b32.xlu1 %v5528_v21, %s5198_s22  ;;  %v555_v21 = vld [vmem:[#allocation2 + $0x131] sm:$0xff] }
  0x7a   :  { %v563_v62 = vpack.c.bf16 %v555_v21, %v554_v39 }
  0x7c   :  { %584 = vrot.lane.b32.xlu0 %v562_v55, %s5199_s23 }
  0x7d   :  { %358 = vrot.lane.b32.xlu1 %v336_v63, %s5199_s23 }
  0x80   :  { %457 = vrot.lane.b32.xlu0 %v434_v18, %s5197_s0 }
  0x81   :  { %230 = vrot.lane.b32.xlu1 %v562_v55, %s5197_s0 }
  0x84   :  { %522 = vrot.lane.b32.xlu0 %v499_v23, %s5198_s22 }
  0x85   :  { %295 = vrot.lane.b32.xlu1 %v5546_v26, %s5198_s22 }
  0x88   :  { %586 = vrot.lane.b32.xlu0 %v563_v62, %s5199_s23 }
  0x89   :  { %360 = vrot.lane.b32.xlu1 %v337_v19, %s5199_s23 }
  0x9e   :  { %v444_v24 = vpop.permute.xlu0 %443 }
  0x9f   :  { %467 = vst.msk [vmem:[#allocation3 + $0x8] sm:$0xff] %vm240_vm2, %v444_v24  ;;  %v509_v53 = vpop.permute.xlu1 %508 }
  0xa0   :  { %532 = vst.msk [vmem:[#allocation3 + $0x8] sm:$0xff] %vm305_vm3, %v509_v53 }
  0xa2   :  { %v217_v60 = vpop.permute.xlu0 %216 }
  0xa3   :  { %241 = vst.msk [vmem:[#allocation3] sm:$0xff] %vm240_vm2, %v217_v60  ;;  %v282_v27 = vpop.permute.xlu1 %281 }
  0xa4   :  { %306 = vst.msk [vmem:[#allocation3] sm:$0xff] %vm305_vm3, %v282_v27 }
  0xa6   :  { %v573_v20 = vpop.permute.xlu0 %572 }
  0xa7   :  { %596 = vst.msk [vmem:[#allocation3 + $0x8] sm:$0xff] %vm370_vm4, %v573_v20  ;;  %v347_v26 = vpop.permute.xlu1 %346 }
  0xa8   :  { %371 = vst.msk [vmem:[#allocation3] sm:$0xff] %vm370_vm4, %v347_v26 }
  0xaa   :  { %v446_v28 = vpop.permute.xlu0 %445 }
  0xab   :  { %468 = vst.msk [vmem:[#allocation3 + $0x20] sm:$0xff] %vm240_vm2, %v446_v28  ;;  %v219_v29 = vpop.permute.xlu1 %218 }
  0xac   :  { %242 = vst.msk [vmem:[#allocation3 + $0x18] sm:$0xff] %vm240_vm2, %v219_v29 }
  0xae   :  { %v511_v31 = vpop.permute.xlu0 %510  ;;  %v637_v56 = vld [vmem:[#allocation3 + $0x8] sm:$0xff] }
  0xaf   :  { %533 = vst.msk [vmem:[#allocation3 + $0x20] sm:$0xff] %vm305_vm3, %v511_v31  ;;  %v284_v37 = vpop.permute.xlu1 %283  ;;  %884 = vmatprep.mubr.bf16.mxu0 %v637_v56  ;;  %v636_v36 = vld [vmem:[#allocation3] sm:$0xff] }
  0xb0   :  { %307 = vst.msk [vmem:[#allocation3 + $0x18] sm:$0xff] %vm305_vm3, %v284_v37  ;;  %885 = vmatmul.mubr.bf16.vlgmr.msra.gmra.mrb[0].mxu0 %v636_v36 }
  0xb2   :  { %v575_v32 = vpop.permute.xlu0 %574 }
  0xb3   :  { %597 = vst.msk [vmem:[#allocation3 + $0x20] sm:$0xff] %vm370_vm4, %v575_v32  ;;  %v349_v34 = vpop.permute.xlu1 %348 }
  0xb4   :  { %372 = vst.msk [vmem:[#allocation3 + $0x18] sm:$0xff] %vm370_vm4, %v349_v34 }
  0xb6   :  { %v448_v43 = vpop.permute.xlu0 %447 }
  0xb7   :  { %469 = vst.msk [vmem:[#allocation3 + $0x38] sm:$0xff] %vm240_vm2, %v448_v43  ;;  %v221_v50 = vpop.permute.xlu1 %220 }
  0xb8   :  { %243 = vst.msk [vmem:[#allocation3 + $0x30] sm:$0xff] %vm240_vm2, %v221_v50 }
  0xba   :  { %v513_v54 = vpop.permute.xlu0 %512  ;;  %v640_v41 = vld [vmem:[#allocation3 + $0x20] sm:$0xff] }
  0xbb   :  { %534 = vst.msk [vmem:[#allocation3 + $0x38] sm:$0xff] %vm305_vm3, %v513_v54  ;;  %v286_v42 = vpop.permute.xlu1 %285  ;;  %892 = vmatprep.mubr.bf16.mxu0 %v640_v41  ;;  %v639_v57 = vld [vmem:[#allocation3 + $0x18] sm:$0xff] }
  0xbc   :  { %308 = vst.msk [vmem:[#allocation3 + $0x30] sm:$0xff] %vm305_vm3, %v286_v42  ;;  %893 = vmatmul.mubr.bf16.gmra.mrb[4].mxu0 %v639_v57 }
  0xbe   :  { %v577_v30 = vpop.permute.xlu0 %576 }
  0xbf   :  { %598 = vst.msk [vmem:[#allocation3 + $0x38] sm:$0xff] %vm370_vm4, %v577_v30  ;;  %v351_v44 = vpop.permute.xlu1 %350 }
  0xc0   :  { %373 = vst.msk [vmem:[#allocation3 + $0x30] sm:$0xff] %vm370_vm4, %v351_v44 }
  0xc2   :  { %v450_v38 = vpop.permute.xlu0 %449 }
  0xc3   :  { %470 = vst.msk [vmem:[#allocation3 + $0x50] sm:$0xff] %vm240_vm2, %v450_v38  ;;  %v223_v48 = vpop.permute.xlu1 %222 }
  0xc4   :  { %244 = vst.msk [vmem:[#allocation3 + $0x48] sm:$0xff] %vm240_vm2, %v223_v48 }
  0xc6   :  { %v515_v35 = vpop.permute.xlu0 %514  ;;  %v643_v25 = vld [vmem:[#allocation3 + $0x38] sm:$0xff] }
  0xc7   :  { %535 = vst.msk [vmem:[#allocation3 + $0x50] sm:$0xff] %vm305_vm3, %v515_v35  ;;  %v288_v33 = vpop.permute.xlu1 %287  ;;  %900 = vmatprep.mubr.bf16.mxu0 %v643_v25  ;;  %v642_v52 = vld [vmem:[#allocation3 + $0x30] sm:$0xff] }
  0xc8   :  { %309 = vst.msk [vmem:[#allocation3 + $0x48] sm:$0xff] %vm305_vm3, %v288_v33  ;;  %901 = vmatmul.mubr.bf16.gmra.mrb[8].mxu0 %v642_v52 }
  0xca   :  { %v579_v58 = vpop.permute.xlu0 %578 }
  0xcb   :  { %599 = vst.msk [vmem:[#allocation3 + $0x50] sm:$0xff] %vm370_vm4, %v579_v58  ;;  %v353_v59 = vpop.permute.xlu1 %352 }
  0xcc   :  { %374 = vst.msk [vmem:[#allocation3 + $0x48] sm:$0xff] %vm370_vm4, %v353_v59 }
  0xce   :  { %v452_v0 = vpop.permute.xlu0 %451 }
  0xcf   :  { %471 = vst.msk [vmem:[#allocation3 + $0x68] sm:$0xff] %vm240_vm2, %v452_v0  ;;  %v225_v47 = vpop.permute.xlu1 %224 }
  0xd0   :  { %245 = vst.msk [vmem:[#allocation3 + $0x60] sm:$0xff] %vm240_vm2, %v225_v47 }
  0xd2   :  { %v517_v39 = vpop.permute.xlu0 %516  ;;  %v646_v45 = vld [vmem:[#allocation3 + $0x50] sm:$0xff] }
  0xd3   :  { %536 = vst.msk [vmem:[#allocation3 + $0x68] sm:$0xff] %vm305_vm3, %v517_v39  ;;  %v290_v40 = vpop.permute.xlu1 %289  ;;  %908 = vmatprep.mubr.bf16.mxu0 %v646_v45  ;;  %v645_v46 = vld [vmem:[#allocation3 + $0x48] sm:$0xff]  ;;  %v5109_v39 = vld [vmem:[%s7845_s4 + $0x80] sm:$0xff]  }
  0xd4   :  { %310 = vst.msk [vmem:[#allocation3 + $0x60] sm:$0xff] %vm305_vm3, %v290_v40  ;;  %909 = vmatmul.mubr.bf16.gmra.mrb[12].mxu0 %v645_v46  ;;  %4984 = vmatprep.subr.bf16.mxu0 %v5109_v39  ;;  %v5110_v46 = vld [vmem:[%s7845_s4 + $0x88] sm:$0xff]  }
  0xd5   :  { %4985 = vmatpush3.bf16.msra.mxu0 %v5109_v39 }
  0xd6   :  { %v581_v49 = vpop.permute.xlu0 %580  ;;  %4986 = vmatprep.subr.bf16.mxu0 %v5110_v46 }
  0xd7   :  { %600 = vst.msk [vmem:[#allocation3 + $0x68] sm:$0xff] %vm370_vm4, %v581_v49  ;;  %v355_v55 = vpop.permute.xlu1 %354 }
  0xd8   :  { %375 = vst.msk [vmem:[#allocation3 + $0x60] sm:$0xff] %vm370_vm4, %v355_v55 }
  0xd9   :  { %4987 = vmatpush3.bf16.msra.mxu0 %v5110_v46 }
  0xda   :  { %v454_v61 = vpop.permute.xlu0 %453 }
  0xdb   :  { %472 = vst.msk [vmem:[#allocation3 + $0x80] sm:$0xff] %vm240_vm2, %v454_v61  ;;  %v227_v63 = vpop.permute.xlu1 %226 }
  0xdc   :  { %246 = vst.msk [vmem:[#allocation3 + $0x78] sm:$0xff] %vm240_vm2, %v227_v63 }
  0xde   :  { %v519_v4 = vpop.permute.xlu0 %518  ;;  %v649_v18 = vld [vmem:[#allocation3 + $0x68] sm:$0xff] }
  0xdf   :  { %537 = vst.msk [vmem:[#allocation3 + $0x80] sm:$0xff] %vm305_vm3, %v519_v4  ;;  %v292_v22 = vpop.permute.xlu1 %291  ;;  %916 = vmatprep.mubr.bf16.mxu0 %v649_v18  ;;  %v648_v51 = vld [vmem:[#allocation3 + $0x60] sm:$0xff]  ;;  %v5111_v18 = vld [vmem:[%s7845_s4 + $0x90] sm:$0xff]  }
  0xe0   :  { %311 = vst.msk [vmem:[#allocation3 + $0x78] sm:$0xff] %vm305_vm3, %v292_v22  ;;  %917 = vmatmul.mubr.bf16.gmra.mrb[16].mxu0 %v648_v51  ;;  %4988 = vmatprep.subr.bf16.mxu0 %v5111_v18  ;;  %v5112_v51 = vld [vmem:[%s7845_s4 + $0x98] sm:$0xff]  }
  0xe1   :  { %4989 = vmatpush3.bf16.msra.mxu0 %v5111_v18 }
  0xe2   :  { %v583_v23 = vpop.permute.xlu0 %582  ;;  %4990 = vmatprep.subr.bf16.mxu0 %v5112_v51 }
  0xe3   :  { %601 = vst.msk [vmem:[#allocation3 + $0x80] sm:$0xff] %vm370_vm4, %v583_v23  ;;  %v357_v21 = vpop.permute.xlu1 %356  ;;  %v5113_v23 = vld [vmem:[%s7845_s4 + $0xa0] sm:$0xff]  }
  0xe4   :  { %376 = vst.msk [vmem:[#allocation3 + $0x78] sm:$0xff] %vm370_vm4, %v357_v21 }
  0xe5   :  { %4991 = vmatpush3.bf16.msra.mxu0 %v5112_v51 }
  0xe6   :  { %v456_v62 = vpop.permute.xlu0 %455  ;;  %4992 = vmatprep.subr.bf16.mxu0 %v5113_v23 }
  0xe7   :  { %473 = vst.msk [vmem:[#allocation3 + $0x98] sm:$0xff] %vm240_vm2, %v456_v62  ;;  %v229_v19 = vpop.permute.xlu1 %228 }
  0xe8   :  { %247 = vst.msk [vmem:[#allocation3 + $0x90] sm:$0xff] %vm240_vm2, %v229_v19  ;;  %v5114_v19 = vld [vmem:[%s7845_s4 + $0xa8] sm:$0xff]  }
  0xe9   :  { %4993 = vmatpush3.bf16.msra.mxu0 %v5113_v23 }
  0xea   :  { %v521_v24 = vpop.permute.xlu0 %520  ;;  %v652_v53 = vld [vmem:[#allocation3 + $0x80] sm:$0xff]  ;;  %4994 = vmatprep.subr.bf16.mxu0 %v5114_v19 }
  0xeb   :  { %538 = vst.msk [vmem:[#allocation3 + $0x98] sm:$0xff] %vm305_vm3, %v521_v24  ;;  %v294_v60 = vpop.permute.xlu1 %293  ;;  %924 = vmatprep.mubr.bf16.mxu0 %v652_v53  ;;  %v651_v27 = vld [vmem:[#allocation3 + $0x78] sm:$0xff] }
  0xec   :  { %312 = vst.msk [vmem:[#allocation3 + $0x90] sm:$0xff] %vm305_vm3, %v294_v60  ;;  %925 = vmatmul.mubr.bf16.gmra.mrb[20].mxu0 %v651_v27 }
  0xed   :  { %4995 = vmatpush3.bf16.msra.mxu0 %v5114_v19 }
  0xee   :  { %v585_v20 = vpop.permute.xlu0 %584 }
  0xef   :  { %602 = vst.msk [vmem:[#allocation3 + $0x98] sm:$0xff] %vm370_vm4, %v585_v20  ;;  %v359_v26 = vpop.permute.xlu1 %358 }
  0xf0   :  { %377 = vst.msk [vmem:[#allocation3 + $0x90] sm:$0xff] %vm370_vm4, %v359_v26 }
  0xf2   :  { %v458_v28 = vpop.permute.xlu0 %457 }
  0xf3   :  { %474 = vst.msk [vmem:[#allocation3 + $0xb0] sm:$0xff] %vm240_vm2, %v458_v28  ;;  %v231_v29 = vpop.permute.xlu1 %230 }
  0xf4   :  { %248 = vst.msk [vmem:[#allocation3 + $0xa8] sm:$0xff] %vm240_vm2, %v231_v29 }
  0xf6   :  { %v523_v31 = vpop.permute.xlu0 %522  ;;  %v655_v56 = vld [vmem:[#allocation3 + $0x98] sm:$0xff] }
  0xf7   :  { %539 = vst.msk [vmem:[#allocation3 + $0xb0] sm:$0xff] %vm305_vm3, %v523_v31  ;;  %v296_v37 = vpop.permute.xlu1 %295  ;;  %932 = vmatprep.mubr.bf16.mxu0 %v655_v56  ;;  %v654_v36 = vld [vmem:[#allocation3 + $0x90] sm:$0xff] }
  0xf8   :  { %313 = vst.msk [vmem:[#allocation3 + $0xa8] sm:$0xff] %vm305_vm3, %v296_v37  ;;  %933 = vmatmul.mubr.bf16.gmra.mrb[24].mxu0 %v654_v36 }
  0xfa   :  { %v587_v32 = vpop.permute.xlu0 %586 }
  0xfb   :  { %603 = vst.msk [vmem:[#allocation3 + $0xb0] sm:$0xff] %vm370_vm4, %v587_v32  ;;  %v361_v34 = vpop.permute.xlu1 %360 }
  0xfc   :  { %378 = vst.msk [vmem:[#allocation3 + $0xa8] sm:$0xff] %vm370_vm4, %v361_v34  ;;  %v5115_v34 = vld [vmem:[%s7845_s4 + $0xb0] sm:$0xff]  }
  0xfd   :  { %4996 = vmatprep.subr.bf16.mxu0 %v5115_v34 }
  0xfe   :  { %4997 = vmatpush3.bf16.msra.mxu0 %v5115_v34 }
 0x102   :  { %v658_v43 = vld [vmem:[#allocation3 + $0xb0] sm:$0xff] }
 0x103   :  { %940 = vmatprep.mubr.bf16.mxu0 %v658_v43  ;;  %v657_v50 = vld [vmem:[#allocation3 + $0xa8] sm:$0xff] }
 0x104   :  { %941 = vmatmul.mubr.bf16.gmra.mrb[28].mxu0 %v657_v50 }
 0x12d   :  { %v4970_v54 = vpop.f32.mrb[0].mxu1 }
 0x12e   :  { %v983_v41 = vpop.f32.mrb[1].mxu1 }
 0x12f   :  { %v4971_v42 = vpop.f32.mrb[2].mxu1 }
 0x130   :  { %v986_v57 = vpop.f32.mrb[3].mxu1 }
 0x135   :  { %v5764_v30 = vpop.f32.mrb[4].mxu1 }
 0x136   :  { %v5766_v44 = vpop.f32.mrb[5].mxu1 }
 0x137   :  { %v5768_v38 = vpop.f32.mrb[6].mxu1 }
 0x138   :  { %v5770_v48 = vpop.f32.mrb[7].mxu1 }
 0x13d   :  { %v5772_v35 = vpop.f32.mrb[8].mxu1 }
 0x13e   :  { %v5774_v25 = vpop.f32.mrb[9].mxu1 }
 0x13f   :  { %v5776_v33 = vpop.f32.mrb[10].mxu1 }
 0x140   :  { %v5778_v52 = vpop.f32.mrb[11].mxu1 }
 0x145   :  { %v5780_v58 = vpop.f32.mrb[12].mxu1 }
 0x146   :  { %v5782_v59 = vpop.f32.mrb[13].mxu1 }
 0x147   :  { %v5784_v0 = vpop.f32.mrb[14].mxu1 }
 0x148   :  { %v5786_v47 = vpop.f32.mrb[15].mxu1 }
 0x183   :  { %v4648_v45 = vpop.f32.mrb[0].mxu0 }
 0x184   :  { %v4649_v40 = vpop.f32.mrb[1].mxu0 }
 0x185   :  { %v4650_v49 = vadd.f32 %v4649_v40, %v4648_v45  ;;  %v4651_v55 = vpop.f32.mrb[2].mxu0 }
 0x186   :  { %v4652_v61 = vpop.f32.mrb[3].mxu0 }
 0x187   :  { %v4653_v63 = vadd.f32 %v4652_v61, %v4651_v55  ;;  %v5794_v4 = vadd.f32 %v4650_v49, %v983_v41  ;;  %v5116_v55 = vld [vmem:[%s7845_s4 + $0xb8] sm:$0xff]  }
 0x188   :  { %4998 = vmatprep.subr.bf16.mxu0 %v5116_v55 }
 0x189   :  { %v5799_v22 = vadd.f32 %v4653_v63, %v986_v57  ;;  %v1086_v29 = vmul.f32 %v5794_v4, %v5794_v4  ;;  %v1048_v37 = vsel %vm53_vm0, %v5794_v4, 0.0  ;;  %4999 = vmatpush3.bf16.msra.mxu0 %v5116_v55 }
 0x18b   :  { %v1087_v26 = vmul.f32 %v5799_v22, %v5799_v22  ;;  %v1049_v31 = vsel %vm53_vm0, %v5799_v22, 0.0  ;;  %v1102_v50 = vsel %vm53_vm0, %v1086_v29, 0.0 }
 0x18c   :  { %v1050_v43 = vadd.f32 %v1049_v31, %v1048_v37 }
 0x18d   :  { %v1103_v36 = vsel %vm53_vm0, %v1087_v26, 0.0 }
 0x18e   :  { %v1104_v57 = vadd.f32 %v1103_v36, %v1102_v50 }
 0x18f   :  { %v4654_v21 = vpop.f32.mrb[4].mxu0 }
 0x190   :  { %v4655_v62 = vpop.f32.mrb[5].mxu0 }
 0x191   :  { %v4656_v24 = vadd.f32 %v4655_v62, %v4654_v21  ;;  %v4657_v53 = vpop.f32.mrb[6].mxu0 }
 0x192   :  { %v4658_v60 = vpop.f32.mrb[7].mxu0 }
 0x193   :  { %v5810_v27 = vadd.f32 %v4970_v54, %v4656_v24  ;;  %v4659_v20 = vadd.f32 %v4658_v60, %v4657_v53 }
 0x195   :  { %v5814_v28 = vadd.f32 %v4971_v42, %v4659_v20  ;;  %v1088_v56 = vmul.f32 %v5810_v27, %v5810_v27  ;;  %v1051_v32 = vsel %vm53_vm0, %v5810_v27, 0.0 }
 0x196   :  { %v1052_v39 = vadd.f32 %v1051_v32, %v1050_v43 }
 0x197   :  { %v1105_v54 = vsel %vm53_vm0, %v1088_v56, 0.0  ;;  %v1089_v41 = vmul.f32 %v5814_v28, %v5814_v28  ;;  %v1053_v40 = vsel %vm53_vm0, %v5814_v28, 0.0 }
 0x198   :  { %v1106_v61 = vadd.f32 %v1105_v54, %v1104_v57  ;;  %v1054_v21 = vadd.f32 %v1053_v40, %v1052_v39 }
 0x199   :  { %v1107_v18 = vsel %vm53_vm0, %v1089_v41, 0.0 }
 0x19a   :  { %v1108_v60 = vadd.f32 %v1107_v18, %v1106_v61 }
 0x19b   :  { %v4660_v42 = vpop.f32.mrb[8].mxu0 }
 0x19c   :  { %v4661_v45 = vpop.f32.mrb[9].mxu0 }
 0x19d   :  { %v4662_v46 = vadd.f32 %v4661_v45, %v4660_v42  ;;  %v4663_v49 = vpop.f32.mrb[10].mxu0 }
 0x19e   :  { %v4664_v63 = vpop.f32.mrb[11].mxu0 }
 0x19f   :  { %v4665_v51 = vadd.f32 %v4664_v63, %v4663_v49  ;;  %v5841_v23 = vadd.f32 %v4662_v46, %v5766_v44 }
 0x1a1   :  { %v1055_v62 = vsel %vm53_vm0, %v5841_v23, 0.0  ;;  %v1090_v19 = vmul.f32 %v5841_v23, %v5841_v23  ;;  %v5848_v24 = vadd.f32 %v4665_v51, %v5770_v48 }
 0x1a2   :  { %v1056_v53 = vadd.f32 %v1055_v62, %v1054_v21 }
 0x1a3   :  { %v1109_v20 = vsel %vm53_vm0, %v1090_v19, 0.0  ;;  %v1057_v44 = vsel %vm53_vm0, %v5848_v24, 0.0  ;;  %v1091_v26 = vmul.f32 %v5848_v24, %v5848_v24 }
 0x1a4   :  { %v1110_v29 = vadd.f32 %v1109_v20, %v1108_v60  ;;  %v1058_v31 = vadd.f32 %v1057_v44, %v1056_v53 }
 0x1a5   :  { %v1111_v56 = vsel %vm53_vm0, %v1091_v26, 0.0 }
 0x1a6   :  { %v1112_v37 = vadd.f32 %v1111_v56, %v1110_v29 }
 0x1a7   :  { %v4666_v36 = vpop.f32.mrb[12].mxu0 }
 0x1a8   :  { %v4667_v32 = vpop.f32.mrb[13].mxu0 }
 0x1a9   :  { %v4668_v34 = vadd.f32 %v4667_v32, %v4666_v36  ;;  %v4669_v48 = vpop.f32.mrb[14].mxu0 }
 0x1aa   :  { %v4670_v43 = vpop.f32.mrb[15].mxu0 }
 0x1ab   :  { %v5857_v50 = vadd.f32 %v5764_v30, %v4668_v34  ;;  %v4671_v54 = vadd.f32 %v4670_v43, %v4669_v48 }
 0x1ad   :  { %v1059_v41 = vsel %vm53_vm0, %v5857_v50, 0.0  ;;  %v1092_v42 = vmul.f32 %v5857_v50, %v5857_v50  ;;  %v5864_v57 = vadd.f32 %v5768_v38, %v4671_v54 }
 0x1ae   :  { %v1060_v39 = vadd.f32 %v1059_v41, %v1058_v31 }
 0x1af   :  { %v1113_v45 = vsel %vm53_vm0, %v1092_v42, 0.0  ;;  %v1061_v40 = vsel %vm53_vm0, %v5864_v57, 0.0  ;;  %v1093_v30 = vmul.f32 %v5864_v57, %v5864_v57 }
 0x1b0   :  { %v1114_v46 = vadd.f32 %v1113_v45, %v1112_v37  ;;  %v1062_v49 = vadd.f32 %v1061_v40, %v1060_v39 }
 0x1b1   :  { %v1115_v55 = vsel %vm53_vm0, %v1093_v30, 0.0 }
 0x1b2   :  { %v1116_v61 = vadd.f32 %v1115_v55, %v1114_v46 }
 0x1b3   :  { %v4672_v63 = vpop.f32.mrb[16].mxu0 }
 0x1b4   :  { %v4673_v18 = vpop.f32.mrb[17].mxu0 }
 0x1b5   :  { %v4674_v51 = vadd.f32 %v4673_v18, %v4672_v63  ;;  %v4675_v21 = vpop.f32.mrb[18].mxu0 }
 0x1b6   :  { %v4676_v38 = vpop.f32.mrb[19].mxu0 }
 0x1b7   :  { %v4677_v62 = vadd.f32 %v4676_v38, %v4675_v21  ;;  %v5873_v19 = vadd.f32 %v4674_v51, %v5774_v25 }
 0x1b9   :  { %v1063_v53 = vsel %vm53_vm0, %v5873_v19, 0.0  ;;  %v1094_v60 = vmul.f32 %v5873_v19, %v5873_v19  ;;  %v5880_v20 = vadd.f32 %v4677_v62, %v5778_v52 }
 0x1ba   :  { %v1064_v44 = vadd.f32 %v1063_v53, %v1062_v49 }
 0x1bb   :  { %v1117_v26 = vsel %vm53_vm0, %v1094_v60, 0.0  ;;  %v1065_v29 = vsel %vm53_vm0, %v5880_v20, 0.0  ;;  %v1095_v31 = vmul.f32 %v5880_v20, %v5880_v20 }
 0x1bc   :  { %v1118_v25 = vadd.f32 %v1117_v26, %v1116_v61  ;;  %v1066_v56 = vadd.f32 %v1065_v29, %v1064_v44 }
 0x1bd   :  { %v1119_v37 = vsel %vm53_vm0, %v1095_v31, 0.0 }
 0x1be   :  { %v1120_v36 = vadd.f32 %v1119_v37, %v1118_v25 }
 0x1bf   :  { %v4678_v32 = vpop.f32.mrb[20].mxu0 }
 0x1c0   :  { %v4679_v34 = vpop.f32.mrb[21].mxu0 }
 0x1c1   :  { %v4680_v48 = vadd.f32 %v4679_v34, %v4678_v32  ;;  %v4681_v43 = vpop.f32.mrb[22].mxu0 }
 0x1c2   :  { %v4682_v52 = vpop.f32.mrb[23].mxu0 }
 0x1c3   :  { %v5889_v54 = vadd.f32 %v5772_v35, %v4680_v48  ;;  %v4683_v41 = vadd.f32 %v4682_v52, %v4681_v43 }
 0x1c5   :  { %v1067_v42 = vsel %vm53_vm0, %v5889_v54, 0.0  ;;  %v1096_v39 = vmul.f32 %v5889_v54, %v5889_v54  ;;  %v5896_v45 = vadd.f32 %v5776_v33, %v4683_v41 }
 0x1c6   :  { %v1068_v40 = vadd.f32 %v1067_v42, %v1066_v56 }
 0x1c7   :  { %v1121_v30 = vsel %vm53_vm0, %v1096_v39, 0.0  ;;  %v1069_v46 = vsel %vm53_vm0, %v5896_v45, 0.0  ;;  %v1097_v35 = vmul.f32 %v5896_v45, %v5896_v45 }
 0x1c8   :  { %v1122_v49 = vadd.f32 %v1121_v30, %v1120_v36  ;;  %v1070_v55 = vadd.f32 %v1069_v46, %v1068_v40 }
 0x1c9   :  { %v1123_v61 = vsel %vm53_vm0, %v1097_v35, 0.0 }
 0x1ca   :  { %v1124_v63 = vadd.f32 %v1123_v61, %v1122_v49 }
 0x1cb   :  { %v4684_v18 = vpop.f32.mrb[24].mxu0 }
 0x1cc   :  { %v4685_v51 = vpop.f32.mrb[25].mxu0 }
 0x1cd   :  { %v4686_v21 = vadd.f32 %v4685_v51, %v4684_v18  ;;  %v4687_v38 = vpop.f32.mrb[26].mxu0 }
 0x1ce   :  { %v4688_v33 = vpop.f32.mrb[27].mxu0 }
 0x1cf   :  { %v4689_v62 = vadd.f32 %v4688_v33, %v4687_v38  ;;  %v5905_v53 = vadd.f32 %v4686_v21, %v5782_v59 }
 0x1d1   :  { %v1071_v60 = vsel %vm53_vm0, %v5905_v53, 0.0  ;;  %v1098_v44 = vmul.f32 %v5905_v53, %v5905_v53  ;;  %v5912_v26 = vadd.f32 %v4689_v62, %v5786_v47 }
 0x1d2   :  { %v1072_v29 = vadd.f32 %v1071_v60, %v1070_v55 }
 0x1d3   :  { %v1125_v31 = vsel %vm53_vm0, %v1098_v44, 0.0  ;;  %v1073_v25 = vsel %vm53_vm0, %v5912_v26, 0.0  ;;  %v1099_v56 = vmul.f32 %v5912_v26, %v5912_v26 }
 0x1d4   :  { %v1126_v59 = vadd.f32 %v1125_v31, %v1124_v63  ;;  %v1074_v37 = vadd.f32 %v1073_v25, %v1072_v29 }
 0x1d5   :  { %v1127_v36 = vsel %vm53_vm0, %v1099_v56, 0.0 }
 0x1d6   :  { %v1128_v32 = vadd.f32 %v1127_v36, %v1126_v59 }
 0x1d7   :  { %v4690_v34 = vpop.f32.mrb[28].mxu0 }
 0x1d8   :  { %v4691_v48 = vpop.f32.mrb[29].mxu0 }
 0x1d9   :  { %v4692_v43 = vadd.f32 %v4691_v48, %v4690_v34  ;;  %v4693_v52 = vpop.f32.mrb[30].mxu0  ;;  %v5117_v48 = vld [vmem:[%s7845_s4 + $0x40] sm:$0xff]  }
 0x1da   :  { %v4694_v47 = vpop.f32.mrb[31].mxu0  ;;  %4712 = vmatprep.subr.bf16.mxu1 %v5117_v48 }
 0x1db   :  { %v5921_v41 = vadd.f32 %v5780_v58, %v4692_v43  ;;  %v4695_v42 = vadd.f32 %v4694_v47, %v4693_v52  ;;  %v5118_v43 = vld [vmem:[%s7845_s4] sm:$0xff]   ;;  %v5119_v52 = vld [vmem:[%s7845_s4 + $0x48] sm:$0xff]   ;;  %v1148_v47 = vlaneseq }
 0x1dc   :  { %4713 = vmatpush3.bf16.msra.mxu1 %v5118_v43 }
 0x1dd   :  { %v1075_v39 = vsel %vm53_vm0, %v5921_v41, 0.0  ;;  %v1100_v40 = vmul.f32 %v5921_v41, %v5921_v41  ;;  %v5928_v30 = vadd.f32 %v5784_v0, %v4695_v42  ;;  %v5120_v42 = vld [vmem:[%s7845_s4 + $0x8] sm:$0xff]   ;;  %4714 = vmatprep.subr.bf16.mxu1 %v5119_v52 }
 0x1de   :  { %v1076_v46 = vadd.f32 %v1075_v39, %v1074_v37  ;;  %v5121_v39 = vld [vmem:[%s7845_s4 + $0x50] sm:$0xff]  }
 0x1df   :  { %v1129_v35 = vsel %vm53_vm0, %v1100_v40, 0.0  ;;  %v1077_v49 = vsel %vm53_vm0, %v5928_v30, 0.0  ;;  %v1101_v58 = vmul.f32 %v5928_v30, %v5928_v30  ;;  %v1149_v40 = vshrl.u32 %v1148_v47, 7 }
 0x1e0   :  { %v1130_v55 = vadd.f32 %v1129_v35, %v1128_v32  ;;  %v1078_v61 = vadd.f32 %v1077_v49, %v1076_v46  ;;  %4715 = vmatpush3.bf16.msra.mxu1 %v5120_v42  ;;  %v5122_v46 = vld [vmem:[%s7845_s4 + $0x10] sm:$0xff]   ;;  %v5123_v35 = vld [vmem:[%s7845_s4 + $0x58] sm:$0xff]   ;;  %v1046_v49 = vld [vmem:[%s7846_s2] sm:$0x1] }
 0x1e1   :  { %v1131_v63 = vsel %vm53_vm0, %v1101_v58, 0.0  ;;  %4716 = vmatprep.subr.bf16.mxu1 %v5121_v39  ;;  %v5960_v58 = vsub.s32 0, %v1149_v40 }
 0x1e2   :  { %v1079_v18 = vrot.slane %v1078_v61, 4  ;;  %v1132_v51 = vadd.f32 %v1131_v63, %v1130_v55 }
 0x1e4   :  { %v1080_v21 = vadd.f32 %v1079_v18, %v1078_v61  ;;  %v1133_v38 = vrot.slane %v1132_v51, 4  ;;  %4717 = vmatpush3.bf16.msra.mxu1 %v5122_v46  ;;  %v5124_v61 = vld [vmem:[%s7845_s4 + $0x18] sm:$0xff]   ;;  %v1047_v18 = vld [vmem:[%s7847_s3] sm:$0x1] }
 0x1e5   :  { %4718 = vmatprep.subr.bf16.mxu1 %v5123_v35 }
 0x1e6   :  { %v1081_v33 = vrot.slane %v1080_v21, 2  ;;  %v1134_v0 = vadd.f32 %v1133_v38, %v1132_v51 }
 0x1e8   :  { %v1082_v62 = vadd.f32 %v1081_v33, %v1080_v21  ;;  %v1135_v60 = vrot.slane %v1134_v0, 2  ;;  %4719 = vmatpush3.bf16.msra.mxu1 %v5124_v61 }
 0x1ea   :  { %v1083_v44 = vrot.slane %v1082_v62, 1  ;;  %v1136_v29 = vadd.f32 %v1135_v60, %v1134_v0 }
 0x1ec   :  { %v1084_v31 = vadd.f32 %v1083_v44, %v1082_v62  ;;  %v1137_v25 = vrot.slane %v1136_v29, 1 }
 0x1ee   :  { %v1085_v56 = vmul.f32 0.0078125, %v1084_v31  ;;  %v1138_v59 = vadd.f32 %v1137_v25, %v1136_v29 }
 0x1f0   :  { %v1139_v37 = vmul.f32 0.0078125, %v1138_v59  ;;  %v1140_v36 = vmul.f32 %v1085_v56, %v1085_v56 }
 0x1f2   :  { %v1141_v32 = vsub.f32 %v1139_v37, %v1140_v36 }
 0x1f4   :  { %v1142_v34 = vadd.f32 1e-05, %v1141_v32 }
 0x1f6   :  { %5181 = vrsqrt.f32 %v1142_v34 }
 0x200   :  { %v5182_v55 = vpop.eup %5181 }
 0x201   :  { %v1144_v63 = vmul.f32 %v5182_v55, %v1046_v49 }
 0x203   :  { %v1145_v51 = vmul.f32 %v1144_v63, %v1085_v56  ;;  %v1151_v21 = vrot.slane %v1144_v63, %v5960_v58 }
 0x205   :  { %v1146_v38 = vsub.f32 %v1047_v18, %v1145_v51  ;;  %v1156_v33 = vmul.f32 %v1151_v21, %v5814_v28  ;;  %v1157_v0 = vmul.f32 %v1151_v21, %v5841_v23  ;;  %v1158_v62 = vmul.f32 %v1151_v21, %v5848_v24 }
 0x206   :  { %v1159_v60 = vmul.f32 %v1151_v21, %v5857_v50  ;;  %v1162_v44 = vmul.f32 %v1151_v21, %v5880_v20  ;;  %v1163_v29 = vmul.f32 %v1151_v21, %v5889_v54  ;;  %v1164_v31 = vmul.f32 %v1151_v21, %v5896_v45 }
 0x207   :  { %v1165_v25 = vmul.f32 %v1151_v21, %v5905_v53  ;;  %v1166_v56 = vmul.f32 %v1151_v21, %v5912_v26  ;;  %v1167_v59 = vmul.f32 %v1151_v21, %v5921_v41  ;;  %v1168_v28 = vmul.f32 %v1151_v21, %v5928_v30 }
 0x208   :  { %v1173_v23 = vrot.slane %v1146_v38, %v5960_v58  ;;  %v1153_v24 = vmul.f32 %v1151_v21, %v5794_v4  ;;  %v1154_v50 = vmul.f32 %v1151_v21, %v5799_v22  ;;  %v1155_v20 = vmul.f32 %v1151_v21, %v5810_v27  ;;  %v5125_v22 = vld [vmem:[%s7845_s4 + $0x60] sm:$0xff]  }
 0x209   :  { %v1160_v54 = vmul.f32 %v1151_v21, %v5864_v57  ;;  %v1161_v45 = vmul.f32 %v1151_v21, %v5873_v19  ;;  %v5126_v27 = vld [vmem:[%s7845_s4 + $0x20] sm:$0xff]   ;;  %4720 = vmatprep.subr.bf16.mxu1 %v5125_v22 }
 0x20a   :  { %v1178_v37 = vadd.f32 %v1173_v23, %v1156_v33  ;;  %v1179_v53 = vadd.f32 %v1173_v23, %v1157_v0  ;;  %v1190_v36 = vadd.f32 %v1173_v23, %v1168_v28  ;;  %v1175_v26 = vadd.f32 %v1173_v23, %v1153_v24  ;;  %4721 = vmatpush3.bf16.msra.mxu1 %v5126_v27  ;;  %v5127_v33 = vld [vmem:[%s7845_s4 + $0x68] sm:$0xff]  }
 0x20b   :  { %v1176_v32 = vadd.f32 %v1173_v23, %v1154_v50  ;;  %v1177_v41 = vadd.f32 %v1173_v23, %v1155_v20  ;;  %v1180_v34 = vadd.f32 %v1173_v23, %v1158_v62  ;;  %v1181_v30 = vadd.f32 %v1173_v23, %v1159_v60  ;;  %v5128_v0 = vld [vmem:[%s7845_s4 + $0x28] sm:$0xff]   ;;  %4722 = vmatprep.subr.bf16.mxu1 %v5127_v33 }
 0x20c   :  { %v1194_v48 = vmax.f32 %v1178_v37, 0.0  ;;  %v1195_v43 = vmax.f32 %v1179_v53, 0.0  ;;  %v1206_v52 = vmax.f32 %v1190_v36, 0.0  ;;  %v1191_v4 = vmax.f32 %v1175_v26, 0.0  ;;  %v1319_v24 = vld [vmem:[#allocation2 + $0x2] sm:$0xff] }
 0x20d   :  { %v1192_v57 = vmax.f32 %v1176_v32, 0.0  ;;  %v1193_v19 = vmax.f32 %v1177_v41, 0.0  ;;  %v1196_v47 = vmax.f32 %v1180_v34, 0.0  ;;  %v1197_v42 = vmax.f32 %v1181_v30, 0.0 }
 0x20e   :  { %1222 = vst.msk [vmem:[#allocation2 + $0x121] sm:$0xff] %vm53_vm0, %v1206_v52  ;;  %1210 = vst.msk [vmem:[#allocation2 + $0x41] sm:$0xff] %vm53_vm0, %v1194_v48  ;;  %v1182_v39 = vadd.f32 %v1173_v23, %v1160_v54  ;;  %v1184_v40 = vadd.f32 %v1173_v23, %v1162_v44  ;;  %v1185_v46 = vadd.f32 %v1173_v23, %v1163_v29  ;;  %4723 = vmatpush3.bf16.msra.mxu1 %v5128_v0 }
 0x20f   :  { %1211 = vst.msk [vmem:[#allocation2 + $0x51] sm:$0xff] %vm53_vm0, %v1195_v43  ;;  %1207 = vst.msk [vmem:[#allocation2 + $0x11] sm:$0xff] %vm53_vm0, %v1191_v4  ;;  %v1186_v35 = vadd.f32 %v1173_v23, %v1164_v31  ;;  %v1187_v49 = vadd.f32 %v1173_v23, %v1165_v25  ;;  %v1188_v55 = vadd.f32 %v1173_v23, %v1166_v56  ;;  %v1255_v31 = vld [vmem:[#allocation2 + $0x1] sm:$0xff]  ;;  %v5129_v56 = vld [vmem:[%s7845_s4 + $0x70] sm:$0xff]  }
 0x210   :  { %1208 = vst.msk [vmem:[#allocation2 + $0x21] sm:$0xff] %vm53_vm0, %v1192_v57  ;;  %1209 = vst.msk [vmem:[#allocation2 + $0x31] sm:$0xff] %vm53_vm0, %v1193_v19  ;;  %v1189_v61 = vadd.f32 %v1173_v23, %v1167_v59  ;;  %v1183_v63 = vadd.f32 %v1173_v23, %v1161_v45  ;;  %v1198_v18 = vmax.f32 %v1182_v39, 0.0  ;;  %v1200_v51 = vmax.f32 %v1184_v40, 0.0  ;;  %v1223_v25 = vld [vmem:[#allocation2] sm:$0xff]  ;;  %v5130_v59 = vld [vmem:[%s7845_s4 + $0x30] sm:$0xff]   ;;  %4724 = vmatprep.subr.bf16.mxu1 %v5129_v56 }
 0x211   :  { %1212 = vst.msk [vmem:[#allocation2 + $0x61] sm:$0xff] %vm53_vm0, %v1196_v47  ;;  %1213 = vst.msk [vmem:[#allocation2 + $0x71] sm:$0xff] %vm53_vm0, %v1197_v42  ;;  %v1201_v21 = vmax.f32 %v1185_v46, 0.0  ;;  %v1202_v38 = vmax.f32 %v1186_v35, 0.0  ;;  %v1203_v62 = vmax.f32 %v1187_v49, 0.0  ;;  %v1204_v60 = vmax.f32 %v1188_v55, 0.0 }
 0x212   :  { %v1205_v44 = vmax.f32 %v1189_v61, 0.0  ;;  %v1199_v29 = vmax.f32 %v1183_v63, 0.0  ;;  %1214 = vst.msk [vmem:[#allocation2 + $0x81] sm:$0xff] %vm53_vm0, %v1198_v18  ;;  %1216 = vst.msk [vmem:[#allocation2 + $0xc1] sm:$0xff] %vm53_vm0, %v1200_v51  ;;  %4725 = vmatpush3.bf16.msra.mxu1 %v5130_v59  ;;  %v5193_v49 = vld [vmem:[#allocation2 + $0x92] sm:$0xff] }
 0x213   :  { %1217 = vst.msk [vmem:[#allocation2 + $0xd1] sm:$0xff] %vm53_vm0, %v1201_v21  ;;  %1218 = vst.msk [vmem:[#allocation2 + $0xe1] sm:$0xff] %vm53_vm0, %v1202_v38 }
 0x214   :  { %1219 = vst.msk [vmem:[#allocation2 + $0xf1] sm:$0xff] %vm53_vm0, %v1203_v62  ;;  %1220 = vst.msk [vmem:[#allocation2 + $0x101] sm:$0xff] %vm53_vm0, %v1204_v60 }
 0x215   :  { %1221 = vst.msk [vmem:[#allocation2 + $0x111] sm:$0xff] %vm53_vm0, %v1205_v44  ;;  %1215 = vst.msk [vmem:[#allocation2 + $0xb1] sm:$0xff] %vm53_vm0, %v1199_v29  ;;  %v6035_v48 = vld [vmem:[#allocation2 + $0x42] sm:$0xff] }
 0x216   :  { %v1479_v28 = vld [vmem:[#allocation2 + $0x12] sm:$0xff]  ;;  %v6049_v57 = vld [vmem:[#allocation2 + $0x40] sm:$0xff] }
 0x217   :  { %v1256_v23 = vld [vmem:[#allocation2 + $0x11] sm:$0xff]  ;;  %v1480_v20 = vld [vmem:[#allocation2 + $0x22] sm:$0xff]  ;;  %v1335_v47 = vpack.c.bf16 %v1479_v28, %v1319_v24 }
 0x218   :  { %v6020_v50 = vld [vmem:[#allocation2 + $0x10] sm:$0xff]  ;;  %v1271_v54 = vpack.c.bf16 %v1256_v23, %v1255_v31  ;;  %v6022_v45 = vld [vmem:[#allocation2 + $0x20] sm:$0xff]  ;;  %v1495_v36 = vpack.c.bf16 %v1480_v20, %v1479_v28 }
 0x219   :  { %v6024_v37 = vld [vmem:[#allocation2 + $0x30] sm:$0xff]  ;;  %v1239_v53 = vpack.c.bf16 %v6020_v50, %v1223_v25  ;;  %v1607_v41 = vld [vmem:[#allocation2 + $0x21] sm:$0xff]  ;;  %v1399_v25 = vpack.c.bf16 %v6022_v45, %v6020_v50 }
 0x21a   :  { %v1559_v26 = vpack.c.bf16 %v6024_v37, %v6022_v45  ;;  %v6029_v32 = vld [vmem:[#allocation2 + $0x32] sm:$0xff]  ;;  %1287 = vrot.lane.b32.xlu1 %v1271_v54, %s5197_s0  ;;  %v6039_v52 = vld [vmem:[#allocation2 + $0x62] sm:$0xff]  ;;  %v1463_v4 = vpack.c.bf16 %v1607_v41, %v1256_v23  ;;  %1511 = vrot.lane.b32.xlu0 %v1495_v36, %s5197_s0  ;;  %v1400_v14 = vpack.c.bf16 %v6049_v57, %v6024_v37 }
 0x21b   :  { %v1608_v34 = vld [vmem:[#allocation2 + $0x31] sm:$0xff]  ;;  %v6033_v30 = vpack.c.bf16 %v6029_v32, %v1480_v20  ;;  %1247 = vst.msk [vmem:[#allocation3] sm:$0xff] %vm53_vm0, %v1239_v53  ;;  %v6064_v40 = vld [vmem:[#allocation2 + $0x82] sm:$0xff]  ;;  %v1496_v1 = vpack.c.bf16 %v6035_v48, %v6029_v32 }
 0x21c   :  { %v6037_v43 = vld [vmem:[#allocation2 + $0x52] sm:$0xff]  ;;  %1248 = vst.msk [vmem:[#allocation3 + $0x18] sm:$0xff] %vm53_vm0, %v1559_v26  ;;  %v6066_v46 = vld [vmem:[#allocation2 + $0xc2] sm:$0xff]  ;;  %1471 = vst.msk [vmem:[#allocation3 + $0x8] sm:$0xff] %vm53_vm0, %v1463_v4  ;;  %v1690_v55 = vpack.c.bf16 %v5193_v49, %v6064_v40  ;;  %v1623_v24 = vpack.c.bf16 %v1608_v34, %v1607_v41 }
 0x21d   :  { %v6045_v22 = vpack.c.bf16 %v6037_v43, %v6035_v48  ;;  %v6047_v27 = vld [vmem:[#allocation2 + $0x72] sm:$0xff]  ;;  %1695 = vst.msk [vmem:[#allocation3 + $0x10] sm:$0xff] %vm53_vm0, %v6033_v30  ;;  %v6078_v63 = vld [vmem:[#allocation2 + $0x41] sm:$0xff] }
 0x21e   :  { %v6051_v19 = vld [vmem:[#allocation2 + $0x50] sm:$0xff]  ;;  %v6058_v42 = vpack.c.bf16 %v6047_v27, %v6039_v52  ;;  %v6082_v51 = vld [vmem:[#allocation2 + $0xe2] sm:$0xff]  ;;  %1351 = vrot.lane.b32.xlu1 %v1335_v47, %s5198_s22  ;;  %v1464_v0 = vpack.c.bf16 %v6078_v63, %v1608_v34  ;;  %1575 = vrot.lane.b32.xlu0 %v1559_v26, %s5198_s22  ;;  %1698 = vst.msk [vmem:[#allocation3 + $0x58] sm:$0xff] %vm53_vm0, %v1690_v55 }
 0x21f   :  { %v6062_v39 = vpack.c.bf16 %v6051_v19, %v6049_v57  ;;  %v6068_v35 = vld [vmem:[#allocation2 + $0xd2] sm:$0xff]  ;;  %1696 = vst.msk [vmem:[#allocation3 + $0x28] sm:$0xff] %vm53_vm0, %v6045_v22  ;;  %v6089_v38 = vld [vmem:[#allocation2 + $0x102] sm:$0xff] }
 0x220   :  { %v6076_v61 = vpack.c.bf16 %v6068_v35, %v6066_v46  ;;  %v6080_v18 = vld [vmem:[#allocation2 + $0x51] sm:$0xff]  ;;  %1697 = vst.msk [vmem:[#allocation3 + $0x40] sm:$0xff] %vm53_vm0, %v6058_v42  ;;  %v6108_v44 = vld [vmem:[#allocation2 + $0x60] sm:$0xff]  ;;  %1472 = vst.msk [vmem:[#allocation3 + $0x20] sm:$0xff] %vm53_vm0, %v1464_v0 }
 0x221   :  { %v6087_v21 = vld [vmem:[#allocation2 + $0xf2] sm:$0xff]  ;;  %1249 = vst.msk [vmem:[#allocation3 + $0x30] sm:$0xff] %vm53_vm0, %v6062_v39  ;;  %v6112_v31 = vld [vmem:[#allocation2 + $0x61] sm:$0xff] }
 0x222   :  { %v6091_v33 = vld [vmem:[#allocation2 + $0x112] sm:$0xff]  ;;  %1699 = vst.msk [vmem:[#allocation3 + $0x70] sm:$0xff] %vm53_vm0, %v6076_v61  ;;  %v6102_v62 = vpack.c.bf16 %v6087_v21, %v6082_v51  ;;  %v6122_v28 = vld [vmem:[#allocation2 + $0x122] sm:$0xff]  ;;  %v1465_v23 = vpack.c.bf16 %v6112_v31, %v6080_v18  ;;  %1415 = vrot.lane.b32.xlu1 %v1399_v25, %s5199_s23  ;;  %1639 = vrot.lane.b32.xlu0 %v1623_v24, %s5199_s23 }
 0x223   :  { %v6106_v60 = vpack.c.bf16 %v6091_v33, %v6089_v38  ;;  %v6110_v29 = vld [vmem:[#allocation2 + $0x70] sm:$0xff]  ;;  %v6132_v54 = vld [vmem:[#allocation2 + $0x81] sm:$0xff] }
 0x224   :  { %v6118_v56 = vpack.c.bf16 %v6110_v29, %v6108_v44  ;;  %v6120_v59 = vld [vmem:[#allocation2 + $0x71] sm:$0xff]  ;;  %1700 = vst.msk [vmem:[#allocation3 + $0x88] sm:$0xff] %vm53_vm0, %v6102_v62  ;;  %v1231_v53 = vld [vmem:[#allocation2 + $0xa0] sm:$0xff]  ;;  %1473 = vst.msk [vmem:[#allocation3 + $0x38] sm:$0xff] %vm53_vm0, %v1465_v23 }
 0x225   :  { %1701 = vst.msk [vmem:[#allocation3 + $0xa0] sm:$0xff] %vm53_vm0, %v6106_v60  ;;  %v5194_v50 = vld [vmem:[#allocation2 + $0x132] sm:$0xff]  ;;  %v6137_v36 = vld [vmem:[#allocation2 + $0xc0] sm:$0xff]  ;;  %v1466_v55 = vpack.c.bf16 %v6132_v54, %v6120_v59 }
 0x226   :  { %v1694_v20 = vpack.c.bf16 %v5194_v50, %v6122_v28  ;;  %v6134_v45 = vld [vmem:[#allocation2 + $0xb1] sm:$0xff]  ;;  %v6141_v41 = vld [vmem:[#allocation2 + $0xc1] sm:$0xff]  ;;  %1250 = vst.msk [vmem:[#allocation3 + $0x48] sm:$0xff] %vm53_vm0, %v6118_v56  ;;  %1289 = vrot.lane.b32.xlu1 %v1623_v24, %s5197_s0  ;;  %1513 = vrot.lane.b32.xlu0 %v1496_v1, %s5197_s0 }
 0x227   :  { %v6139_v26 = vld [vmem:[#allocation2 + $0xd0] sm:$0xff]  ;;  %v1467_v0 = vpack.c.bf16 %v6141_v41, %v6134_v45  ;;  %v1708_v25 = vld [vmem:[#allocation3 + $0x28] sm:$0xff]  ;;  %v6160_v23 = vld [vmem:[#allocation2 + $0xe0] sm:$0xff]  ;;  %1474 = vst.msk [vmem:[#allocation3 + $0x50] sm:$0xff] %vm53_vm0, %v1466_v55 }
 0x228   :  { %v1705_v34 = vld [vmem:[#allocation3 + $0x10] sm:$0xff]  ;;  %1702 = vst.msk [vmem:[#allocation3 + $0xb8] sm:$0xff] %vm53_vm0, %v1694_v20  ;;  %v6150_v4 = vpack.c.bf16 %v6139_v26, %v6137_v36  ;;  %v1711_v10 = vld [vmem:[#allocation3 + $0x40] sm:$0xff]  ;;  %v5131_v1 = vld [vmem:[%s7845_s4 + $0x78] sm:$0xff]  }
 0x229   :  { %v6152_v47 = vld [vmem:[#allocation2 + $0xd1] sm:$0xff]  ;;  %5000 = vmatprep.mubr.bf16.mxu0 %v1705_v34  ;;  %v6171_v16 = vld [vmem:[#allocation2 + $0xe1] sm:$0xff]  ;;  %1475 = vst.msk [vmem:[#allocation3 + $0x68] sm:$0xff] %vm53_vm0, %v1467_v0  ;;  %4726 = vmatprep.subr.bf16.mxu1 %v5131_v1 }
 0x22a   :  { %v6154_v49 = vld [vmem:[#allocation2 + $0xb0] sm:$0xff]  ;;  %5001 = vmatmul.mubr.bf16.vlgmr.msra.gmra.mrb[32].mxu0 %v1708_v25  ;;  %1252 = vst.msk [vmem:[#allocation3 + $0x78] sm:$0xff] %vm53_vm0, %v6150_v4  ;;  %v1468_v32 = vpack.c.bf16 %v6171_v16, %v6152_v47  ;;  %v6188_v34 = vld [vmem:[#allocation2 + $0x101] sm:$0xff]  ;;  %v5132_v25 = vld [vmem:[%s7845_s4 + $0x38] sm:$0xff]   ;;  %1353 = vrot.lane.b32.xlu1 %v6033_v30, %s5198_s22 }
 0x22b   :  { %v6162_v50 = vld [vmem:[#allocation2 + $0xf0] sm:$0xff]  ;;  %v1243_v20 = vpack.c.bf16 %v6154_v49, %v1231_v53  ;;  %5004 = vmatprep.mubr.bf16.mxu0 %v1711_v10  ;;  %v6180_v53 = vld [vmem:[#allocation2 + $0x100] sm:$0xff]  ;;  %1577 = vrot.lane.b32.xlu0 %v6062_v39, %s5198_s22  ;;  %v1497_v39 = vpack.c.bf16 %v6039_v52, %v6037_v43  ;;  %v1720_v37 = vld [vmem:[#allocation3 + $0x88] sm:$0xff]  ;;  %v1625_v43 = vpack.c.bf16 %v6120_v59, %v6112_v31 }
 0x22c   :  { %v6169_v17 = vpack.c.bf16 %v6162_v50, %v6160_v23  ;;  %v6173_v15 = vld [vmem:[#allocation2 + $0xf1] sm:$0xff]  ;;  %1476 = vst.msk [vmem:[#allocation3 + $0x80] sm:$0xff] %vm53_vm0, %v1468_v32  ;;  %v6201_v0 = vld [vmem:[#allocation2 + $0x121] sm:$0xff]  ;;  %4727 = vmatpush3.bf16.msra.mxu1 %v5132_v25 }
 0x22d   :  { %1251 = vst.msk [vmem:[#allocation3 + $0x60] sm:$0xff] %vm53_vm0, %v1243_v20  ;;  %v6186_v48 = vld [vmem:[#allocation2 + $0x110] sm:$0xff]  ;;  %v1469_v24 = vpack.c.bf16 %v6188_v34, %v6173_v15  ;;  %v1714_v32 = vld [vmem:[#allocation3 + $0x58] sm:$0xff]  ;;  %v1723_v57 = vld [vmem:[#allocation3 + $0xa0] sm:$0xff] }
 0x22e   :  { %v6190_v55 = vld [vmem:[#allocation2 + $0x111] sm:$0xff]  ;;  %1253 = vst.msk [vmem:[#allocation3 + $0x90] sm:$0xff] %vm53_vm0, %v6169_v17  ;;  %v6196_v10 = vpack.c.bf16 %v6186_v48, %v6180_v53  ;;  %1417 = vrot.lane.b32.xlu1 %v1400_v14, %s5199_s23  ;;  %v1401_v14 = vpack.c.bf16 %v6108_v44, %v6051_v19  ;;  %v1263_v59 = vld [vmem:[#allocation2 + $0xa1] sm:$0xff] }
 0x22f   :  { %1477 = vst.msk [vmem:[#allocation3 + $0x98] sm:$0xff] %vm53_vm0, %v1469_v24  ;;  %v1470_v20 = vpack.c.bf16 %v6201_v0, %v6190_v55  ;;  %v1717_v30 = vld [vmem:[#allocation3 + $0x70] sm:$0xff]  ;;  %v1624_v24 = vpack.c.bf16 %v6080_v18, %v6078_v63  ;;  %v1726_v52 = vld [vmem:[#allocation3 + $0xb8] sm:$0xff]  ;;  %v1498_v63 = vpack.c.bf16 %v6064_v40, %v6047_v27  ;;  %v1275_v40 = vpack.c.bf16 %v6134_v45, %v1263_v59  ;;  %v1327_v25 = vld [vmem:[#allocation2 + $0xa2] sm:$0xff] }
 0x230   :  { %1254 = vst.msk [vmem:[#allocation3 + $0xa8] sm:$0xff] %vm53_vm0, %v6196_v10  ;;  %v1550_v18 = vld [vmem:[#allocation2 + $0x90] sm:$0xff]  ;;  %v1404_v45 = vpack.c.bf16 %v6160_v23, %v6139_v26 }
 0x231   :  { %1478 = vst.msk [vmem:[#allocation3 + $0xb0] sm:$0xff] %vm53_vm0, %v1470_v20  ;;  %1641 = vrot.lane.b32.xlu0 %v1624_v24, %s5199_s23  ;;  %v1614_v19 = vld [vmem:[#allocation2 + $0x91] sm:$0xff] }
 0x232   :  { %5005 = vmatmul.mubr.bf16.gmra.mrb[36].mxu0 %v1714_v32  ;;  %1291 = vrot.lane.b32.xlu1 %v1624_v24, %s5197_s0  ;;  %v1626_v31 = vpack.c.bf16 %v1614_v19, %v6132_v54  ;;  %v1487_v27 = vld [vmem:[#allocation2 + $0xb2] sm:$0xff]  ;;  %v1627_v54 = vpack.c.bf16 %v6152_v47, %v6141_v41 }
 0x233   :  { %5008 = vmatprep.mubr.bf16.mxu0 %v1717_v30  ;;  %v1499_v1 = vpack.c.bf16 %v6066_v46, %v1487_v27  ;;  %v1500_v46 = vpack.c.bf16 %v6082_v51, %v6068_v35  ;;  %v1501_v35 = vpack.c.bf16 %v6089_v38, %v6087_v21  ;;  %v1558_v51 = vld [vmem:[#allocation2 + $0x130] sm:$0xff] }
 0x234   :  { %v1622_v38 = vld [vmem:[#allocation2 + $0x131] sm:$0xff] }
 0x235   :  { %1515 = vrot.lane.b32.xlu0 %v1497_v39, %s5197_s0  ;;  %v1630_v26 = vpack.c.bf16 %v1622_v38, %v6201_v0 }
 0x236   :  { %1355 = vrot.lane.b32.xlu1 %v6045_v22, %s5198_s22  ;;  %v1549_v22 = vld [vmem:[#allocation2 + $0x80] sm:$0xff] }
 0x237   :  { %v1402_v44 = vpack.c.bf16 %v1549_v22, %v6110_v29  ;;  %v1403_v29 = vpack.c.bf16 %v6137_v36, %v6154_v49  ;;  %v1628_v36 = vpack.c.bf16 %v6173_v15, %v6171_v16  ;;  %v1405_v15 = vpack.c.bf16 %v6180_v53, %v6162_v50 }
 0x238   :  { %v1629_v16 = vpack.c.bf16 %v6190_v55, %v6188_v34 }
 0x239   :  { %1579 = vrot.lane.b32.xlu0 %v6118_v56, %s5198_s22  ;;  %v1562_v56 = vpack.c.bf16 %v1550_v18, %v1549_v22 }
 0x23a   :  { %5009 = vmatmul.mubr.bf16.gmra.mrb[40].mxu0 %v1720_v37  ;;  %1419 = vrot.lane.b32.xlu1 %v1401_v14, %s5199_s23 }
 0x23b   :  { %5012 = vmatprep.mubr.bf16.mxu0 %v1723_v57 }
 0x23d   :  { %1643 = vrot.lane.b32.xlu0 %v1625_v43, %s5199_s23 }
 0x23e   :  { %1293 = vrot.lane.b32.xlu1 %v1625_v43, %s5197_s0 }
 0x241   :  { %1517 = vrot.lane.b32.xlu0 %v1498_v63, %s5197_s0 }
 0x242   :  { %5013 = vmatmul.mubr.bf16.gmra.mrb[44].mxu0 %v1726_v52  ;;  %1357 = vrot.lane.b32.xlu1 %v6058_v42, %s5198_s22  ;;  %v1339_v42 = vpack.c.bf16 %v1487_v27, %v1327_v25 }
 0x245   :  { %1581 = vrot.lane.b32.xlu0 %v1562_v56, %s5198_s22 }
 0x246   :  { %1421 = vrot.lane.b32.xlu1 %v1402_v44, %s5199_s23 }
 0x249   :  { %1645 = vrot.lane.b32.xlu0 %v1626_v31, %s5199_s23 }
 0x24a   :  { %1295 = vrot.lane.b32.xlu1 %v1275_v40, %s5197_s0 }
 0x24d   :  { %1519 = vrot.lane.b32.xlu0 %v1499_v1, %s5197_s0 }
 0x24e   :  { %1359 = vrot.lane.b32.xlu1 %v1339_v42, %s5198_s22 }
 0x251   :  { %1583 = vrot.lane.b32.xlu0 %v6150_v4, %s5198_s22 }
 0x252   :  { %1423 = vrot.lane.b32.xlu1 %v1403_v29, %s5199_s23 }
 0x255   :  { %1647 = vrot.lane.b32.xlu0 %v1627_v54, %s5199_s23 }
 0x256   :  { %1297 = vrot.lane.b32.xlu1 %v1627_v54, %s5197_s0 }
 0x259   :  { %1521 = vrot.lane.b32.xlu0 %v1500_v46, %s5197_s0 }
 0x25a   :  { %1361 = vrot.lane.b32.xlu1 %v6076_v61, %s5198_s22  ;;  %v1557_v61 = vld [vmem:[#allocation2 + $0x120] sm:$0xff] }
 0x25b   :  { %v1566_v21 = vpack.c.bf16 %v1558_v51, %v1557_v61 }
 0x25d   :  { %1585 = vrot.lane.b32.xlu0 %v6169_v17, %s5198_s22  ;;  %v1502_v17 = vpack.c.bf16 %v6122_v28, %v6091_v33 }
 0x25e   :  { %1425 = vrot.lane.b32.xlu1 %v1404_v45, %s5199_s23 }
 0x261   :  { %1649 = vrot.lane.b32.xlu0 %v1628_v36, %s5199_s23 }
 0x262   :  { %1299 = vrot.lane.b32.xlu1 %v1628_v36, %s5197_s0 }
 0x265   :  { %1523 = vrot.lane.b32.xlu0 %v1501_v35, %s5197_s0 }
 0x266   :  { %1363 = vrot.lane.b32.xlu1 %v6102_v62, %s5198_s22  ;;  %v1406_v62 = vpack.c.bf16 %v1557_v61, %v6186_v48 }
 0x269   :  { %1587 = vrot.lane.b32.xlu0 %v6196_v10, %s5198_s22 }
 0x26a   :  { %1427 = vrot.lane.b32.xlu1 %v1405_v15, %s5199_s23 }
 0x26d   :  { %1651 = vrot.lane.b32.xlu0 %v1629_v16, %s5199_s23 }
 0x26e   :  { %1301 = vrot.lane.b32.xlu1 %v1629_v16, %s5197_s0 }
 0x271   :  { %1525 = vrot.lane.b32.xlu0 %v1502_v17, %s5197_s0 }
 0x272   :  { %1365 = vrot.lane.b32.xlu1 %v6106_v60, %s5198_s22 }
 0x275   :  { %1589 = vrot.lane.b32.xlu0 %v1566_v21, %s5198_s22 }
 0x276   :  { %1429 = vrot.lane.b32.xlu1 %v1406_v62, %s5199_s23 }
 0x279   :  { %1653 = vrot.lane.b32.xlu0 %v1630_v26, %s5199_s23 }
 0x28c   :  { %v1288_v33 = vpop.permute.xlu1 %1287  ;;  %v1512_v28 = vpop.permute.xlu0 %1511 }
 0x28d   :  { %1311 = vst.msk [vmem:[#allocation3] sm:$0xff] %vm240_vm2, %v1288_v33  ;;  %1535 = vst.msk [vmem:[#allocation3 + $0x8] sm:$0xff] %vm240_vm2, %v1512_v28 }
 0x290   :  { %v1352_v41 = vpop.permute.xlu1 %1351  ;;  %v1576_v4 = vpop.permute.xlu0 %1575 }
 0x291   :  { %1375 = vst.msk [vmem:[#allocation3] sm:$0xff] %vm305_vm3, %v1352_v41  ;;  %1599 = vst.msk [vmem:[#allocation3 + $0x8] sm:$0xff] %vm305_vm3, %v1576_v4 }
 0x294   :  { %v1416_v60 = vpop.permute.xlu1 %1415  ;;  %v1640_v47 = vpop.permute.xlu0 %1639 }
 0x295   :  { %1439 = vst.msk [vmem:[#allocation3] sm:$0xff] %vm370_vm4, %v1416_v60  ;;  %1663 = vst.msk [vmem:[#allocation3 + $0x8] sm:$0xff] %vm370_vm4, %v1640_v47 }
 0x298   :  { %v1290_v49 = vpop.permute.xlu1 %1289  ;;  %v1514_v23 = vpop.permute.xlu0 %1513 }
 0x299   :  { %1312 = vst.msk [vmem:[#allocation3 + $0x18] sm:$0xff] %vm240_vm2, %v1290_v49  ;;  %1536 = vst.msk [vmem:[#allocation3 + $0x20] sm:$0xff] %vm240_vm2, %v1514_v23 }
 0x29c   :  { %v1354_v50 = vpop.permute.xlu1 %1353  ;;  %v1703_v53 = vld [vmem:[#allocation3] sm:$0xff]  ;;  %v1704_v34 = vld [vmem:[#allocation3 + $0x8] sm:$0xff] }
 0x29d   :  { %v1578_v48 = vpop.permute.xlu0 %1577  ;;  %1376 = vst.msk [vmem:[#allocation3 + $0x18] sm:$0xff] %vm305_vm3, %v1354_v50  ;;  %1951 = vmatprep.mubr.bf16.mxu1 %v1704_v34 }
 0x29e   :  { %1600 = vst.msk [vmem:[#allocation3 + $0x20] sm:$0xff] %vm305_vm3, %v1578_v48  ;;  %1952 = vmatmul.mubr.bf16.vlgmr.msra.gmra.mrb[16].mxu1 %v1703_v53 }
 0x2a0   :  { %v1418_v55 = vpop.permute.xlu1 %1417 }
 0x2a1   :  { %1440 = vst.msk [vmem:[#allocation3 + $0x18] sm:$0xff] %vm370_vm4, %v1418_v55 }
 0x2a3   :  { %v1642_v10 = vpop.permute.xlu0 %1641 }
 0x2a4   :  { %1664 = vst.msk [vmem:[#allocation3 + $0x20] sm:$0xff] %vm370_vm4, %v1642_v10  ;;  %v1292_v0 = vpop.permute.xlu1 %1291 }
 0x2a5   :  { %1313 = vst.msk [vmem:[#allocation3 + $0x30] sm:$0xff] %vm240_vm2, %v1292_v0 }
 0x2a7   :  { %v1516_v20 = vpop.permute.xlu0 %1515 }
 0x2a8   :  { %1537 = vst.msk [vmem:[#allocation3 + $0x38] sm:$0xff] %vm240_vm2, %v1516_v20  ;;  %v1356_v32 = vpop.permute.xlu1 %1355  ;;  %v1706_v30 = vld [vmem:[#allocation3 + $0x18] sm:$0xff] }
 0x2a9   :  { %1377 = vst.msk [vmem:[#allocation3 + $0x30] sm:$0xff] %vm305_vm3, %v1356_v32 }
 0x2ab   :  { %v1580_v24 = vpop.permute.xlu0 %1579  ;;  %v1707_v39 = vld [vmem:[#allocation3 + $0x20] sm:$0xff] }
 0x2ac   :  { %1601 = vst.msk [vmem:[#allocation3 + $0x38] sm:$0xff] %vm305_vm3, %v1580_v24  ;;  %1959 = vmatprep.mubr.bf16.mxu1 %v1707_v39  ;;  %v1420_v37 = vpop.permute.xlu1 %1419 }
 0x2ad   :  { %1960 = vmatmul.mubr.bf16.gmra.mrb[20].mxu1 %v1706_v30  ;;  %1441 = vst.msk [vmem:[#allocation3 + $0x30] sm:$0xff] %vm370_vm4, %v1420_v37 }
 0x2af   :  { %v1644_v57 = vpop.permute.xlu0 %1643 }
 0x2b0   :  { %1665 = vst.msk [vmem:[#allocation3 + $0x38] sm:$0xff] %vm370_vm4, %v1644_v57  ;;  %v1294_v14 = vpop.permute.xlu1 %1293 }
 0x2b1   :  { %1314 = vst.msk [vmem:[#allocation3 + $0x48] sm:$0xff] %vm240_vm2, %v1294_v14 }
 0x2b3   :  { %v1518_v43 = vpop.permute.xlu0 %1517 }
 0x2b4   :  { %1538 = vst.msk [vmem:[#allocation3 + $0x50] sm:$0xff] %vm240_vm2, %v1518_v43  ;;  %v1358_v52 = vpop.permute.xlu1 %1357  ;;  %v1709_v63 = vld [vmem:[#allocation3 + $0x30] sm:$0xff] }
 0x2b5   :  { %1378 = vst.msk [vmem:[#allocation3 + $0x48] sm:$0xff] %vm305_vm3, %v1358_v52 }
 0x2b7   :  { %v1582_v22 = vpop.permute.xlu0 %1581  ;;  %v1710_v18 = vld [vmem:[#allocation3 + $0x38] sm:$0xff] }
 0x2b8   :  { %1602 = vst.msk [vmem:[#allocation3 + $0x50] sm:$0xff] %vm305_vm3, %v1582_v22  ;;  %1967 = vmatprep.mubr.bf16.mxu1 %v1710_v18  ;;  %v1422_v56 = vpop.permute.xlu1 %1421 }
 0x2b9   :  { %1968 = vmatmul.mubr.bf16.gmra.mrb[24].mxu1 %v1709_v63  ;;  %1442 = vst.msk [vmem:[#allocation3 + $0x48] sm:$0xff] %vm370_vm4, %v1422_v56 }
 0x2bb   :  { %v1646_v19 = vpop.permute.xlu0 %1645 }
 0x2bc   :  { %1666 = vst.msk [vmem:[#allocation3 + $0x50] sm:$0xff] %vm370_vm4, %v1646_v19  ;;  %v1296_v44 = vpop.permute.xlu1 %1295 }
 0x2bd   :  { %1315 = vst.msk [vmem:[#allocation3 + $0x60] sm:$0xff] %vm240_vm2, %v1296_v44 }
 0x2bf   :  { %v1520_v31 = vpop.permute.xlu0 %1519 }
 0x2c0   :  { %1539 = vst.msk [vmem:[#allocation3 + $0x68] sm:$0xff] %vm240_vm2, %v1520_v31  ;;  %v1360_v59 = vpop.permute.xlu1 %1359  ;;  %v1712_v27 = vld [vmem:[#allocation3 + $0x48] sm:$0xff] }
 0x2c1   :  { %1379 = vst.msk [vmem:[#allocation3 + $0x60] sm:$0xff] %vm305_vm3, %v1360_v59 }
 0x2c3   :  { %v1584_v40 = vpop.permute.xlu0 %1583  ;;  %v1713_v1 = vld [vmem:[#allocation3 + $0x50] sm:$0xff] }
 0x2c4   :  { %1603 = vst.msk [vmem:[#allocation3 + $0x68] sm:$0xff] %vm305_vm3, %v1584_v40  ;;  %1975 = vmatprep.mubr.bf16.mxu1 %v1713_v1  ;;  %v1424_v25 = vpop.permute.xlu1 %1423 }
 0x2c5   :  { %1976 = vmatmul.mubr.bf16.gmra.mrb[28].mxu1 %v1712_v27  ;;  %1443 = vst.msk [vmem:[#allocation3 + $0x60] sm:$0xff] %vm370_vm4, %v1424_v25 }
 0x2c7   :  { %v1648_v42 = vpop.permute.xlu0 %1647 }
 0x2c8   :  { %1667 = vst.msk [vmem:[#allocation3 + $0x68] sm:$0xff] %vm370_vm4, %v1648_v42  ;;  %v1298_v29 = vpop.permute.xlu1 %1297 }
 0x2c9   :  { %1316 = vst.msk [vmem:[#allocation3 + $0x78] sm:$0xff] %vm240_vm2, %v1298_v29 }
 0x2cb   :  { %v1522_v54 = vpop.permute.xlu0 %1521 }
 0x2cc   :  { %1540 = vst.msk [vmem:[#allocation3 + $0x80] sm:$0xff] %vm240_vm2, %v1522_v54  ;;  %v1362_v46 = vpop.permute.xlu1 %1361  ;;  %v1715_v45 = vld [vmem:[#allocation3 + $0x60] sm:$0xff] }
 0x2cd   :  { %1380 = vst.msk [vmem:[#allocation3 + $0x78] sm:$0xff] %vm305_vm3, %v1362_v46  ;;  %v5133_v54 = vld [vmem:[%s7848_s7 + $0x80] sm:$0xff]  }
 0x2ce   :  { %5016 = vmatprep.subr.bf16.mxu1 %v5133_v54 }
 0x2cf   :  { %v1586_v36 = vpop.permute.xlu0 %1585  ;;  %v1716_v35 = vld [vmem:[#allocation3 + $0x68] sm:$0xff]  ;;  %5017 = vmatpush3.bf16.msra.mxu1 %v5133_v54 }
 0x2d0   :  { %1604 = vst.msk [vmem:[#allocation3 + $0x80] sm:$0xff] %vm305_vm3, %v1586_v36  ;;  %1983 = vmatprep.mubr.bf16.mxu1 %v1716_v35  ;;  %v1426_v15 = vpop.permute.xlu1 %1425 }
 0x2d1   :  { %1984 = vmatmul.mubr.bf16.gmra.mrb[32].mxu1 %v1715_v45  ;;  %1444 = vst.msk [vmem:[#allocation3 + $0x78] sm:$0xff] %vm370_vm4, %v1426_v15 }
 0x2d3   :  { %v1650_v16 = vpop.permute.xlu0 %1649 }
 0x2d4   :  { %1668 = vst.msk [vmem:[#allocation3 + $0x80] sm:$0xff] %vm370_vm4, %v1650_v16  ;;  %v1300_v17 = vpop.permute.xlu1 %1299 }
 0x2d5   :  { %1317 = vst.msk [vmem:[#allocation3 + $0x90] sm:$0xff] %vm240_vm2, %v1300_v17  ;;  %v5134_v17 = vld [vmem:[%s7848_s7 + $0x88] sm:$0xff]  }
 0x2d6   :  { %5018 = vmatprep.subr.bf16.mxu1 %v5134_v17 }
 0x2d7   :  { %v1524_v61 = vpop.permute.xlu0 %1523  ;;  %5019 = vmatpush3.bf16.msra.mxu1 %v5134_v17 }
 0x2d8   :  { %1541 = vst.msk [vmem:[#allocation3 + $0x98] sm:$0xff] %vm240_vm2, %v1524_v61  ;;  %v1364_v51 = vpop.permute.xlu1 %1363  ;;  %v1718_v21 = vld [vmem:[#allocation3 + $0x78] sm:$0xff] }
 0x2d9   :  { %1381 = vst.msk [vmem:[#allocation3 + $0x90] sm:$0xff] %vm305_vm3, %v1364_v51  ;;  %v5135_v51 = vld [vmem:[%s7848_s7 + $0x90] sm:$0xff]  }
 0x2da   :  { %5020 = vmatprep.subr.bf16.mxu1 %v5135_v51 }
 0x2db   :  { %v1588_v38 = vpop.permute.xlu0 %1587  ;;  %v1719_v62 = vld [vmem:[#allocation3 + $0x80] sm:$0xff]  ;;  %5021 = vmatpush3.bf16.msra.mxu1 %v5135_v51 }
 0x2dc   :  { %1605 = vst.msk [vmem:[#allocation3 + $0x98] sm:$0xff] %vm305_vm3, %v1588_v38  ;;  %1991 = vmatprep.mubr.bf16.mxu1 %v1719_v62  ;;  %v1428_v26 = vpop.permute.xlu1 %1427 }
 0x2dd   :  { %1992 = vmatmul.mubr.bf16.gmra.mrb[36].mxu1 %v1718_v21  ;;  %1445 = vst.msk [vmem:[#allocation3 + $0x90] sm:$0xff] %vm370_vm4, %v1428_v26 }
 0x2df   :  { %v1652_v33 = vpop.permute.xlu0 %1651 }
 0x2e0   :  { %1669 = vst.msk [vmem:[#allocation3 + $0x98] sm:$0xff] %vm370_vm4, %v1652_v33  ;;  %v1302_v28 = vpop.permute.xlu1 %1301 }
 0x2e1   :  { %1318 = vst.msk [vmem:[#allocation3 + $0xa8] sm:$0xff] %vm240_vm2, %v1302_v28  ;;  %v5136_v28 = vld [vmem:[%s7848_s7 + $0x98] sm:$0xff]  }
 0x2e2   :  { %5022 = vmatprep.subr.bf16.mxu1 %v5136_v28 }
 0x2e3   :  { %v1526_v41 = vpop.permute.xlu0 %1525  ;;  %5023 = vmatpush3.bf16.msra.mxu1 %v5136_v28 }
 0x2e4   :  { %1542 = vst.msk [vmem:[#allocation3 + $0xb0] sm:$0xff] %vm240_vm2, %v1526_v41  ;;  %v1366_v4 = vpop.permute.xlu1 %1365  ;;  %v1721_v60 = vld [vmem:[#allocation3 + $0x90] sm:$0xff] }
 0x2e5   :  { %1382 = vst.msk [vmem:[#allocation3 + $0xa8] sm:$0xff] %vm305_vm3, %v1366_v4 }
 0x2e7   :  { %v1590_v47 = vpop.permute.xlu0 %1589  ;;  %v1722_v49 = vld [vmem:[#allocation3 + $0x98] sm:$0xff] }
 0x2e8   :  { %1606 = vst.msk [vmem:[#allocation3 + $0xb0] sm:$0xff] %vm305_vm3, %v1590_v47  ;;  %1999 = vmatprep.mubr.bf16.mxu1 %v1722_v49  ;;  %v1430_v23 = vpop.permute.xlu1 %1429 }
 0x2e9   :  { %2000 = vmatmul.mubr.bf16.gmra.mrb[40].mxu1 %v1721_v60  ;;  %1446 = vst.msk [vmem:[#allocation3 + $0xa8] sm:$0xff] %vm370_vm4, %v1430_v23 }
 0x2eb   :  { %v1654_v50 = vpop.permute.xlu0 %1653 }
 0x2ec   :  { %1670 = vst.msk [vmem:[#allocation3 + $0xb0] sm:$0xff] %vm370_vm4, %v1654_v50 }
 0x2f0   :  { %v1724_v53 = vld [vmem:[#allocation3 + $0xa8] sm:$0xff] }
 0x2f3   :  { %v1725_v48 = vld [vmem:[#allocation3 + $0xb0] sm:$0xff] }
 0x2f4   :  { %2007 = vmatprep.mubr.bf16.mxu1 %v1725_v48 }
 0x2f5   :  { %2008 = vmatmul.mubr.bf16.gmra.mrb[44].mxu1 %v1724_v53  ;;  %v5137_v53 = vld [vmem:[%s7848_s7 + $0xa0] sm:$0xff]  }
 0x2f6   :  { %5024 = vmatprep.subr.bf16.mxu1 %v5137_v53 }
 0x2f7   :  { %5025 = vmatpush3.bf16.msra.mxu1 %v5137_v53 }
 0x2fd   :  { %v5002_v34 = vpop.f32.mrb[32].mxu0 }
 0x2fe   :  { %v2050_v55 = vpop.f32.mrb[33].mxu0 }
 0x2ff   :  { %v5003_v10 = vpop.f32.mrb[34].mxu0 }
 0x300   :  { %v2053_v0 = vpop.f32.mrb[35].mxu0 }
 0x305   :  { %v6350_v20 = vpop.f32.mrb[36].mxu0 }
 0x306   :  { %v2066_v32 = vpop.f32.mrb[37].mxu0 }
 0x307   :  { %v6352_v30 = vpop.f32.mrb[38].mxu0 }
 0x308   :  { %v6354_v24 = vpop.f32.mrb[39].mxu0 }
 0x30d   :  { %v6356_v39 = vpop.f32.mrb[40].mxu0 }
 0x30e   :  { %v6358_v37 = vpop.f32.mrb[41].mxu0 }
 0x30f   :  { %v6360_v57 = vpop.f32.mrb[42].mxu0 }
 0x310   :  { %v6362_v14 = vpop.f32.mrb[43].mxu0 }
 0x315   :  { %v6364_v43 = vpop.f32.mrb[44].mxu0 }
 0x316   :  { %v6366_v52 = vpop.f32.mrb[45].mxu0 }
 0x317   :  { %v6368_v63 = vpop.f32.mrb[46].mxu0 }
 0x318   :  { %v6370_v22 = vpop.f32.mrb[47].mxu0 }
 0x371   :  { %v4728_v18 = vpop.f32.mrb[16].mxu1 }
 0x372   :  { %v4729_v56 = vpop.f32.mrb[17].mxu1 }
 0x373   :  { %v4730_v19 = vadd.f32 %v4729_v56, %v4728_v18  ;;  %v4731_v44 = vpop.f32.mrb[18].mxu1 }
 0x374   :  { %v4732_v31 = vpop.f32.mrb[19].mxu1 }
 0x375   :  { %v6372_v59 = vadd.f32 %v4730_v19, %v2050_v55  ;;  %v4733_v27 = vadd.f32 %v4732_v31, %v4731_v44 }
 0x377   :  { %v6374_v40 = vadd.f32 %v4733_v27, %v2053_v0  ;;  %v2153_v45 = vmul.f32 %v6372_v59, %v6372_v59  ;;  %v2115_v61 = vsel %vm53_vm0, %v6372_v59, 0.0 }
 0x379   :  { %v2154_v36 = vmul.f32 %v6374_v40, %v6374_v40  ;;  %v2169_v21 = vsel %vm53_vm0, %v2153_v45, 0.0  ;;  %v2116_v38 = vsel %vm53_vm0, %v6374_v40, 0.0 }
 0x37a   :  { %v2117_v41 = vadd.f32 %v2116_v38, %v2115_v61 }
 0x37b   :  { %v2170_v62 = vsel %vm53_vm0, %v2154_v36, 0.0 }
 0x37c   :  { %v2171_v49 = vadd.f32 %v2170_v62, %v2169_v21  ;;  %v5140_v62 = vld [vmem:[%s7848_s7 + $0xb8] sm:$0xff]  }
 0x380   :  { %v4734_v1 = vpop.f32.mrb[20].mxu1 }
 0x381   :  { %v4735_v25 = vpop.f32.mrb[21].mxu1 }
 0x382   :  { %v4736_v42 = vadd.f32 %v4735_v25, %v4734_v1  ;;  %v4737_v29 = vpop.f32.mrb[22].mxu1  ;;  %v5138_v25 = vld [vmem:[%s7848_s7 + $0xa8] sm:$0xff]  }
 0x383   :  { %v4738_v46 = vpop.f32.mrb[23].mxu1  ;;  %5026 = vmatprep.subr.bf16.mxu1 %v5138_v25 }
 0x384   :  { %v6383_v35 = vadd.f32 %v5002_v34, %v4736_v42  ;;  %v4739_v15 = vadd.f32 %v4738_v46, %v4737_v29  ;;  %5027 = vmatpush3.bf16.msra.mxu1 %v5138_v25 }
 0x386   :  { %v6385_v16 = vadd.f32 %v5003_v10, %v4739_v15  ;;  %v2155_v26 = vmul.f32 %v6383_v35, %v6383_v35  ;;  %v2118_v33 = vsel %vm53_vm0, %v6383_v35, 0.0  ;;  %v5139_v15 = vld [vmem:[%s7848_s7 + $0xb0] sm:$0xff]  }
 0x387   :  { %v2119_v23 = vadd.f32 %v2118_v33, %v2117_v41  ;;  %5028 = vmatprep.subr.bf16.mxu1 %v5139_v15 }
 0x388   :  { %v2156_v4 = vmul.f32 %v6385_v16, %v6385_v16  ;;  %v2172_v60 = vsel %vm53_vm0, %v2155_v26, 0.0  ;;  %v2120_v48 = vsel %vm53_vm0, %v6385_v16, 0.0  ;;  %5029 = vmatpush3.bf16.msra.mxu1 %v5139_v15 }
 0x389   :  { %v2173_v10 = vadd.f32 %v2172_v60, %v2171_v49  ;;  %v2121_v44 = vadd.f32 %v2120_v48, %v2119_v23  ;;  %5030 = vmatprep.subr.bf16.mxu1 %v5140_v62 }
 0x38a   :  { %v2174_v0 = vsel %vm53_vm0, %v2156_v4, 0.0 }
 0x38b   :  { %v2175_v42 = vadd.f32 %v2174_v0, %v2173_v10 }
 0x38c   :  { %v4740_v47 = vpop.f32.mrb[24].mxu1  ;;  %5031 = vmatpush3.bf16.msra.mxu1 %v5140_v62 }
 0x38d   :  { %v4741_v50 = vpop.f32.mrb[25].mxu1 }
 0x38e   :  { %v4742_v34 = vadd.f32 %v4741_v50, %v4740_v47  ;;  %v4743_v55 = vpop.f32.mrb[26].mxu1 }
 0x38f   :  { %v4744_v18 = vpop.f32.mrb[27].mxu1 }
 0x390   :  { %v6415_v56 = vadd.f32 %v4742_v34, %v2066_v32  ;;  %v4745_v19 = vadd.f32 %v4744_v18, %v4743_v55 }
 0x392   :  { %v2122_v31 = vsel %vm53_vm0, %v6415_v56, 0.0  ;;  %v2157_v27 = vmul.f32 %v6415_v56, %v6415_v56  ;;  %v6422_v1 = vadd.f32 %v4745_v19, %v6354_v24 }
 0x393   :  { %v2123_v32 = vadd.f32 %v2122_v31, %v2121_v44 }
 0x394   :  { %v2176_v29 = vsel %vm53_vm0, %v2157_v27, 0.0  ;;  %v2124_v54 = vsel %vm53_vm0, %v6422_v1, 0.0  ;;  %v2158_v46 = vmul.f32 %v6422_v1, %v6422_v1 }
 0x395   :  { %v2177_v45 = vadd.f32 %v2176_v29, %v2175_v42  ;;  %v2125_v36 = vadd.f32 %v2124_v54, %v2123_v32 }
 0x396   :  { %v2178_v24 = vsel %vm53_vm0, %v2158_v46, 0.0 }
 0x397   :  { %v2179_v17 = vadd.f32 %v2178_v24, %v2177_v45 }
 0x398   :  { %v4746_v61 = vpop.f32.mrb[28].mxu1 }
 0x399   :  { %v4747_v51 = vpop.f32.mrb[29].mxu1 }
 0x39a   :  { %v4748_v21 = vadd.f32 %v4747_v51, %v4746_v61  ;;  %v4749_v38 = vpop.f32.mrb[30].mxu1 }
 0x39b   :  { %v4750_v26 = vpop.f32.mrb[31].mxu1 }
 0x39c   :  { %v6440_v33 = vadd.f32 %v6350_v20, %v4748_v21  ;;  %v4751_v28 = vadd.f32 %v4750_v26, %v4749_v38 }
 0x39e   :  { %v2126_v41 = vsel %vm53_vm0, %v6440_v33, 0.0  ;;  %v2159_v4 = vmul.f32 %v6440_v33, %v6440_v33  ;;  %v6447_v60 = vadd.f32 %v6352_v30, %v4751_v28 }
 0x39f   :  { %v2127_v47 = vadd.f32 %v2126_v41, %v2125_v36 }
 0x3a0   :  { %v2180_v49 = vsel %vm53_vm0, %v2159_v4, 0.0  ;;  %v2128_v23 = vsel %vm53_vm0, %v6447_v60, 0.0  ;;  %v2160_v20 = vmul.f32 %v6447_v60, %v6447_v60 }
 0x3a1   :  { %v2181_v50 = vadd.f32 %v2180_v49, %v2179_v17  ;;  %v2129_v53 = vadd.f32 %v2128_v23, %v2127_v47 }
 0x3a2   :  { %v2182_v48 = vsel %vm53_vm0, %v2160_v20, 0.0 }
 0x3a3   :  { %v2183_v34 = vadd.f32 %v2182_v48, %v2181_v50 }
 0x3a4   :  { %v4752_v55 = vpop.f32.mrb[32].mxu1 }
 0x3a5   :  { %v4753_v10 = vpop.f32.mrb[33].mxu1 }
 0x3a6   :  { %v4754_v30 = vadd.f32 %v4753_v10, %v4752_v55  ;;  %v4755_v0 = vpop.f32.mrb[34].mxu1 }
 0x3a7   :  { %v4756_v18 = vpop.f32.mrb[35].mxu1 }
 0x3a8   :  { %v6456_v19 = vadd.f32 %v4754_v30, %v6358_v37  ;;  %v4757_v44 = vadd.f32 %v4756_v18, %v4755_v0 }
 0x3aa   :  { %v2130_v31 = vsel %vm53_vm0, %v6456_v19, 0.0  ;;  %v2161_v27 = vmul.f32 %v6456_v19, %v6456_v19  ;;  %v6463_v25 = vadd.f32 %v4757_v44, %v6362_v14 }
 0x3ab   :  { %v2131_v42 = vadd.f32 %v2130_v31, %v2129_v53 }
 0x3ac   :  { %v2184_v32 = vsel %vm53_vm0, %v2161_v27, 0.0  ;;  %v2132_v29 = vsel %vm53_vm0, %v6463_v25, 0.0  ;;  %v2162_v37 = vmul.f32 %v6463_v25, %v6463_v25 }
 0x3ad   :  { %v2185_v54 = vadd.f32 %v2184_v32, %v2183_v34  ;;  %v2133_v46 = vadd.f32 %v2132_v29, %v2131_v42 }
 0x3ae   :  { %v2186_v45 = vsel %vm53_vm0, %v2162_v37, 0.0 }
 0x3af   :  { %v2187_v36 = vadd.f32 %v2186_v45, %v2185_v54 }
 0x3b0   :  { %v4758_v24 = vpop.f32.mrb[36].mxu1 }
 0x3b1   :  { %v4759_v15 = vpop.f32.mrb[37].mxu1 }
 0x3b2   :  { %v4760_v17 = vadd.f32 %v4759_v15, %v4758_v24  ;;  %v4761_v61 = vpop.f32.mrb[38].mxu1 }
 0x3b3   :  { %v4762_v14 = vpop.f32.mrb[39].mxu1 }
 0x3b4   :  { %v6472_v51 = vadd.f32 %v6356_v39, %v4760_v17  ;;  %v4763_v21 = vadd.f32 %v4762_v14, %v4761_v61 }
 0x3b6   :  { %v2134_v38 = vsel %vm53_vm0, %v6472_v51, 0.0  ;;  %v2163_v62 = vmul.f32 %v6472_v51, %v6472_v51  ;;  %v6479_v26 = vadd.f32 %v6360_v57, %v4763_v21 }
 0x3b7   :  { %v2135_v28 = vadd.f32 %v2134_v38, %v2133_v46 }
 0x3b8   :  { %v2188_v41 = vsel %vm53_vm0, %v2163_v62, 0.0  ;;  %v2136_v4 = vsel %vm53_vm0, %v6479_v26, 0.0  ;;  %v2164_v39 = vmul.f32 %v6479_v26, %v6479_v26 }
 0x3b9   :  { %v2189_v47 = vadd.f32 %v2188_v41, %v2187_v36  ;;  %v2137_v49 = vadd.f32 %v2136_v4, %v2135_v28 }
 0x3ba   :  { %v2190_v23 = vsel %vm53_vm0, %v2164_v39, 0.0 }
 0x3bb   :  { %v2191_v20 = vadd.f32 %v2190_v23, %v2189_v47 }
 0x3bc   :  { %v4764_v50 = vpop.f32.mrb[40].mxu1 }
 0x3bd   :  { %v4765_v53 = vpop.f32.mrb[41].mxu1 }
 0x3be   :  { %v4766_v48 = vadd.f32 %v4765_v53, %v4764_v50  ;;  %v4767_v34 = vpop.f32.mrb[42].mxu1 }
 0x3bf   :  { %v4768_v57 = vpop.f32.mrb[43].mxu1 }
 0x3c0   :  { %v6488_v55 = vadd.f32 %v4766_v48, %v6366_v52  ;;  %v4769_v10 = vadd.f32 %v4768_v57, %v4767_v34 }
 0x3c2   :  { %v2138_v30 = vsel %vm53_vm0, %v6488_v55, 0.0  ;;  %v2165_v0 = vmul.f32 %v6488_v55, %v6488_v55  ;;  %v6495_v18 = vadd.f32 %v4769_v10, %v6370_v22 }
 0x3c3   :  { %v2139_v44 = vadd.f32 %v2138_v30, %v2137_v49 }
 0x3c4   :  { %v2192_v31 = vsel %vm53_vm0, %v2165_v0, 0.0  ;;  %v2140_v27 = vsel %vm53_vm0, %v6495_v18, 0.0  ;;  %v2166_v52 = vmul.f32 %v6495_v18, %v6495_v18 }
 0x3c5   :  { %v2193_v42 = vadd.f32 %v2192_v31, %v2191_v20  ;;  %v2141_v32 = vadd.f32 %v2140_v27, %v2139_v44 }
 0x3c6   :  { %v2194_v29 = vsel %vm53_vm0, %v2166_v52, 0.0 }
 0x3c7   :  { %v2195_v37 = vadd.f32 %v2194_v29, %v2193_v42  ;;  %v2113_v42 = vld [vmem:[%s7849_s5] sm:$0x1] }
 0x3c8   :  { %v4770_v54 = vpop.f32.mrb[44].mxu1  ;;  %v5141_v29 = vld [vmem:[%s7848_s7 + $0x40] sm:$0xff]  }
 0x3c9   :  { %v4771_v46 = vpop.f32.mrb[45].mxu1  ;;  %4792 = vmatprep.subr.bf16.mxu0 %v5141_v29 }
 0x3ca   :  { %v4772_v45 = vadd.f32 %v4771_v46, %v4770_v54  ;;  %v4773_v36 = vpop.f32.mrb[46].mxu1  ;;  %v5143_v54 = vld [vmem:[%s7848_s7 + $0x48] sm:$0xff]  }
 0x3cb   :  { %v4774_v22 = vpop.f32.mrb[47].mxu1 }
 0x3cc   :  { %v2107_v24 = vadd.f32 %v6364_v43, %v4772_v45  ;;  %v4775_v15 = vadd.f32 %v4774_v22, %v4773_v36  ;;  %v2114_v45 = vld [vmem:[%s7850_s6] sm:$0x1] }
 0x3ce   :  { %v2142_v17 = vsel %vm53_vm0, %v2107_v24, 0.0  ;;  %v2167_v61 = vmul.f32 %v2107_v24, %v2107_v24  ;;  %v2110_v14 = vadd.f32 %v6368_v63, %v4775_v15  ;;  %v5144_v15 = vld [vmem:[%s7848_s7 + $0x8] sm:$0xff]  }
 0x3cf   :  { %v2143_v21 = vadd.f32 %v2142_v17, %v2141_v32  ;;  %v5145_v17 = vld [vmem:[%s7848_s7 + $0x50] sm:$0xff]  }
 0x3d0   :  { %v2196_v38 = vsel %vm53_vm0, %v2167_v61, 0.0  ;;  %v2144_v62 = vsel %vm53_vm0, %v2110_v14, 0.0  ;;  %v2168_v28 = vmul.f32 %v2110_v14, %v2110_v14 }
 0x3d1   :  { %v2197_v41 = vadd.f32 %v2196_v38, %v2195_v37  ;;  %v2145_v4 = vadd.f32 %v2144_v62, %v2143_v21  ;;  %v5142_v37 = vld [vmem:[%s7848_s7] sm:$0xff]  }
 0x3d2   :  { %v2198_v39 = vsel %vm53_vm0, %v2168_v28, 0.0  ;;  %4793 = vmatpush3.bf16.msra.mxu0 %v5142_v37 }
 0x3d3   :  { %v2146_v47 = vrot.slane %v2145_v4, 4  ;;  %v2199_v49 = vadd.f32 %v2198_v39, %v2197_v41  ;;  %4794 = vmatprep.subr.bf16.mxu0 %v5143_v54 }
 0x3d5   :  { %v2147_v23 = vadd.f32 %v2146_v47, %v2145_v4  ;;  %v2200_v43 = vrot.slane %v2199_v49, 4 }
 0x3d6   :  { %4795 = vmatpush3.bf16.msra.mxu0 %v5144_v15 }
 0x3d7   :  { %v2148_v20 = vrot.slane %v2147_v23, 2  ;;  %v2201_v50 = vadd.f32 %v2200_v43, %v2199_v49  ;;  %4796 = vmatprep.subr.bf16.mxu0 %v5145_v17 }
 0x3d9   :  { %v2149_v53 = vadd.f32 %v2148_v20, %v2147_v23  ;;  %v2202_v48 = vrot.slane %v2201_v50, 2 }
 0x3db   :  { %v2150_v34 = vrot.slane %v2149_v53, 1  ;;  %v2203_v63 = vadd.f32 %v2202_v48, %v2201_v50 }
 0x3dd   :  { %v2151_v57 = vadd.f32 %v2150_v34, %v2149_v53  ;;  %v2204_v10 = vrot.slane %v2203_v63, 1 }
 0x3df   :  { %v2152_v30 = vmul.f32 0.0078125, %v2151_v57  ;;  %v2205_v0 = vadd.f32 %v2204_v10, %v2203_v63 }
 0x3e1   :  { %v2206_v44 = vmul.f32 0.0078125, %v2205_v0  ;;  %v2207_v31 = vmul.f32 %v2152_v30, %v2152_v30 }
 0x3e3   :  { %v2208_v27 = vsub.f32 %v2206_v44, %v2207_v31 }
 0x3e5   :  { %v2209_v52 = vadd.f32 1e-05, %v2208_v27 }
 0x3e7   :  { %5183 = vrsqrt.f32 %v2209_v52 }
 0x3f1   :  { %v5184_v32 = vpop.eup %5183 }
 0x3f2   :  { %v2211_v46 = vmul.f32 %v5184_v32, %v2113_v42 }
 0x3f4   :  { %v2212_v36 = vmul.f32 %v2211_v46, %v2152_v30  ;;  %v2218_v22 = vrot.slane %v2211_v46, %v5960_v58 }
 0x3f6   :  { %v2213_v61 = vsub.f32 %v2114_v45, %v2212_v36  ;;  %v2221_v21 = vmul.f32 %v2218_v22, %v6374_v40  ;;  %v2222_v38 = vmul.f32 %v2218_v22, %v6383_v35  ;;  %v2223_v62 = vmul.f32 %v2218_v22, %v6385_v16  ;;  %v5146_v35 = vld [vmem:[%s7848_s7 + $0x10] sm:$0xff]  }
 0x3f7   :  { %v2224_v28 = vmul.f32 %v2218_v22, %v6415_v56  ;;  %v2225_v41 = vmul.f32 %v2218_v22, %v6422_v1  ;;  %v2226_v4 = vmul.f32 %v2218_v22, %v6440_v33  ;;  %v2227_v39 = vmul.f32 %v2218_v22, %v6447_v60  ;;  %v5147_v60 = vld [vmem:[%s7848_s7 + $0x58] sm:$0xff]   ;;  %4797 = vmatpush3.bf16.msra.mxu0 %v5146_v35 }
 0x3f8   :  { %v2229_v47 = vmul.f32 %v2218_v22, %v6463_v25  ;;  %v2230_v49 = vmul.f32 %v2218_v22, %v6472_v51  ;;  %v2231_v23 = vmul.f32 %v2218_v22, %v6479_v26  ;;  %v2232_v40 = vmul.f32 %v2218_v22, %v6488_v55  ;;  %4798 = vmatprep.subr.bf16.mxu0 %v5147_v60 }
 0x3f9   :  { %v2233_v16 = vmul.f32 %v2218_v22, %v6495_v18  ;;  %v2234_v56 = vmul.f32 %v2218_v22, %v2107_v24  ;;  %v2235_v1 = vmul.f32 %v2218_v22, %v2110_v14  ;;  %v2240_v33 = vrot.slane %v2213_v61, %v5960_v58  ;;  %v5148_v14 = vld [vmem:[%s7848_s7 + $0x18] sm:$0xff]  }
 0x3fa   :  { %v2220_v25 = vmul.f32 %v2218_v22, %v6372_v59  ;;  %v2228_v51 = vmul.f32 %v2218_v22, %v6456_v19 }
 0x3fb   :  { %v2243_v26 = vadd.f32 %v2240_v33, %v2221_v21  ;;  %v2244_v55 = vadd.f32 %v2240_v33, %v2222_v38  ;;  %v2245_v43 = vadd.f32 %v2240_v33, %v2223_v62  ;;  %v2246_v20 = vadd.f32 %v2240_v33, %v2224_v28  ;;  %4799 = vmatpush3.bf16.msra.mxu0 %v5148_v14 }
 0x3fc   :  { %v2247_v50 = vadd.f32 %v2240_v33, %v2225_v41  ;;  %v2248_v53 = vadd.f32 %v2240_v33, %v2226_v4  ;;  %v2249_v18 = vadd.f32 %v2240_v33, %v2227_v39  ;;  %v2251_v24 = vadd.f32 %v2240_v33, %v2229_v47  ;;  %v7915_v4 = vld [vmem:[#allocation5_spill] sm:$0xff]  ;;  %v7916_v47 = vld [vmem:[#allocation6_spill] sm:$0xff] }
 0x3fd   :  { %v2252_v48 = vadd.f32 %v2240_v33, %v2230_v49  ;;  %v2253_v34 = vadd.f32 %v2240_v33, %v2231_v23  ;;  %v2254_v63 = vadd.f32 %v2240_v33, %v2232_v40  ;;  %v2255_v57 = vadd.f32 %v2240_v33, %v2233_v16  ;;  %v5149_v23 = vld [vmem:[%s7848_s7 + $0x60] sm:$0xff]  }
 0x3fe   :  { %v2256_v59 = vadd.f32 %v2240_v33, %v2234_v56  ;;  %v2257_v19 = vadd.f32 %v2240_v33, %v2235_v1  ;;  %v6556_v10 = vadd.f32 %v2243_v26, %v5292_v2  ;;  %v6559_v30 = vadd.f32 %v2244_v55, %v5333_v3  ;;  %v5150_v40 = vld [vmem:[%s7848_s7 + $0x20] sm:$0xff]   ;;  %4800 = vmatprep.subr.bf16.mxu0 %v5149_v23  ;;  %v2761_v26 = vld [vmem:[#allocation2 + $0x92] sm:$0xff] }
 0x3ff   :  { %v6562_v0 = vadd.f32 %v2245_v43, %v5344_v5  ;;  %v6565_v44 = vadd.f32 %v2246_v20, %v5349_v6  ;;  %v6568_v31 = vadd.f32 %v2247_v50, %v5354_v7  ;;  %v6571_v27 = vadd.f32 %v2248_v53, %v5365_v8  ;;  %v7907_v6 = vld [vmem:[#allocation7_spill] sm:$0xff]  ;;  %v7909_v7 = vld [vmem:[#allocation8_spill] sm:$0xff]  ;;  %v7911_v8 = vld [vmem:[#allocation9_spill] sm:$0xff]  ;;  %4801 = vmatpush3.bf16.msra.mxu0 %v5150_v40 }
 0x400   :  { %v6574_v52 = vadd.f32 %v2249_v18, %v5370_v9  ;;  %v6577_v2 = vadd.f32 %v2251_v24, %v5384_v11  ;;  %v6580_v3 = vadd.f32 %v2252_v48, %v5391_v12  ;;  %v6583_v5 = vadd.f32 %v2253_v34, %v5396_v13  ;;  %v7913_v9 = vld [vmem:[#allocation10_spill] sm:$0xff]  ;;  %v2338_v53 = vld [vmem:[#allocation2 + $0x1] sm:$0xff] }
 0x401   :  { %7899 = vst [vmem:[#allocation11_spill] sm:$0xff] %v6562_v0  ;;  %7900 = vst [vmem:[#allocation12_spill] sm:$0xff] %v6565_v44  ;;  %v6586_v42 = vadd.f32 %v2254_v63, %v7907_v6  ;;  %v6589_v32 = vadd.f32 %v2255_v57, %v7909_v7  ;;  %v6592_v29 = vadd.f32 %v2256_v59, %v7911_v8  ;;  %v7879_v11 = vmax.f32 %v6556_v10, 0.0  ;;  %v2306_v6 = vld [vmem:[#allocation2] sm:$0xff] }
 0x402   :  { %7901 = vst [vmem:[#allocation13_spill] sm:$0xff] %v6568_v31  ;;  %7902 = vst [vmem:[#allocation14_spill] sm:$0xff] %v6571_v27  ;;  %v6595_v37 = vadd.f32 %v2257_v19, %v7913_v9  ;;  %v7878_v12 = vmax.f32 %v6559_v30, 0.0  ;;  %v7876_v13 = vmax.f32 %v6562_v0, 0.0  ;;  %v7873_v54 = vmax.f32 %v6565_v44, 0.0 }
 0x403   :  { %7903 = vst [vmem:[#allocation15_spill] sm:$0xff] %v6574_v52  ;;  %7904 = vst [vmem:[#allocation16_spill] sm:$0xff] %v6577_v2  ;;  %v7870_v46 = vmax.f32 %v6568_v31, 0.0  ;;  %v7868_v45 = vmax.f32 %v6571_v27, 0.0  ;;  %v7871_v36 = vmax.f32 %v6574_v52, 0.0  ;;  %v7875_v22 = vmax.f32 %v6577_v2, 0.0 }
 0x404   :  { %7905 = vst [vmem:[#allocation17_spill] sm:$0xff] %v6580_v3  ;;  %7906 = vst [vmem:[#allocation18_spill] sm:$0xff] %v6583_v5  ;;  %v7874_v15 = vmax.f32 %v6580_v3, 0.0  ;;  %v7872_v17 = vmax.f32 %v6583_v5, 0.0  ;;  %v7869_v61 = vmax.f32 %v6586_v42, 0.0  ;;  %v7866_v21 = vmax.f32 %v6589_v32, 0.0 }
 0x405   :  { %7908 = vst [vmem:[#allocation7_spill] sm:$0xff] %v6586_v42  ;;  %7910 = vst [vmem:[#allocation8_spill] sm:$0xff] %v6589_v32  ;;  %v7865_v38 = vmax.f32 %v6592_v29, 0.0  ;;  %v7867_v62 = vmax.f32 %v6595_v37, 0.0  ;;  %v2242_v28 = vadd.f32 %v2240_v33, %v2220_v25  ;;  %v2250_v41 = vadd.f32 %v2240_v33, %v2228_v51 }
 0x406   :  { %7912 = vst [vmem:[#allocation9_spill] sm:$0xff] %v6592_v29  ;;  %7914 = vst [vmem:[#allocation10_spill] sm:$0xff] %v6595_v37 }
 0x407   :  { %2291 = vst.msk [vmem:[#allocation2 + $0x21] sm:$0xff] %vm53_vm0, %v7879_v11  ;;  %2292 = vst.msk [vmem:[#allocation2 + $0x31] sm:$0xff] %vm53_vm0, %v7878_v12  ;;  %v6654_v39 = vadd.f32 %v2242_v28, %v7915_v4  ;;  %v6657_v49 = vadd.f32 %v2250_v41, %v7916_v47  ;;  %v2769_v4 = vld [vmem:[#allocation2 + $0x132] sm:$0xff] }
 0x408   :  { %2293 = vst.msk [vmem:[#allocation2 + $0x41] sm:$0xff] %vm53_vm0, %v7876_v13  ;;  %2294 = vst.msk [vmem:[#allocation2 + $0x51] sm:$0xff] %vm53_vm0, %v7873_v54 }
 0x409   :  { %2295 = vst.msk [vmem:[#allocation2 + $0x61] sm:$0xff] %vm53_vm0, %v7870_v46  ;;  %2296 = vst.msk [vmem:[#allocation2 + $0x71] sm:$0xff] %vm53_vm0, %v7868_v45  ;;  %v7880_v35 = vmax.f32 %v6654_v39, 0.0  ;;  %v7877_v16 = vmax.f32 %v6657_v49, 0.0 }
 0x40a   :  { %2297 = vst.msk [vmem:[#allocation2 + $0x81] sm:$0xff] %vm53_vm0, %v7871_v36  ;;  %2299 = vst.msk [vmem:[#allocation2 + $0xc1] sm:$0xff] %vm53_vm0, %v7875_v22 }
 0x40b   :  { %2300 = vst.msk [vmem:[#allocation2 + $0xd1] sm:$0xff] %vm53_vm0, %v7874_v15  ;;  %2301 = vst.msk [vmem:[#allocation2 + $0xe1] sm:$0xff] %vm53_vm0, %v7872_v17  ;;  %v2402_v17 = vld [vmem:[#allocation2 + $0x2] sm:$0xff] }
 0x40c   :  { %2302 = vst.msk [vmem:[#allocation2 + $0xf1] sm:$0xff] %vm53_vm0, %v7869_v61  ;;  %2303 = vst.msk [vmem:[#allocation2 + $0x101] sm:$0xff] %vm53_vm0, %v7866_v21 }
 0x40d   :  { %2304 = vst.msk [vmem:[#allocation2 + $0x111] sm:$0xff] %vm53_vm0, %v7865_v38  ;;  %2305 = vst.msk [vmem:[#allocation2 + $0x121] sm:$0xff] %vm53_vm0, %v7867_v62 }
 0x40e   :  { %2290 = vst.msk [vmem:[#allocation2 + $0x11] sm:$0xff] %vm53_vm0, %v7880_v35  ;;  %v2563_v56 = vld [vmem:[#allocation2 + $0x22] sm:$0xff]  ;;  %v6672_v33 = vld [vmem:[#allocation2 + $0x30] sm:$0xff]  ;;  %2298 = vst.msk [vmem:[#allocation2 + $0xb1] sm:$0xff] %vm53_vm0, %v7877_v16 }
 0x40f   :  { %v6670_v1 = vld [vmem:[#allocation2 + $0x20] sm:$0xff]  ;;  %v6681_v25 = vld [vmem:[#allocation2 + $0x32] sm:$0xff] }
 0x410   :  { %v6679_v60 = vpack.c.bf16 %v6672_v33, %v6670_v1  ;;  %v6683_v51 = vld [vmem:[#allocation2 + $0x31] sm:$0xff]  ;;  %v6686_v55 = vpack.c.bf16 %v6681_v25, %v2563_v56  ;;  %v6688_v43 = vld [vmem:[#allocation2 + $0x42] sm:$0xff] }
 0x411   :  { %v6690_v20 = vld [vmem:[#allocation2 + $0x52] sm:$0xff]  ;;  %v6692_v50 = vld [vmem:[#allocation2 + $0x62] sm:$0xff]  ;;  %v2579_v3 = vpack.c.bf16 %v6688_v43, %v6681_v25 }
 0x412   :  { %v6696_v18 = vpack.c.bf16 %v6690_v20, %v6688_v43  ;;  %v6698_v24 = vld [vmem:[#allocation2 + $0x72] sm:$0xff]  ;;  %v6700_v14 = vld [vmem:[#allocation2 + $0x40] sm:$0xff]  ;;  %2331 = vst.msk [vmem:[#allocation3 + $0x18] sm:$0xff] %vm53_vm0, %v6679_v60  ;;  %2778 = vst.msk [vmem:[#allocation3 + $0x10] sm:$0xff] %vm53_vm0, %v6686_v55 }
 0x413   :  { %v6702_v48 = vld [vmem:[#allocation2 + $0x50] sm:$0xff]  ;;  %v6710_v34 = vpack.c.bf16 %v6698_v24, %v6692_v50  ;;  %v6716_v57 = vld [vmem:[#allocation2 + $0x82] sm:$0xff]  ;;  %v5156_v25 = vld [vmem:[%s7848_s7 + $0x38] sm:$0xff]  }
 0x414   :  { %v6714_v63 = vpack.c.bf16 %v6702_v48, %v6700_v14  ;;  %v6718_v59 = vld [vmem:[#allocation2 + $0xc2] sm:$0xff]  ;;  %v6720_v19 = vld [vmem:[#allocation2 + $0xd2] sm:$0xff]  ;;  %2779 = vst.msk [vmem:[#allocation3 + $0x28] sm:$0xff] %vm53_vm0, %v6696_v18  ;;  %v2773_v8 = vpack.c.bf16 %v2761_v26, %v6716_v57 }
 0x415   :  { %v6722_v7 = vld [vmem:[#allocation2 + $0x21] sm:$0xff]  ;;  %v6729_v9 = vpack.c.bf16 %v6720_v19, %v6718_v59  ;;  %2780 = vst.msk [vmem:[#allocation3 + $0x40] sm:$0xff] %vm53_vm0, %v6710_v34  ;;  %v6737_v47 = vld [vmem:[#allocation2 + $0xf2] sm:$0xff] }
 0x416   :  { %v6731_v28 = vld [vmem:[#allocation2 + $0x41] sm:$0xff]  ;;  %v6741_v40 = vld [vmem:[#allocation2 + $0x112] sm:$0xff]  ;;  %2332 = vst.msk [vmem:[#allocation3 + $0x30] sm:$0xff] %vm53_vm0, %v6714_v63  ;;  %2781 = vst.msk [vmem:[#allocation3 + $0x58] sm:$0xff] %vm53_vm0, %v2773_v8 }
 0x417   :  { %v6733_v41 = vld [vmem:[#allocation2 + $0xe2] sm:$0xff]  ;;  %v2547_v26 = vpack.c.bf16 %v6731_v28, %v6683_v51  ;;  %v2562_v38 = vld [vmem:[#allocation2 + $0x12] sm:$0xff]  ;;  %2782 = vst.msk [vmem:[#allocation3 + $0x70] sm:$0xff] %vm53_vm0, %v6729_v9 }
 0x418   :  { %v6739_v23 = vld [vmem:[#allocation2 + $0x102] sm:$0xff]  ;;  %v2339_v21 = vld [vmem:[#allocation2 + $0x11] sm:$0xff]  ;;  %v6754_v45 = vpack.c.bf16 %v6737_v47, %v6733_v41  ;;  %v2578_v46 = vpack.c.bf16 %v2563_v56, %v2562_v38 }
 0x419   :  { %v6747_v62 = vld [vmem:[#allocation2 + $0x10] sm:$0xff]  ;;  %v6758_v61 = vpack.c.bf16 %v6741_v40, %v6739_v23  ;;  %v2354_v36 = vpack.c.bf16 %v2339_v21, %v2338_v53  ;;  %v6760_v54 = vld [vmem:[#allocation2 + $0x60] sm:$0xff]  ;;  %2555 = vst.msk [vmem:[#allocation3 + $0x20] sm:$0xff] %vm53_vm0, %v2547_v26  ;;  %v2546_v13 = vpack.c.bf16 %v6722_v7, %v2339_v21 }
 0x41a   :  { %v6762_v15 = vld [vmem:[#allocation2 + $0x70] sm:$0xff]  ;;  %2783 = vst.msk [vmem:[#allocation3 + $0x88] sm:$0xff] %vm53_vm0, %v6754_v45  ;;  %v6775_v56 = vld [vmem:[#allocation2 + $0x61] sm:$0xff]  ;;  %v2322_v26 = vpack.c.bf16 %v6747_v62, %v2306_v6  ;;  %2594 = vrot.lane.b32.xlu0 %v2578_v46, %s5197_s0  ;;  %v2418_v46 = vpack.c.bf16 %v2562_v38, %v2402_v17 }
 0x41b   :  { %v6765_v8 = vld [vmem:[#allocation2 + $0x51] sm:$0xff]  ;;  %2784 = vst.msk [vmem:[#allocation3 + $0xa0] sm:$0xff] %vm53_vm0, %v6758_v61  ;;  %v6773_v22 = vpack.c.bf16 %v6762_v15, %v6760_v54  ;;  %v6777_v53 = vld [vmem:[#allocation2 + $0x122] sm:$0xff]  ;;  %2370 = vrot.lane.b32.xlu1 %v2354_v36, %s5197_s0  ;;  %2554 = vst.msk [vmem:[#allocation3 + $0x8] sm:$0xff] %vm53_vm0, %v2546_v13 }
 0x41c   :  { %v2314_v16 = vld [vmem:[#allocation2 + $0xa0] sm:$0xff]  ;;  %v6783_v12 = vld [vmem:[#allocation2 + $0x71] sm:$0xff]  ;;  %v2777_v11 = vpack.c.bf16 %v2769_v4, %v6777_v53  ;;  %2330 = vst.msk [vmem:[#allocation3] sm:$0xff] %vm53_vm0, %v2322_v26  ;;  %v2791_v36 = vld [vmem:[#allocation3 + $0x28] sm:$0xff]  ;;  %v2548_v4 = vpack.c.bf16 %v6775_v56, %v6765_v8 }
 0x41d   :  { %v6786_v35 = vld [vmem:[#allocation2 + $0x81] sm:$0xff]  ;;  %v6788_v29 = vld [vmem:[#allocation2 + $0xb1] sm:$0xff]  ;;  %2333 = vst.msk [vmem:[#allocation3 + $0x48] sm:$0xff] %vm53_vm0, %v6773_v22 }
 0x41e   :  { %v2788_v32 = vld [vmem:[#allocation3 + $0x10] sm:$0xff]  ;;  %v6790_v37 = vld [vmem:[#allocation2 + $0xc0] sm:$0xff]  ;;  %2785 = vst.msk [vmem:[#allocation3 + $0xb8] sm:$0xff] %vm53_vm0, %v2777_v11  ;;  %2658 = vrot.lane.b32.xlu0 %v6679_v60, %s5198_s22  ;;  %2556 = vst.msk [vmem:[#allocation3 + $0x38] sm:$0xff] %vm53_vm0, %v2548_v4 }
 0x41f   :  { %v6792_v27 = vld [vmem:[#allocation2 + $0xd0] sm:$0xff]  ;;  %5032 = vmatprep.mubr.bf16.mxu1 %v2788_v32  ;;  %v6803_v6 = vld [vmem:[#allocation2 + $0xc1] sm:$0xff]  ;;  %v2549_v32 = vpack.c.bf16 %v6786_v35, %v6783_v12  ;;  %2434 = vrot.lane.b32.xlu1 %v2418_v46, %s5198_s22  ;;  %v2706_v46 = vpack.c.bf16 %v6683_v51, %v6722_v7  ;;  %v2797_v2 = vld [vmem:[#allocation3 + $0x58] sm:$0xff] }
 0x420   :  { %v6801_v21 = vpack.c.bf16 %v6792_v27, %v6790_v37  ;;  %5033 = vmatmul.mubr.bf16.vlgmr.msra.gmra.mrb[48].mxu1 %v2791_v36  ;;  %v6807_v13 = vld [vmem:[#allocation2 + $0xd1] sm:$0xff]  ;;  %v6811_v42 = vld [vmem:[#allocation2 + $0xe0] sm:$0xff]  ;;  %v2550_v11 = vpack.c.bf16 %v6803_v6, %v6788_v29  ;;  %v5152_v51 = vld [vmem:[%s7848_s7 + $0x28] sm:$0xff]  }
 0x421   :  { %v6809_v26 = vld [vmem:[#allocation2 + $0xb0] sm:$0xff]  ;;  %v2794_v17 = vld [vmem:[#allocation3 + $0x40] sm:$0xff]  ;;  %2557 = vst.msk [vmem:[#allocation3 + $0x50] sm:$0xff] %vm53_vm0, %v2549_v32  ;;  %v2803_v43 = vld [vmem:[#allocation3 + $0x88] sm:$0xff] }
 0x422   :  { %v6820_v38 = vld [vmem:[#allocation2 + $0xf0] sm:$0xff]  ;;  %v2326_v36 = vpack.c.bf16 %v6809_v26, %v2314_v16  ;;  %2335 = vst.msk [vmem:[#allocation3 + $0x78] sm:$0xff] %vm53_vm0, %v6801_v21  ;;  %5036 = vmatprep.mubr.bf16.mxu1 %v2794_v17  ;;  %v6830_v52 = vld [vmem:[#allocation2 + $0xe1] sm:$0xff]  ;;  %2558 = vst.msk [vmem:[#allocation3 + $0x68] sm:$0xff] %vm53_vm0, %v2550_v11  ;;  %v2482_v16 = vpack.c.bf16 %v6670_v1, %v6747_v62  ;;  %2722 = vrot.lane.b32.xlu0 %v2706_v46, %s5199_s23 }
 0x423   :  { %v6828_v31 = vpack.c.bf16 %v6820_v38, %v6811_v42  ;;  %v6832_v60 = vld [vmem:[#allocation2 + $0x100] sm:$0xff]  ;;  %v6840_v4 = vld [vmem:[#allocation2 + $0xf1] sm:$0xff]  ;;  %v2551_v5 = vpack.c.bf16 %v6830_v52, %v6807_v13  ;;  %v5151_v1 = vld [vmem:[%s7848_s7 + $0x68] sm:$0xff]  }
 0x424   :  { %v6842_v17 = vld [vmem:[#allocation2 + $0x110] sm:$0xff]  ;;  %2334 = vst.msk [vmem:[#allocation3 + $0x60] sm:$0xff] %vm53_vm0, %v2326_v36  ;;  %v6851_v11 = vld [vmem:[#allocation2 + $0x101] sm:$0xff]  ;;  %2498 = vrot.lane.b32.xlu1 %v2482_v16, %s5199_s23  ;;  %4802 = vmatprep.subr.bf16.mxu0 %v5151_v1 }
 0x425   :  { %v6849_v32 = vpack.c.bf16 %v6842_v17, %v6832_v60  ;;  %v6853_v44 = vld [vmem:[#allocation2 + $0x111] sm:$0xff]  ;;  %2336 = vst.msk [vmem:[#allocation3 + $0x90] sm:$0xff] %vm53_vm0, %v6828_v31  ;;  %v6859_v62 = vld [vmem:[#allocation2 + $0x121] sm:$0xff]  ;;  %2559 = vst.msk [vmem:[#allocation3 + $0x80] sm:$0xff] %vm53_vm0, %v2551_v5  ;;  %v2552_v36 = vpack.c.bf16 %v6851_v11, %v6840_v4  ;;  %4803 = vmatpush3.bf16.msra.mxu0 %v5152_v51 }
 0x426   :  { %v5153_v7 = vld [vmem:[%s7848_s7 + $0x70] sm:$0xff]   ;;  %v2553_v16 = vpack.c.bf16 %v6859_v62, %v6853_v44  ;;  %2596 = vrot.lane.b32.xlu0 %v2579_v3, %s5197_s0  ;;  %v2483_v3 = vpack.c.bf16 %v6700_v14, %v6672_v33  ;;  %v2708_v33 = vpack.c.bf16 %v6783_v12, %v6775_v56  ;;  %v2484_v14 = vpack.c.bf16 %v6760_v54, %v6702_v48  ;;  %v2410_v56 = vld [vmem:[#allocation2 + $0xa2] sm:$0xff] }
 0x427   :  { %2337 = vst.msk [vmem:[#allocation3 + $0xa8] sm:$0xff] %vm53_vm0, %v6849_v32  ;;  %v5154_v5 = vld [vmem:[%s7848_s7 + $0x30] sm:$0xff]   ;;  %2560 = vst.msk [vmem:[#allocation3 + $0x98] sm:$0xff] %vm53_vm0, %v2552_v36  ;;  %4804 = vmatprep.subr.bf16.mxu0 %v5153_v7 }
 0x428   :  { %5037 = vmatmul.mubr.bf16.gmra.mrb[52].mxu1 %v2797_v2  ;;  %2561 = vst.msk [vmem:[#allocation3 + $0xb0] sm:$0xff] %vm53_vm0, %v2553_v16  ;;  %2372 = vrot.lane.b32.xlu1 %v2706_v46, %s5197_s0  ;;  %v2800_v0 = vld [vmem:[#allocation3 + $0x70] sm:$0xff]  ;;  %v5155_v2 = vld [vmem:[%s7848_s7 + $0x78] sm:$0xff]   ;;  %v2806_v46 = vld [vmem:[#allocation3 + $0xa0] sm:$0xff] }
 0x429   :  { %5040 = vmatprep.mubr.bf16.mxu1 %v2800_v0  ;;  %4805 = vmatpush3.bf16.msra.mxu0 %v5154_v5  ;;  %v2707_v0 = vpack.c.bf16 %v6765_v8, %v6731_v28  ;;  %v2633_v28 = vld [vmem:[#allocation2 + $0x90] sm:$0xff]  ;;  %v2346_v8 = vld [vmem:[#allocation2 + $0xa1] sm:$0xff] }
 0x42a   :  { %2660 = vrot.lane.b32.xlu0 %v6714_v63, %s5198_s22  ;;  %4806 = vmatprep.subr.bf16.mxu0 %v5155_v2  ;;  %v2580_v63 = vpack.c.bf16 %v6692_v50, %v6690_v20  ;;  %v2581_v20 = vpack.c.bf16 %v6716_v57, %v6698_v24  ;;  %v2632_v50 = vld [vmem:[#allocation2 + $0x80] sm:$0xff]  ;;  %v2570_v48 = vld [vmem:[#allocation2 + $0xb2] sm:$0xff]  ;;  %v2358_v57 = vpack.c.bf16 %v6788_v29, %v2346_v8 }
 0x42b   :  { %v2485_v54 = vpack.c.bf16 %v2632_v50, %v6762_v15  ;;  %v2582_v24 = vpack.c.bf16 %v6718_v59, %v2570_v48  ;;  %v2710_v15 = vpack.c.bf16 %v6807_v13, %v6803_v6  ;;  %v2583_v29 = vpack.c.bf16 %v6733_v41, %v6720_v19  ;;  %v2705_v41 = vld [vmem:[#allocation2 + $0x131] sm:$0xff] }
 0x42c   :  { %2436 = vrot.lane.b32.xlu1 %v6686_v55, %s5198_s22  ;;  %v2809_v55 = vld [vmem:[#allocation3 + $0xb8] sm:$0xff]  ;;  %v2487_v59 = vpack.c.bf16 %v6811_v42, %v6792_v27  ;;  %v2584_v19 = vpack.c.bf16 %v6739_v23, %v6737_v47  ;;  %v2488_v27 = vpack.c.bf16 %v6832_v60, %v6820_v38  ;;  %v2640_v42 = vld [vmem:[#allocation2 + $0x120] sm:$0xff] }
 0x42d   :  { %4807 = vmatpush3.bf16.msra.mxu0 %v5156_v25  ;;  %v2489_v47 = vpack.c.bf16 %v2640_v42, %v6842_v17 }
 0x42e   :  { %2724 = vrot.lane.b32.xlu0 %v2707_v0, %s5199_s23 }
 0x430   :  { %5041 = vmatmul.mubr.bf16.gmra.mrb[56].mxu1 %v2803_v43  ;;  %2500 = vrot.lane.b32.xlu1 %v2483_v3, %s5199_s23 }
 0x431   :  { %5044 = vmatprep.mubr.bf16.mxu1 %v2806_v46 }
 0x432   :  { %2598 = vrot.lane.b32.xlu0 %v2580_v63, %s5197_s0 }
 0x434   :  { %2374 = vrot.lane.b32.xlu1 %v2707_v0, %s5197_s0 }
 0x436   :  { %2662 = vrot.lane.b32.xlu0 %v6773_v22, %s5198_s22  ;;  %v2645_v22 = vpack.c.bf16 %v2633_v28, %v2632_v50 }
 0x438   :  { %5045 = vmatmul.mubr.bf16.gmra.mrb[60].mxu1 %v2809_v55  ;;  %2438 = vrot.lane.b32.xlu1 %v6696_v18, %s5198_s22  ;;  %v2697_v18 = vld [vmem:[#allocation2 + $0x91] sm:$0xff] }
 0x439   :  { %v2709_v12 = vpack.c.bf16 %v2697_v18, %v6786_v35  ;;  %v2486_v35 = vpack.c.bf16 %v6790_v37, %v6809_v26  ;;  %v2711_v37 = vpack.c.bf16 %v6840_v4, %v6830_v52  ;;  %v2585_v52 = vpack.c.bf16 %v6777_v53, %v6741_v40 }
 0x43a   :  { %2726 = vrot.lane.b32.xlu0 %v2708_v33, %s5199_s23 }
 0x43c   :  { %2502 = vrot.lane.b32.xlu1 %v2484_v14, %s5199_s23 }
 0x43e   :  { %2600 = vrot.lane.b32.xlu0 %v2581_v20, %s5197_s0 }
 0x440   :  { %2376 = vrot.lane.b32.xlu1 %v2708_v33, %s5197_s0 }
 0x442   :  { %2664 = vrot.lane.b32.xlu0 %v2645_v22, %s5198_s22 }
 0x444   :  { %2440 = vrot.lane.b32.xlu1 %v6710_v34, %s5198_s22  ;;  %v2422_v34 = vpack.c.bf16 %v2570_v48, %v2410_v56 }
 0x446   :  { %2728 = vrot.lane.b32.xlu0 %v2709_v12, %s5199_s23 }
 0x448   :  { %2504 = vrot.lane.b32.xlu1 %v2485_v54, %s5199_s23 }
 0x44a   :  { %2602 = vrot.lane.b32.xlu0 %v2582_v24, %s5197_s0 }
 0x44c   :  { %2378 = vrot.lane.b32.xlu1 %v2358_v57, %s5197_s0 }
 0x44e   :  { %2666 = vrot.lane.b32.xlu0 %v6801_v21, %s5198_s22 }
 0x450   :  { %2442 = vrot.lane.b32.xlu1 %v2422_v34, %s5198_s22 }
 0x452   :  { %2730 = vrot.lane.b32.xlu0 %v2710_v15, %s5199_s23 }
 0x454   :  { %2506 = vrot.lane.b32.xlu1 %v2486_v35, %s5199_s23 }
 0x456   :  { %2604 = vrot.lane.b32.xlu0 %v2583_v29, %s5197_s0 }
 0x458   :  { %2380 = vrot.lane.b32.xlu1 %v2710_v15, %s5197_s0 }
 0x45a   :  { %2668 = vrot.lane.b32.xlu0 %v6828_v31, %s5198_s22  ;;  %v2712_v31 = vpack.c.bf16 %v6853_v44, %v6851_v11  ;;  %v2713_v44 = vpack.c.bf16 %v2705_v41, %v6859_v62 }
 0x45c   :  { %2444 = vrot.lane.b32.xlu1 %v6729_v9, %s5198_s22  ;;  %v2641_v9 = vld [vmem:[#allocation2 + $0x130] sm:$0xff] }
 0x45e   :  { %2732 = vrot.lane.b32.xlu0 %v2711_v37, %s5199_s23 }
 0x460   :  { %2508 = vrot.lane.b32.xlu1 %v2487_v59, %s5199_s23 }
 0x462   :  { %2606 = vrot.lane.b32.xlu0 %v2584_v19, %s5197_s0 }
 0x464   :  { %2382 = vrot.lane.b32.xlu1 %v2711_v37, %s5197_s0 }
 0x466   :  { %2670 = vrot.lane.b32.xlu0 %v6849_v32, %s5198_s22 }
 0x468   :  { %2446 = vrot.lane.b32.xlu1 %v6754_v45, %s5198_s22  ;;  %v2649_v45 = vpack.c.bf16 %v2641_v9, %v2640_v42 }
 0x46a   :  { %2734 = vrot.lane.b32.xlu0 %v2712_v31, %s5199_s23 }
 0x46c   :  { %2510 = vrot.lane.b32.xlu1 %v2488_v27, %s5199_s23 }
 0x46e   :  { %2608 = vrot.lane.b32.xlu0 %v2585_v52, %s5197_s0 }
 0x470   :  { %2384 = vrot.lane.b32.xlu1 %v2712_v31, %s5197_s0 }
 0x472   :  { %2672 = vrot.lane.b32.xlu0 %v2649_v45, %s5198_s22 }
 0x474   :  { %2448 = vrot.lane.b32.xlu1 %v6758_v61, %s5198_s22 }
 0x476   :  { %2736 = vrot.lane.b32.xlu0 %v2713_v44, %s5199_s23 }
 0x478   :  { %2512 = vrot.lane.b32.xlu1 %v2489_v47, %s5199_s23 }
 0x48c   :  { %v2595_v23 = vpop.permute.xlu0 %2594 }
 0x48d   :  { %v2371_v40 = vpop.permute.xlu1 %2370  ;;  %2618 = vst.msk [vmem:[#allocation3 + $0x8] sm:$0xff] %vm240_vm2, %v2595_v23 }
 0x48e   :  { %2394 = vst.msk [vmem:[#allocation3] sm:$0xff] %vm240_vm2, %v2371_v40 }
 0x490   :  { %v2659_v53 = vpop.permute.xlu0 %2658 }
 0x491   :  { %v2435_v21 = vpop.permute.xlu1 %2434  ;;  %2682 = vst.msk [vmem:[#allocation3 + $0x8] sm:$0xff] %vm305_vm3, %v2659_v53 }
 0x492   :  { %2458 = vst.msk [vmem:[#allocation3] sm:$0xff] %vm305_vm3, %v2435_v21 }
 0x494   :  { %v2723_v61 = vpop.permute.xlu0 %2722 }
 0x495   :  { %2746 = vst.msk [vmem:[#allocation3 + $0x8] sm:$0xff] %vm370_vm4, %v2723_v61 }
 0x496   :  { %v2499_v6 = vpop.permute.xlu1 %2498 }
 0x497   :  { %2522 = vst.msk [vmem:[#allocation3] sm:$0xff] %vm370_vm4, %v2499_v6 }
 0x498   :  { %v2597_v13 = vpop.permute.xlu0 %2596 }
 0x499   :  { %2619 = vst.msk [vmem:[#allocation3 + $0x20] sm:$0xff] %vm240_vm2, %v2597_v13 }
 0x49a   :  { %v2373_v26 = vpop.permute.xlu1 %2372 }
 0x49b   :  { %2395 = vst.msk [vmem:[#allocation3 + $0x18] sm:$0xff] %vm240_vm2, %v2373_v26 }
 0x49c   :  { %v2661_v38 = vpop.permute.xlu0 %2660  ;;  %v2787_v4 = vld [vmem:[#allocation3 + $0x8] sm:$0xff] }
 0x49d   :  { %2683 = vst.msk [vmem:[#allocation3 + $0x20] sm:$0xff] %vm305_vm3, %v2661_v38  ;;  %3034 = vmatprep.mubr.bf16.mxu0 %v2787_v4 }
 0x49e   :  { %v2437_v60 = vpop.permute.xlu1 %2436  ;;  %v2786_v17 = vld [vmem:[#allocation3] sm:$0xff] }
 0x49f   :  { %2459 = vst.msk [vmem:[#allocation3 + $0x18] sm:$0xff] %vm305_vm3, %v2437_v60  ;;  %3035 = vmatmul.mubr.bf16.vlgmr.msra.gmra.mrb[48].mxu0 %v2786_v17 }
 0x4a0   :  { %v2725_v32 = vpop.permute.xlu0 %2724 }
 0x4a1   :  { %2747 = vst.msk [vmem:[#allocation3 + $0x20] sm:$0xff] %vm370_vm4, %v2725_v32 }
 0x4a2   :  { %v2501_v11 = vpop.permute.xlu1 %2500 }
 0x4a3   :  { %2523 = vst.msk [vmem:[#allocation3 + $0x18] sm:$0xff] %vm370_vm4, %v2501_v11 }
 0x4a4   :  { %v2599_v62 = vpop.permute.xlu0 %2598 }
 0x4a5   :  { %2620 = vst.msk [vmem:[#allocation3 + $0x38] sm:$0xff] %vm240_vm2, %v2599_v62 }
 0x4a6   :  { %v2375_v1 = vpop.permute.xlu1 %2374 }
 0x4a7   :  { %2396 = vst.msk [vmem:[#allocation3 + $0x30] sm:$0xff] %vm240_vm2, %v2375_v1 }
 0x4a8   :  { %v2663_v51 = vpop.permute.xlu0 %2662  ;;  %v2790_v36 = vld [vmem:[#allocation3 + $0x20] sm:$0xff] }
 0x4a9   :  { %2684 = vst.msk [vmem:[#allocation3 + $0x38] sm:$0xff] %vm305_vm3, %v2663_v51  ;;  %3042 = vmatprep.mubr.bf16.mxu0 %v2790_v36 }
 0x4aa   :  { %v2439_v7 = vpop.permute.xlu1 %2438  ;;  %v2789_v16 = vld [vmem:[#allocation3 + $0x18] sm:$0xff] }
 0x4ab   :  { %2460 = vst.msk [vmem:[#allocation3 + $0x30] sm:$0xff] %vm305_vm3, %v2439_v7  ;;  %3043 = vmatmul.mubr.bf16.gmra.mrb[52].mxu0 %v2789_v16 }
 0x4ac   :  { %v2727_v5 = vpop.permute.xlu0 %2726 }
 0x4ad   :  { %2748 = vst.msk [vmem:[#allocation3 + $0x38] sm:$0xff] %vm370_vm4, %v2727_v5 }
 0x4ae   :  { %v2503_v2 = vpop.permute.xlu1 %2502 }
 0x4af   :  { %2524 = vst.msk [vmem:[#allocation3 + $0x30] sm:$0xff] %vm370_vm4, %v2503_v2 }
 0x4b0   :  { %v2601_v25 = vpop.permute.xlu0 %2600 }
 0x4b1   :  { %2621 = vst.msk [vmem:[#allocation3 + $0x50] sm:$0xff] %vm240_vm2, %v2601_v25 }
 0x4b2   :  { %v2377_v0 = vpop.permute.xlu1 %2376 }
 0x4b3   :  { %2397 = vst.msk [vmem:[#allocation3 + $0x48] sm:$0xff] %vm240_vm2, %v2377_v0 }
 0x4b4   :  { %v2665_v3 = vpop.permute.xlu0 %2664  ;;  %v2793_v46 = vld [vmem:[#allocation3 + $0x38] sm:$0xff] }
 0x4b5   :  { %2685 = vst.msk [vmem:[#allocation3 + $0x50] sm:$0xff] %vm305_vm3, %v2665_v3  ;;  %3050 = vmatprep.mubr.bf16.mxu0 %v2793_v46 }
 0x4b6   :  { %v2441_v43 = vpop.permute.xlu1 %2440  ;;  %v2792_v63 = vld [vmem:[#allocation3 + $0x30] sm:$0xff] }
 0x4b7   :  { %2461 = vst.msk [vmem:[#allocation3 + $0x48] sm:$0xff] %vm305_vm3, %v2441_v43  ;;  %3051 = vmatmul.mubr.bf16.gmra.mrb[56].mxu0 %v2792_v63 }
 0x4b8   :  { %v2729_v55 = vpop.permute.xlu0 %2728 }
 0x4b9   :  { %2749 = vst.msk [vmem:[#allocation3 + $0x50] sm:$0xff] %vm370_vm4, %v2729_v55 }
 0x4ba   :  { %v2505_v33 = vpop.permute.xlu1 %2504 }
 0x4bb   :  { %2525 = vst.msk [vmem:[#allocation3 + $0x48] sm:$0xff] %vm370_vm4, %v2505_v33  ;;  %v5157_v33 = vld [vmem:[%s7851_s10 + $0x80] sm:$0xff]  }
 0x4bc   :  { %v2603_v14 = vpop.permute.xlu0 %2602  ;;  %5048 = vmatprep.subr.bf16.mxu0 %v5157_v33 }
 0x4bd   :  { %2622 = vst.msk [vmem:[#allocation3 + $0x68] sm:$0xff] %vm240_vm2, %v2603_v14  ;;  %5049 = vmatpush3.bf16.msra.mxu0 %v5157_v33  ;;  %v5158_v14 = vld [vmem:[%s7851_s10 + $0x88] sm:$0xff]  }
 0x4be   :  { %v2379_v20 = vpop.permute.xlu1 %2378  ;;  %5050 = vmatprep.subr.bf16.mxu0 %v5158_v14 }
 0x4bf   :  { %2398 = vst.msk [vmem:[#allocation3 + $0x60] sm:$0xff] %vm240_vm2, %v2379_v20 }
 0x4c0   :  { %v2667_v50 = vpop.permute.xlu0 %2666  ;;  %v2796_v22 = vld [vmem:[#allocation3 + $0x50] sm:$0xff] }
 0x4c1   :  { %2686 = vst.msk [vmem:[#allocation3 + $0x68] sm:$0xff] %vm305_vm3, %v2667_v50  ;;  %3058 = vmatprep.mubr.bf16.mxu0 %v2796_v22  ;;  %5051 = vmatpush3.bf16.msra.mxu0 %v5158_v14 }
 0x4c2   :  { %v2443_v28 = vpop.permute.xlu1 %2442  ;;  %v2795_v18 = vld [vmem:[#allocation3 + $0x48] sm:$0xff] }
 0x4c3   :  { %2462 = vst.msk [vmem:[#allocation3 + $0x60] sm:$0xff] %vm305_vm3, %v2443_v28  ;;  %3059 = vmatmul.mubr.bf16.gmra.mrb[60].mxu0 %v2795_v18  ;;  %v5159_v18 = vld [vmem:[%s7851_s10 + $0x90] sm:$0xff]  }
 0x4c4   :  { %v2731_v12 = vpop.permute.xlu0 %2730  ;;  %5052 = vmatprep.subr.bf16.mxu0 %v5159_v18 }
 0x4c5   :  { %2750 = vst.msk [vmem:[#allocation3 + $0x68] sm:$0xff] %vm370_vm4, %v2731_v12  ;;  %5053 = vmatpush3.bf16.msra.mxu0 %v5159_v18 }
 0x4c6   :  { %v2507_v54 = vpop.permute.xlu1 %2506 }
 0x4c7   :  { %2526 = vst.msk [vmem:[#allocation3 + $0x60] sm:$0xff] %vm370_vm4, %v2507_v54 }
 0x4c8   :  { %v2605_v48 = vpop.permute.xlu0 %2604 }
 0x4c9   :  { %2623 = vst.msk [vmem:[#allocation3 + $0x80] sm:$0xff] %vm240_vm2, %v2605_v48 }
 0x4ca   :  { %v2381_v8 = vpop.permute.xlu1 %2380 }
 0x4cb   :  { %2399 = vst.msk [vmem:[#allocation3 + $0x78] sm:$0xff] %vm240_vm2, %v2381_v8 }
 0x4cc   :  { %v2669_v24 = vpop.permute.xlu0 %2668  ;;  %v2799_v56 = vld [vmem:[#allocation3 + $0x68] sm:$0xff] }
 0x4cd   :  { %2687 = vst.msk [vmem:[#allocation3 + $0x80] sm:$0xff] %vm305_vm3, %v2669_v24  ;;  %3066 = vmatprep.mubr.bf16.mxu0 %v2799_v56  ;;  %v5160_v24 = vld [vmem:[%s7851_s10 + $0x98] sm:$0xff]  }
 0x4ce   :  { %v2445_v57 = vpop.permute.xlu1 %2444  ;;  %v2798_v34 = vld [vmem:[#allocation3 + $0x60] sm:$0xff]  ;;  %5054 = vmatprep.subr.bf16.mxu0 %v5160_v24 }
 0x4cf   :  { %2463 = vst.msk [vmem:[#allocation3 + $0x78] sm:$0xff] %vm305_vm3, %v2445_v57  ;;  %3067 = vmatmul.mubr.bf16.gmra.mrb[64].mxu0 %v2798_v34  ;;  %v5161_v34 = vld [vmem:[%s7851_s10 + $0xa0] sm:$0xff]  }
 0x4d0   :  { %v2733_v15 = vpop.permute.xlu0 %2732  ;;  %5055 = vmatpush3.bf16.msra.mxu0 %v5160_v24 }
 0x4d1   :  { %2751 = vst.msk [vmem:[#allocation3 + $0x80] sm:$0xff] %vm370_vm4, %v2733_v15  ;;  %5056 = vmatprep.subr.bf16.mxu0 %v5161_v34 }
 0x4d2   :  { %v2509_v35 = vpop.permute.xlu1 %2508 }
 0x4d3   :  { %2527 = vst.msk [vmem:[#allocation3 + $0x78] sm:$0xff] %vm370_vm4, %v2509_v35 }
 0x4d4   :  { %v2607_v29 = vpop.permute.xlu0 %2606  ;;  %5057 = vmatpush3.bf16.msra.mxu0 %v5161_v34 }
 0x4d5   :  { %2624 = vst.msk [vmem:[#allocation3 + $0x98] sm:$0xff] %vm240_vm2, %v2607_v29 }
 0x4d6   :  { %v2383_v37 = vpop.permute.xlu1 %2382 }
 0x4d7   :  { %2400 = vst.msk [vmem:[#allocation3 + $0x90] sm:$0xff] %vm240_vm2, %v2383_v37 }
 0x4d8   :  { %v2671_v59 = vpop.permute.xlu0 %2670  ;;  %v2802_v31 = vld [vmem:[#allocation3 + $0x80] sm:$0xff] }
 0x4d9   :  { %2688 = vst.msk [vmem:[#allocation3 + $0x98] sm:$0xff] %vm305_vm3, %v2671_v59  ;;  %3074 = vmatprep.mubr.bf16.mxu0 %v2802_v31 }
 0x4da   :  { %v2447_v19 = vpop.permute.xlu1 %2446  ;;  %v2801_v27 = vld [vmem:[#allocation3 + $0x78] sm:$0xff] }
 0x4db   :  { %2464 = vst.msk [vmem:[#allocation3 + $0x90] sm:$0xff] %vm305_vm3, %v2447_v19  ;;  %3075 = vmatmul.mubr.bf16.gmra.mrb[68].mxu0 %v2801_v27  ;;  %v5162_v19 = vld [vmem:[%s7851_s10 + $0xa8] sm:$0xff]  }
 0x4dc   :  { %v2735_v52 = vpop.permute.xlu0 %2734  ;;  %5058 = vmatprep.subr.bf16.mxu0 %v5162_v19 }
 0x4dd   :  { %2752 = vst.msk [vmem:[#allocation3 + $0x98] sm:$0xff] %vm370_vm4, %v2735_v52  ;;  %5059 = vmatpush3.bf16.msra.mxu0 %v5162_v19 }
 0x4de   :  { %v2511_v42 = vpop.permute.xlu1 %2510 }
 0x4df   :  { %2528 = vst.msk [vmem:[#allocation3 + $0x90] sm:$0xff] %vm370_vm4, %v2511_v42 }
 0x4e0   :  { %v2609_v9 = vpop.permute.xlu0 %2608 }
 0x4e1   :  { %2625 = vst.msk [vmem:[#allocation3 + $0xb0] sm:$0xff] %vm240_vm2, %v2609_v9 }
 0x4e2   :  { %v2385_v45 = vpop.permute.xlu1 %2384 }
 0x4e3   :  { %2401 = vst.msk [vmem:[#allocation3 + $0xa8] sm:$0xff] %vm240_vm2, %v2385_v45 }
 0x4e4   :  { %v2673_v41 = vpop.permute.xlu0 %2672  ;;  %v2805_v47 = vld [vmem:[#allocation3 + $0x98] sm:$0xff] }
 0x4e5   :  { %2689 = vst.msk [vmem:[#allocation3 + $0xb0] sm:$0xff] %vm305_vm3, %v2673_v41  ;;  %3082 = vmatprep.mubr.bf16.mxu0 %v2805_v47 }
 0x4e6   :  { %v2449_v44 = vpop.permute.xlu1 %2448  ;;  %v2804_v23 = vld [vmem:[#allocation3 + $0x90] sm:$0xff] }
 0x4e7   :  { %2465 = vst.msk [vmem:[#allocation3 + $0xa8] sm:$0xff] %vm305_vm3, %v2449_v44  ;;  %3083 = vmatmul.mubr.bf16.gmra.mrb[72].mxu0 %v2804_v23 }
 0x4e8   :  { %v2737_v40 = vpop.permute.xlu0 %2736 }
 0x4e9   :  { %2753 = vst.msk [vmem:[#allocation3 + $0xb0] sm:$0xff] %vm370_vm4, %v2737_v40 }
 0x4ea   :  { %v2513_v53 = vpop.permute.xlu1 %2512 }
 0x4eb   :  { %2529 = vst.msk [vmem:[#allocation3 + $0xa8] sm:$0xff] %vm370_vm4, %v2513_v53  ;;  %v5163_v53 = vld [vmem:[%s7851_s10 + $0xb0] sm:$0xff]  }
 0x4ec   :  { %5060 = vmatprep.subr.bf16.mxu0 %v5163_v53 }
 0x4ed   :  { %5061 = vmatpush3.bf16.msra.mxu0 %v5163_v53 }
 0x4f0   :  { %v2808_v21 = vld [vmem:[#allocation3 + $0xb0] sm:$0xff] }
 0x4f1   :  { %3090 = vmatprep.mubr.bf16.mxu0 %v2808_v21 }
 0x4f2   :  { %v2807_v61 = vld [vmem:[#allocation3 + $0xa8] sm:$0xff] }
 0x4f3   :  { %v5034_v6 = vpop.f32.mrb[48].mxu1  ;;  %3091 = vmatmul.mubr.bf16.gmra.mrb[76].mxu0 %v2807_v61 }
 0x4f4   :  { %v3133_v13 = vpop.f32.mrb[49].mxu1 }
 0x4f5   :  { %v5035_v26 = vpop.f32.mrb[50].mxu1 }
 0x4f6   :  { %v3136_v38 = vpop.f32.mrb[51].mxu1 }
 0x4fb   :  { %v7027_v60 = vpop.f32.mrb[52].mxu1 }
 0x4fc   :  { %v7029_v4 = vpop.f32.mrb[53].mxu1 }
 0x4fd   :  { %v7031_v17 = vpop.f32.mrb[54].mxu1 }
 0x4fe   :  { %v7033_v32 = vpop.f32.mrb[55].mxu1 }
 0x503   :  { %v7035_v11 = vpop.f32.mrb[56].mxu1 }
 0x504   :  { %v7037_v62 = vpop.f32.mrb[57].mxu1 }
 0x505   :  { %v7039_v1 = vpop.f32.mrb[58].mxu1 }
 0x506   :  { %v7041_v51 = vpop.f32.mrb[59].mxu1 }
 0x50b   :  { %v7043_v7 = vpop.f32.mrb[60].mxu1 }
 0x50c   :  { %v7045_v36 = vpop.f32.mrb[61].mxu1 }
 0x50d   :  { %v7047_v16 = vpop.f32.mrb[62].mxu1 }
 0x50e   :  { %v7049_v5 = vpop.f32.mrb[63].mxu1 }
 0x572   :  { %v4808_v2 = vpop.f32.mrb[48].mxu0 }
 0x573   :  { %v4809_v25 = vpop.f32.mrb[49].mxu0 }
 0x574   :  { %v4810_v0 = vadd.f32 %v4809_v25, %v4808_v2  ;;  %v4811_v3 = vpop.f32.mrb[50].mxu0 }
 0x575   :  { %v4812_v43 = vpop.f32.mrb[51].mxu0 }
 0x576   :  { %v7051_v46 = vadd.f32 %v4810_v0, %v3133_v13  ;;  %v4813_v63 = vadd.f32 %v4812_v43, %v4811_v3  ;;  %v5164_v3 = vld [vmem:[%s7851_s10 + $0xb8] sm:$0xff]  }
 0x577   :  { %5062 = vmatprep.subr.bf16.mxu0 %v5164_v3 }
 0x578   :  { %v7053_v55 = vadd.f32 %v4813_v63, %v3136_v38  ;;  %v3198_v57 = vsel %vm53_vm0, %v7051_v46, 0.0  ;;  %v3236_v15 = vmul.f32 %v7051_v46, %v7051_v46  ;;  %5063 = vmatpush3.bf16.msra.mxu0 %v5164_v3 }
 0x57a   :  { %v3237_v54 = vmul.f32 %v7053_v55, %v7053_v55  ;;  %v3199_v35 = vsel %vm53_vm0, %v7053_v55, 0.0  ;;  %v3252_v27 = vsel %vm53_vm0, %v3236_v15, 0.0 }
 0x57b   :  { %v3200_v31 = vadd.f32 %v3199_v35, %v3198_v57 }
 0x57c   :  { %v3253_v29 = vsel %vm53_vm0, %v3237_v54, 0.0 }
 0x57d   :  { %v3254_v45 = vadd.f32 %v3253_v29, %v3252_v27 }
 0x57e   :  { %v4814_v20 = vpop.f32.mrb[52].mxu0 }
 0x57f   :  { %v4815_v50 = vpop.f32.mrb[53].mxu0 }
 0x580   :  { %v4816_v28 = vadd.f32 %v4815_v50, %v4814_v20  ;;  %v4817_v22 = vpop.f32.mrb[54].mxu0 }
 0x581   :  { %v4818_v12 = vpop.f32.mrb[55].mxu0 }
 0x582   :  { %v7066_v48 = vadd.f32 %v5034_v6, %v4816_v28  ;;  %v4819_v8 = vadd.f32 %v4818_v12, %v4817_v22 }
 0x584   :  { %v7073_v56 = vadd.f32 %v5035_v26, %v4819_v8  ;;  %v3238_v37 = vmul.f32 %v7066_v48, %v7066_v48  ;;  %v3201_v59 = vsel %vm53_vm0, %v7066_v48, 0.0 }
 0x585   :  { %v3202_v41 = vadd.f32 %v3201_v59, %v3200_v31 }
 0x586   :  { %v3255_v52 = vsel %vm53_vm0, %v3238_v37, 0.0  ;;  %v3239_v42 = vmul.f32 %v7073_v56, %v7073_v56  ;;  %v3203_v44 = vsel %vm53_vm0, %v7073_v56, 0.0 }
 0x587   :  { %v3256_v21 = vadd.f32 %v3255_v52, %v3254_v45  ;;  %v3204_v38 = vadd.f32 %v3203_v44, %v3202_v41 }
 0x588   :  { %v3257_v6 = vsel %vm53_vm0, %v3239_v42, 0.0 }
 0x589   :  { %v3258_v43 = vadd.f32 %v3257_v6, %v3256_v21 }
 0x58a   :  { %v4820_v9 = vpop.f32.mrb[56].mxu0 }
 0x58b   :  { %v4821_v47 = vpop.f32.mrb[57].mxu0 }
 0x58c   :  { %v4822_v23 = vadd.f32 %v4821_v47, %v4820_v9  ;;  %v4823_v40 = vpop.f32.mrb[58].mxu0 }
 0x58d   :  { %v4824_v61 = vpop.f32.mrb[59].mxu0 }
 0x58e   :  { %v7101_v13 = vadd.f32 %v4822_v23, %v7029_v4  ;;  %v4825_v26 = vadd.f32 %v4824_v61, %v4823_v40 }
 0x590   :  { %v3205_v2 = vsel %vm53_vm0, %v7101_v13, 0.0  ;;  %v3240_v25 = vmul.f32 %v7101_v13, %v7101_v13  ;;  %v7108_v0 = vadd.f32 %v4825_v26, %v7033_v32 }
 0x591   :  { %v3206_v4 = vadd.f32 %v3205_v2, %v3204_v38 }
 0x592   :  { %v3259_v63 = vsel %vm53_vm0, %v3240_v25, 0.0  ;;  %v3207_v33 = vsel %vm53_vm0, %v7108_v0, 0.0  ;;  %v3241_v14 = vmul.f32 %v7108_v0, %v7108_v0 }
 0x593   :  { %v3260_v20 = vadd.f32 %v3259_v63, %v3258_v43  ;;  %v3208_v50 = vadd.f32 %v3207_v33, %v3206_v4 }
 0x594   :  { %v3261_v32 = vsel %vm53_vm0, %v3241_v14, 0.0 }
 0x595   :  { %v3262_v28 = vadd.f32 %v3261_v32, %v3260_v20 }
 0x596   :  { %v4826_v22 = vpop.f32.mrb[60].mxu0 }
 0x597   :  { %v4827_v18 = vpop.f32.mrb[61].mxu0 }
 0x598   :  { %v4828_v12 = vadd.f32 %v4827_v18, %v4826_v22  ;;  %v4829_v54 = vpop.f32.mrb[62].mxu0 }
 0x599   :  { %v4830_v8 = vpop.f32.mrb[63].mxu0 }
 0x59a   :  { %v7120_v24 = vadd.f32 %v7027_v60, %v4828_v12  ;;  %v4831_v57 = vadd.f32 %v4830_v8, %v4829_v54 }
 0x59c   :  { %v3209_v34 = vsel %vm53_vm0, %v7120_v24, 0.0  ;;  %v3242_v15 = vmul.f32 %v7120_v24, %v7120_v24  ;;  %v7127_v35 = vadd.f32 %v7031_v17, %v4831_v57 }
 0x59d   :  { %v3210_v29 = vadd.f32 %v3209_v34, %v3208_v50 }
 0x59e   :  { %v3263_v37 = vsel %vm53_vm0, %v3242_v15, 0.0  ;;  %v3211_v59 = vsel %vm53_vm0, %v7127_v35, 0.0  ;;  %v3243_v60 = vmul.f32 %v7127_v35, %v7127_v35 }
 0x59f   :  { %v3264_v19 = vadd.f32 %v3263_v37, %v3262_v28  ;;  %v3212_v31 = vadd.f32 %v3211_v59, %v3210_v29 }
 0x5a0   :  { %v3265_v27 = vsel %vm53_vm0, %v3243_v60, 0.0 }
 0x5a1   :  { %v3266_v52 = vadd.f32 %v3265_v27, %v3264_v19 }
 0x5a2   :  { %v4832_v42 = vpop.f32.mrb[64].mxu0 }
 0x5a3   :  { %v4833_v9 = vpop.f32.mrb[65].mxu0 }
 0x5a4   :  { %v4834_v45 = vadd.f32 %v4833_v9, %v4832_v42  ;;  %v4835_v41 = vpop.f32.mrb[66].mxu0 }
 0x5a5   :  { %v4836_v17 = vpop.f32.mrb[67].mxu0 }
 0x5a6   :  { %v7136_v44 = vadd.f32 %v4834_v45, %v7037_v62  ;;  %v4837_v47 = vadd.f32 %v4836_v17, %v4835_v41 }
 0x5a8   :  { %v3213_v23 = vsel %vm53_vm0, %v7136_v44, 0.0  ;;  %v3244_v40 = vmul.f32 %v7136_v44, %v7136_v44  ;;  %v7143_v53 = vadd.f32 %v4837_v47, %v7041_v51 }
 0x5a9   :  { %v3214_v21 = vadd.f32 %v3213_v23, %v3212_v31 }
 0x5aa   :  { %v3267_v61 = vsel %vm53_vm0, %v3244_v40, 0.0  ;;  %v3215_v6 = vsel %vm53_vm0, %v7143_v53, 0.0  ;;  %v3245_v62 = vmul.f32 %v7143_v53, %v7143_v53 }
 0x5ab   :  { %v3268_v26 = vadd.f32 %v3267_v61, %v3266_v52  ;;  %v3216_v38 = vadd.f32 %v3215_v6, %v3214_v21 }
 0x5ac   :  { %v3269_v2 = vsel %vm53_vm0, %v3245_v62, 0.0 }
 0x5ad   :  { %v3270_v25 = vadd.f32 %v3269_v2, %v3268_v26 }
 0x5ae   :  { %v4838_v3 = vpop.f32.mrb[68].mxu0 }
 0x5af   :  { %v4839_v43 = vpop.f32.mrb[69].mxu0 }
 0x5b0   :  { %v4840_v4 = vadd.f32 %v4839_v43, %v4838_v3  ;;  %v4841_v63 = vpop.f32.mrb[70].mxu0 }
 0x5b1   :  { %v4842_v51 = vpop.f32.mrb[71].mxu0 }
 0x5b2   :  { %v7152_v33 = vadd.f32 %v7035_v11, %v4840_v4  ;;  %v4843_v14 = vadd.f32 %v4842_v51, %v4841_v63 }
 0x5b4   :  { %v3217_v20 = vsel %vm53_vm0, %v7152_v33, 0.0  ;;  %v3246_v50 = vmul.f32 %v7152_v33, %v7152_v33  ;;  %v7159_v32 = vadd.f32 %v7039_v1, %v4843_v14 }
 0x5b5   :  { %v3218_v28 = vadd.f32 %v3217_v20, %v3216_v38 }
 0x5b6   :  { %v3271_v22 = vsel %vm53_vm0, %v3246_v50, 0.0  ;;  %v3219_v18 = vsel %vm53_vm0, %v7159_v32, 0.0  ;;  %v3247_v11 = vmul.f32 %v7159_v32, %v7159_v32 }
 0x5b7   :  { %v3272_v12 = vadd.f32 %v3271_v22, %v3270_v25  ;;  %v3220_v54 = vadd.f32 %v3219_v18, %v3218_v28 }
 0x5b8   :  { %v3273_v8 = vsel %vm53_vm0, %v3247_v11, 0.0 }
 0x5b9   :  { %v3274_v57 = vadd.f32 %v3273_v8, %v3272_v12 }
 0x5ba   :  { %v4844_v34 = vpop.f32.mrb[72].mxu0 }
 0x5bb   :  { %v4845_v15 = vpop.f32.mrb[73].mxu0 }
 0x5bc   :  { %v4846_v29 = vadd.f32 %v4845_v15, %v4844_v34  ;;  %v4847_v37 = vpop.f32.mrb[74].mxu0 }
 0x5bd   :  { %v4848_v1 = vpop.f32.mrb[75].mxu0 }
 0x5be   :  { %v7168_v59 = vadd.f32 %v4846_v29, %v7045_v36  ;;  %v4849_v60 = vadd.f32 %v4848_v1, %v4847_v37 }
 0x5c0   :  { %v3221_v19 = vsel %vm53_vm0, %v7168_v59, 0.0  ;;  %v3248_v31 = vmul.f32 %v7168_v59, %v7168_v59  ;;  %v7175_v27 = vadd.f32 %v4849_v60, %v7049_v5 }
 0x5c1   :  { %v3222_v52 = vadd.f32 %v3221_v19, %v3220_v54  ;;  %v5165_v19 = vld [vmem:[%s7851_s10 + $0x40] sm:$0xff]  }
 0x5c2   :  { %v3275_v42 = vsel %vm53_vm0, %v3248_v31, 0.0  ;;  %v3223_v9 = vsel %vm53_vm0, %v7175_v27, 0.0  ;;  %v3249_v36 = vmul.f32 %v7175_v27, %v7175_v27  ;;  %v5166_v31 = vld [vmem:[%s7851_s10] sm:$0xff]   ;;  %4872 = vmatprep.subr.bf16.mxu1 %v5165_v19 }
 0x5c3   :  { %v3276_v45 = vadd.f32 %v3275_v42, %v3274_v57  ;;  %v3224_v41 = vadd.f32 %v3223_v9, %v3222_v52  ;;  %v5167_v52 = vld [vmem:[%s7851_s10 + $0x48] sm:$0xff]   ;;  %4873 = vmatpush3.bf16.msra.mxu1 %v5166_v31  ;;  %v5169_v9 = vld [vmem:[%s7851_s10 + $0x50] sm:$0xff]  }
 0x5c4   :  { %v3277_v17 = vsel %vm53_vm0, %v3249_v36, 0.0  ;;  %v5168_v42 = vld [vmem:[%s7851_s10 + $0x8] sm:$0xff]   ;;  %4874 = vmatprep.subr.bf16.mxu1 %v5167_v52  ;;  %v3196_v36 = vld [vmem:[%s7852_s8] sm:$0x1] }
 0x5c5   :  { %v3278_v47 = vadd.f32 %v3277_v17, %v3276_v45  ;;  %v5170_v45 = vld [vmem:[%s7851_s10 + $0x10] sm:$0xff]   ;;  %v5171_v17 = vld [vmem:[%s7851_s10 + $0x58] sm:$0xff]  }
 0x5c6   :  { %v4850_v23 = vpop.f32.mrb[76].mxu0 }
 0x5c7   :  { %v4851_v40 = vpop.f32.mrb[77].mxu0  ;;  %4875 = vmatpush3.bf16.msra.mxu1 %v5168_v42 }
 0x5c8   :  { %v4852_v21 = vadd.f32 %v4851_v40, %v4850_v23  ;;  %v4853_v61 = vpop.f32.mrb[78].mxu0  ;;  %4876 = vmatprep.subr.bf16.mxu1 %v5169_v9  ;;  %v3197_v23 = vld [vmem:[%s7853_s9] sm:$0x1] }
 0x5c9   :  { %v4854_v5 = vpop.f32.mrb[79].mxu0 }
 0x5ca   :  { %v7184_v6 = vadd.f32 %v7043_v7, %v4852_v21  ;;  %v4855_v62 = vadd.f32 %v4854_v5, %v4853_v61  ;;  %v5172_v61 = vld [vmem:[%s7851_s10 + $0x18] sm:$0xff]  }
 0x5cb   :  { %4877 = vmatpush3.bf16.msra.mxu1 %v5170_v45 }
 0x5cc   :  { %v3225_v26 = vsel %vm53_vm0, %v7184_v6, 0.0  ;;  %v3250_v38 = vmul.f32 %v7184_v6, %v7184_v6  ;;  %v7191_v2 = vadd.f32 %v7047_v16, %v4855_v62  ;;  %4878 = vmatprep.subr.bf16.mxu1 %v5171_v17  ;;  %v5176_v17 = vld [vmem:[%s7851_s10 + $0x28] sm:$0xff]  }
 0x5cd   :  { %v3226_v25 = vadd.f32 %v3225_v26, %v3224_v41 }
 0x5ce   :  { %v3279_v3 = vsel %vm53_vm0, %v3250_v38, 0.0  ;;  %v3227_v43 = vsel %vm53_vm0, %v7191_v2, 0.0  ;;  %v3251_v7 = vmul.f32 %v7191_v2, %v7191_v2 }
 0x5cf   :  { %v3280_v4 = vadd.f32 %v3279_v3, %v3278_v47  ;;  %v3228_v63 = vadd.f32 %v3227_v43, %v3226_v25  ;;  %4879 = vmatpush3.bf16.msra.mxu1 %v5172_v61 }
 0x5d0   :  { %v3281_v51 = vsel %vm53_vm0, %v3251_v7, 0.0 }
 0x5d1   :  { %v3229_v14 = vrot.slane %v3228_v63, 4  ;;  %v3282_v20 = vadd.f32 %v3281_v51, %v3280_v4 }
 0x5d3   :  { %v3230_v50 = vadd.f32 %v3229_v14, %v3228_v63  ;;  %v3283_v28 = vrot.slane %v3282_v20, 4 }
 0x5d5   :  { %v3231_v22 = vrot.slane %v3230_v50, 2  ;;  %v3284_v16 = vadd.f32 %v3283_v28, %v3282_v20 }
 0x5d7   :  { %v3232_v18 = vadd.f32 %v3231_v22, %v3230_v50  ;;  %v3285_v11 = vrot.slane %v3284_v16, 2 }
 0x5d9   :  { %v3233_v12 = vrot.slane %v3232_v18, 1  ;;  %v3286_v54 = vadd.f32 %v3285_v11, %v3284_v16 }
 0x5db   :  { %v3234_v8 = vadd.f32 %v3233_v12, %v3232_v18  ;;  %v3287_v57 = vrot.slane %v3286_v54, 1  ;;  %v5174_v12 = vld [vmem:[%s7851_s10 + $0x20] sm:$0xff]  }
 0x5dd   :  { %v3235_v34 = vmul.f32 0.0078125, %v3234_v8  ;;  %v3288_v15 = vadd.f32 %v3287_v57, %v3286_v54 }
 0x5df   :  { %v3289_v29 = vmul.f32 0.0078125, %v3288_v15  ;;  %v3290_v37 = vmul.f32 %v3235_v34, %v3235_v34 }
 0x5e1   :  { %v3291_v1 = vsub.f32 %v3289_v29, %v3290_v37 }
 0x5e3   :  { %v3292_v60 = vadd.f32 1e-05, %v3291_v1 }
 0x5e5   :  { %5185 = vrsqrt.f32 %v3292_v60 }
 0x5ef   :  { %v5186_v41 = vpop.eup %5185 }
 0x5f0   :  { %v3294_v47 = vmul.f32 %v5186_v41, %v3196_v36  ;;  %v5175_v41 = vld [vmem:[%s7851_s10 + $0x68] sm:$0xff]  }
 0x5f2   :  { %v3295_v40 = vmul.f32 %v3294_v47, %v3235_v34  ;;  %v3301_v21 = vrot.slane %v3294_v47, %v5960_v58  ;;  %v3405_v47 = vld [vmem:[#allocation2 + $0x1] sm:$0xff] }
 0x5f4   :  { %v3296_v5 = vsub.f32 %v3197_v23, %v3295_v40  ;;  %v3303_v62 = vmul.f32 %v3301_v21, %v7051_v46  ;;  %v3306_v26 = vmul.f32 %v3301_v21, %v7073_v56  ;;  %v3307_v38 = vmul.f32 %v3301_v21, %v7101_v13  ;;  %v5177_v23 = vld [vmem:[%s7851_s10 + $0x70] sm:$0xff]  }
 0x5f5   :  { %v3308_v25 = vmul.f32 %v3301_v21, %v7108_v0  ;;  %v3309_v3 = vmul.f32 %v3301_v21, %v7120_v24  ;;  %v3310_v43 = vmul.f32 %v3301_v21, %v7127_v35  ;;  %v3311_v7 = vmul.f32 %v3301_v21, %v7136_v44  ;;  %v5178_v40 = vld [vmem:[%s7851_s10 + $0x30] sm:$0xff]  }
 0x5f6   :  { %v3312_v4 = vmul.f32 %v3301_v21, %v7143_v53  ;;  %v3313_v63 = vmul.f32 %v3301_v21, %v7152_v33  ;;  %v3314_v51 = vmul.f32 %v3301_v21, %v7159_v32  ;;  %v3315_v46 = vmul.f32 %v3301_v21, %v7168_v59 }
 0x5f7   :  { %v3316_v56 = vmul.f32 %v3301_v21, %v7175_v27  ;;  %v3317_v13 = vmul.f32 %v3301_v21, %v7184_v6  ;;  %v3304_v0 = vmul.f32 %v3301_v21, %v7053_v55  ;;  %v3305_v24 = vmul.f32 %v3301_v21, %v7066_v48 }
 0x5f8   :  { %v3318_v35 = vmul.f32 %v3301_v21, %v7191_v2  ;;  %v3323_v44 = vrot.slane %v3296_v5, %v5960_v58  ;;  %v5173_v2 = vld [vmem:[%s7851_s10 + $0x60] sm:$0xff]  }
 0x5f9   :  { %4880 = vmatprep.subr.bf16.mxu1 %v5173_v2  ;;  %v3373_v21 = vld [vmem:[#allocation2] sm:$0xff] }
 0x5fa   :  { %v3325_v53 = vadd.f32 %v3323_v44, %v3303_v62  ;;  %v3326_v14 = vadd.f32 %v3323_v44, %v3304_v0  ;;  %v3327_v33 = vadd.f32 %v3323_v44, %v3305_v24  ;;  %v3328_v20 = vadd.f32 %v3323_v44, %v3306_v26  ;;  %4881 = vmatpush3.bf16.msra.mxu1 %v5174_v12  ;;  %v3469_v26 = vld [vmem:[#allocation2 + $0x2] sm:$0xff] }
 0x5fb   :  { %v3329_v50 = vadd.f32 %v3323_v44, %v3307_v38  ;;  %v3330_v32 = vadd.f32 %v3323_v44, %v3308_v25  ;;  %v3331_v28 = vadd.f32 %v3323_v44, %v3309_v3  ;;  %v3332_v59 = vadd.f32 %v3323_v44, %v3310_v43  ;;  %4882 = vmatprep.subr.bf16.mxu1 %v5175_v41 }
 0x5fc   :  { %v3333_v22 = vadd.f32 %v3323_v44, %v3311_v7  ;;  %v3334_v27 = vadd.f32 %v3323_v44, %v3312_v4  ;;  %v3335_v16 = vadd.f32 %v3323_v44, %v3313_v63  ;;  %v3336_v6 = vadd.f32 %v3323_v44, %v3314_v51  ;;  %v3828_v4 = vld [vmem:[#allocation2 + $0x92] sm:$0xff] }
 0x5fd   :  { %v3337_v18 = vadd.f32 %v3323_v44, %v3315_v46  ;;  %v3338_v55 = vadd.f32 %v3323_v44, %v3316_v56  ;;  %v3339_v11 = vadd.f32 %v3323_v44, %v3317_v13  ;;  %v3340_v48 = vadd.f32 %v3323_v44, %v3318_v35 }
 0x5fe   :  { %v3341_v54 = vmax.f32 %v3325_v53, 0.0  ;;  %v3342_v8 = vmax.f32 %v3326_v14, 0.0  ;;  %v3343_v57 = vmax.f32 %v3327_v33, 0.0  ;;  %v3344_v34 = vmax.f32 %v3328_v20, 0.0  ;;  %4883 = vmatpush3.bf16.msra.mxu1 %v5176_v17 }
 0x5ff   :  { %v3345_v15 = vmax.f32 %v3329_v50, 0.0  ;;  %v3346_v29 = vmax.f32 %v3330_v32, 0.0  ;;  %v3347_v37 = vmax.f32 %v3331_v28, 0.0  ;;  %v3348_v1 = vmax.f32 %v3332_v59, 0.0  ;;  %4884 = vmatprep.subr.bf16.mxu1 %v5177_v23 }
 0x600   :  { %v3349_v60 = vmax.f32 %v3333_v22, 0.0  ;;  %v3350_v19 = vmax.f32 %v3334_v27, 0.0  ;;  %v3351_v31 = vmax.f32 %v3335_v16, 0.0  ;;  %v3352_v52 = vmax.f32 %v3336_v6, 0.0  ;;  %3357 = vst.msk [vmem:[#allocation2 + $0x11] sm:$0xff] %vm53_vm0, %v3341_v54  ;;  %3358 = vst.msk [vmem:[#allocation2 + $0x21] sm:$0xff] %vm53_vm0, %v3342_v8 }
 0x601   :  { %3359 = vst.msk [vmem:[#allocation2 + $0x31] sm:$0xff] %vm53_vm0, %v3343_v57  ;;  %3360 = vst.msk [vmem:[#allocation2 + $0x41] sm:$0xff] %vm53_vm0, %v3344_v34  ;;  %v3353_v42 = vmax.f32 %v3337_v18, 0.0  ;;  %v3354_v9 = vmax.f32 %v3338_v55, 0.0  ;;  %v3355_v36 = vmax.f32 %v3339_v11, 0.0  ;;  %v3356_v45 = vmax.f32 %v3340_v48, 0.0 }
 0x602   :  { %3361 = vst.msk [vmem:[#allocation2 + $0x51] sm:$0xff] %vm53_vm0, %v3345_v15  ;;  %3362 = vst.msk [vmem:[#allocation2 + $0x61] sm:$0xff] %vm53_vm0, %v3346_v29  ;;  %4885 = vmatpush3.bf16.msra.mxu1 %v5178_v40  ;;  %v3836_v6 = vld [vmem:[#allocation2 + $0x132] sm:$0xff] }
 0x603   :  { %3363 = vst.msk [vmem:[#allocation2 + $0x71] sm:$0xff] %vm53_vm0, %v3347_v37  ;;  %3364 = vst.msk [vmem:[#allocation2 + $0x81] sm:$0xff] %vm53_vm0, %v3348_v1 }
 0x604   :  { %3365 = vst.msk [vmem:[#allocation2 + $0xb1] sm:$0xff] %vm53_vm0, %v3349_v60  ;;  %3366 = vst.msk [vmem:[#allocation2 + $0xc1] sm:$0xff] %vm53_vm0, %v3350_v19 }
 0x605   :  { %3367 = vst.msk [vmem:[#allocation2 + $0xd1] sm:$0xff] %vm53_vm0, %v3351_v31  ;;  %3368 = vst.msk [vmem:[#allocation2 + $0xe1] sm:$0xff] %vm53_vm0, %v3352_v52 }
 0x606   :  { %3369 = vst.msk [vmem:[#allocation2 + $0xf1] sm:$0xff] %vm53_vm0, %v3353_v42  ;;  %3370 = vst.msk [vmem:[#allocation2 + $0x101] sm:$0xff] %vm53_vm0, %v3354_v9 }
 0x607   :  { %3371 = vst.msk [vmem:[#allocation2 + $0x111] sm:$0xff] %vm53_vm0, %v3355_v36  ;;  %3372 = vst.msk [vmem:[#allocation2 + $0x121] sm:$0xff] %vm53_vm0, %v3356_v45  ;;  %v3629_v61 = vld [vmem:[#allocation2 + $0x12] sm:$0xff]  ;;  %v3630_v5 = vld [vmem:[#allocation2 + $0x22] sm:$0xff] }
 0x608   :  { %v3406_v62 = vld [vmem:[#allocation2 + $0x11] sm:$0xff]  ;;  %v3645_v38 = vpack.c.bf16 %v3630_v5, %v3629_v61  ;;  %v7281_v3 = vld [vmem:[#allocation2 + $0x20] sm:$0xff]  ;;  %v3485_v32 = vpack.c.bf16 %v3629_v61, %v3469_v26 }
 0x609   :  { %v3421_v25 = vpack.c.bf16 %v3406_v62, %v3405_v47  ;;  %v7283_v43 = vld [vmem:[#allocation2 + $0x30] sm:$0xff]  ;;  %v3757_v46 = vld [vmem:[#allocation2 + $0x21] sm:$0xff] }
 0x60a   :  { %v7285_v7 = vld [vmem:[#allocation2 + $0x32] sm:$0xff]  ;;  %v3709_v63 = vpack.c.bf16 %v7283_v43, %v7281_v3  ;;  %3661 = vrot.lane.b32.xlu0 %v3645_v38, %s5197_s0  ;;  %v7294_v0 = vld [vmem:[#allocation2 + $0x42] sm:$0xff]  ;;  %v3613_v44 = vpack.c.bf16 %v3757_v46, %v3406_v62 }
 0x60b   :  { %v7290_v51 = vpack.c.bf16 %v7285_v7, %v3630_v5  ;;  %v3758_v56 = vld [vmem:[#allocation2 + $0x31] sm:$0xff]  ;;  %3437 = vrot.lane.b32.xlu1 %v3421_v25, %s5197_s0  ;;  %v7298_v35 = vld [vmem:[#allocation2 + $0x62] sm:$0xff] }
 0x60c   :  { %v3533_v13 = vld [vmem:[#allocation2 + $0x10] sm:$0xff]  ;;  %v7308_v33 = vld [vmem:[#allocation2 + $0x40] sm:$0xff]  ;;  %3398 = vst.msk [vmem:[#allocation3 + $0x18] sm:$0xff] %vm53_vm0, %v3709_v63  ;;  %3621 = vst.msk [vmem:[#allocation3 + $0x8] sm:$0xff] %vm53_vm0, %v3613_v44  ;;  %v3773_v19 = vpack.c.bf16 %v3758_v56, %v3757_v46 }
 0x60d   :  { %v7296_v24 = vld [vmem:[#allocation2 + $0x52] sm:$0xff]  ;;  %3845 = vst.msk [vmem:[#allocation3 + $0x10] sm:$0xff] %vm53_vm0, %v7290_v51  ;;  %v3389_v50 = vpack.c.bf16 %v3533_v13, %v3373_v21  ;;  %v7321_v22 = vld [vmem:[#allocation2 + $0x82] sm:$0xff]  ;;  %v3549_v31 = vpack.c.bf16 %v7281_v3, %v3533_v13 }
 0x60e   :  { %v7304_v53 = vpack.c.bf16 %v7296_v24, %v7294_v0  ;;  %v7306_v14 = vld [vmem:[#allocation2 + $0x72] sm:$0xff]  ;;  %v7323_v27 = vld [vmem:[#allocation2 + $0xc2] sm:$0xff]  ;;  %v3840_v18 = vpack.c.bf16 %v3828_v4, %v7321_v22  ;;  %3725 = vrot.lane.b32.xlu0 %v3709_v63, %s5198_s22  ;;  %v3646_v4 = vpack.c.bf16 %v7294_v0, %v7285_v7 }
 0x60f   :  { %v7310_v20 = vld [vmem:[#allocation2 + $0x50] sm:$0xff]  ;;  %v7315_v28 = vpack.c.bf16 %v7306_v14, %v7298_v35  ;;  %v7335_v11 = vld [vmem:[#allocation2 + $0x41] sm:$0xff]  ;;  %3397 = vst.msk [vmem:[#allocation3] sm:$0xff] %vm53_vm0, %v3389_v50  ;;  %3501 = vrot.lane.b32.xlu1 %v3485_v32, %s5198_s22 }
 0x610   :  { %v7319_v59 = vpack.c.bf16 %v7310_v20, %v7308_v33  ;;  %v7325_v16 = vld [vmem:[#allocation2 + $0xd2] sm:$0xff]  ;;  %3846 = vst.msk [vmem:[#allocation3 + $0x28] sm:$0xff] %vm53_vm0, %v7304_v53  ;;  %v7339_v2 = vld [vmem:[#allocation2 + $0xe2] sm:$0xff]  ;;  %v3614_v57 = vpack.c.bf16 %v7335_v11, %v3758_v56  ;;  %3848 = vst.msk [vmem:[#allocation3 + $0x58] sm:$0xff] %vm53_vm0, %v3840_v18 }
 0x611   :  { %v7333_v55 = vpack.c.bf16 %v7325_v16, %v7323_v27  ;;  %v7337_v48 = vld [vmem:[#allocation2 + $0x51] sm:$0xff]  ;;  %3847 = vst.msk [vmem:[#allocation3 + $0x40] sm:$0xff] %vm53_vm0, %v7315_v28  ;;  %v7348_v54 = vld [vmem:[#allocation2 + $0x102] sm:$0xff] }
 0x612   :  { %v7346_v12 = vld [vmem:[#allocation2 + $0xf2] sm:$0xff]  ;;  %3399 = vst.msk [vmem:[#allocation3 + $0x30] sm:$0xff] %vm53_vm0, %v7319_v59  ;;  %v7366_v29 = vld [vmem:[#allocation2 + $0x60] sm:$0xff]  ;;  %3622 = vst.msk [vmem:[#allocation3 + $0x20] sm:$0xff] %vm53_vm0, %v3614_v57  ;;  %3789 = vrot.lane.b32.xlu0 %v3773_v19, %s5199_s23 }
 0x613   :  { %v7350_v8 = vld [vmem:[#allocation2 + $0x112] sm:$0xff]  ;;  %3849 = vst.msk [vmem:[#allocation3 + $0x70] sm:$0xff] %vm53_vm0, %v7333_v55  ;;  %v7360_v34 = vpack.c.bf16 %v7346_v12, %v7339_v2  ;;  %v7370_v1 = vld [vmem:[#allocation2 + $0x61] sm:$0xff]  ;;  %v3651_v60 = vpack.c.bf16 %v7348_v54, %v7346_v12  ;;  %3565 = vrot.lane.b32.xlu1 %v3549_v31, %s5199_s23 }
 0x614   :  { %v7364_v15 = vpack.c.bf16 %v7350_v8, %v7348_v54  ;;  %v7368_v37 = vld [vmem:[#allocation2 + $0x70] sm:$0xff]  ;;  %v7381_v9 = vld [vmem:[#allocation2 + $0x122] sm:$0xff]  ;;  %v3615_v36 = vpack.c.bf16 %v7370_v1, %v7337_v48 }
 0x615   :  { %v7377_v52 = vpack.c.bf16 %v7368_v37, %v7366_v29  ;;  %v7379_v42 = vld [vmem:[#allocation2 + $0x71] sm:$0xff]  ;;  %3850 = vst.msk [vmem:[#allocation3 + $0x88] sm:$0xff] %vm53_vm0, %v7360_v34  ;;  %v3844_v45 = vpack.c.bf16 %v3836_v6, %v7381_v9  ;;  %v7391_v41 = vld [vmem:[#allocation2 + $0x81] sm:$0xff]  ;;  %v3652_v38 = vpack.c.bf16 %v7381_v9, %v7350_v8 }
 0x616   :  { %3851 = vst.msk [vmem:[#allocation3 + $0xa0] sm:$0xff] %vm53_vm0, %v7364_v15  ;;  %v7393_v17 = vld [vmem:[#allocation2 + $0xb1] sm:$0xff]  ;;  %v3381_v47 = vld [vmem:[#allocation2 + $0xa0] sm:$0xff]  ;;  %3623 = vst.msk [vmem:[#allocation3 + $0x38] sm:$0xff] %vm53_vm0, %v3615_v36  ;;  %v3616_v25 = vpack.c.bf16 %v7391_v41, %v7379_v42  ;;  %3663 = vrot.lane.b32.xlu0 %v3646_v4, %s5197_s0 }
 0x617   :  { %v3855_v23 = vld [vmem:[#allocation3 + $0x10] sm:$0xff]  ;;  %v7397_v40 = vld [vmem:[#allocation2 + $0xc0] sm:$0xff]  ;;  %3400 = vst.msk [vmem:[#allocation3 + $0x48] sm:$0xff] %vm53_vm0, %v7377_v52  ;;  %3852 = vst.msk [vmem:[#allocation3 + $0xb8] sm:$0xff] %vm53_vm0, %v3844_v45  ;;  %3439 = vrot.lane.b32.xlu1 %v3773_v19, %s5197_s0 }
 0x618   :  { %v7399_v21 = vld [vmem:[#allocation2 + $0xd0] sm:$0xff]  ;;  %5064 = vmatprep.mubr.bf16.mxu0 %v3855_v23  ;;  %v7409_v5 = vld [vmem:[#allocation2 + $0xc1] sm:$0xff]  ;;  %3624 = vst.msk [vmem:[#allocation3 + $0x50] sm:$0xff] %vm53_vm0, %v3616_v25  ;;  %v5179_v23 = vld [vmem:[%s7851_s10 + $0x78] sm:$0xff]  }
 0x619   :  { %v7407_v61 = vpack.c.bf16 %v7399_v21, %v7397_v40  ;;  %v7411_v62 = vld [vmem:[#allocation2 + $0xd1] sm:$0xff]  ;;  %v3858_v3 = vld [vmem:[#allocation3 + $0x28] sm:$0xff]  ;;  %v7421_v63 = vld [vmem:[#allocation2 + $0xe0] sm:$0xff]  ;;  %v3617_v56 = vpack.c.bf16 %v7409_v5, %v7393_v17  ;;  %4886 = vmatprep.subr.bf16.mxu1 %v5179_v23 }
 0x61a   :  { %v7413_v26 = vld [vmem:[#allocation2 + $0xb0] sm:$0xff]  ;;  %5065 = vmatmul.mubr.bf16.vlgmr.msra.gmra.mrb[80].mxu0 %v3858_v3  ;;  %v3861_v44 = vld [vmem:[#allocation3 + $0x40] sm:$0xff]  ;;  %v5180_v25 = vld [vmem:[%s7851_s10 + $0x38] sm:$0xff]   ;;  %3727 = vrot.lane.b32.xlu0 %v7319_v59, %s5198_s22 }
 0x61b   :  { %v7423_v46 = vld [vmem:[#allocation2 + $0xf0] sm:$0xff]  ;;  %v3393_v13 = vpack.c.bf16 %v7413_v26, %v3381_v47  ;;  %v7432_v32 = vld [vmem:[#allocation2 + $0xe1] sm:$0xff]  ;;  %3402 = vst.msk [vmem:[#allocation3 + $0x78] sm:$0xff] %vm53_vm0, %v7407_v61  ;;  %5068 = vmatprep.mubr.bf16.mxu0 %v3861_v44  ;;  %3625 = vst.msk [vmem:[#allocation3 + $0x68] sm:$0xff] %vm53_vm0, %v3617_v56  ;;  %3503 = vrot.lane.b32.xlu1 %v7290_v51, %s5198_s22  ;;  %v3774_v56 = vpack.c.bf16 %v7337_v48, %v7335_v11 }
 0x61c   :  { %v7430_v50 = vpack.c.bf16 %v7423_v46, %v7421_v63  ;;  %v7434_v6 = vld [vmem:[#allocation2 + $0xf1] sm:$0xff]  ;;  %v7440_v7 = vld [vmem:[#allocation2 + $0x100] sm:$0xff]  ;;  %v3618_v0 = vpack.c.bf16 %v7432_v32, %v7411_v62  ;;  %4887 = vmatpush3.bf16.msra.mxu1 %v5180_v25  ;;  %v3647_v51 = vpack.c.bf16 %v7298_v35, %v7296_v24  ;;  %v3870_v11 = vld [vmem:[#allocation3 + $0x88] sm:$0xff]  ;;  %v3551_v24 = vpack.c.bf16 %v7366_v29, %v7310_v20 }
 0x61d   :  { %3401 = vst.msk [vmem:[#allocation3 + $0x60] sm:$0xff] %vm53_vm0, %v3393_v13  ;;  %v7447_v18 = vld [vmem:[#allocation2 + $0x110] sm:$0xff]  ;;  %v7449_v57 = vld [vmem:[#allocation2 + $0x101] sm:$0xff]  ;;  %v3555_v36 = vpack.c.bf16 %v7440_v7, %v7423_v46  ;;  %v3864_v4 = vld [vmem:[#allocation3 + $0x58] sm:$0xff]  ;;  %v3550_v13 = vpack.c.bf16 %v7308_v33, %v7283_v43  ;;  %v3775_v43 = vpack.c.bf16 %v7379_v42, %v7370_v1  ;;  %v3648_v33 = vpack.c.bf16 %v7321_v22, %v7306_v14 }
 0x61e   :  { %v7451_v31 = vld [vmem:[#allocation2 + $0x111] sm:$0xff]  ;;  %3403 = vst.msk [vmem:[#allocation3 + $0x90] sm:$0xff] %vm53_vm0, %v7430_v50  ;;  %v7459_v45 = vpack.c.bf16 %v7447_v18, %v7440_v7  ;;  %3626 = vst.msk [vmem:[#allocation3 + $0x80] sm:$0xff] %vm53_vm0, %v3618_v0  ;;  %v3619_v19 = vpack.c.bf16 %v7449_v57, %v7434_v6  ;;  %v7464_v47 = vld [vmem:[#allocation2 + $0x121] sm:$0xff]  ;;  %3791 = vrot.lane.b32.xlu0 %v3774_v56, %s5199_s23 }
 0x61f   :  { %v3620_v3 = vpack.c.bf16 %v7464_v47, %v7451_v31  ;;  %v3867_v59 = vld [vmem:[#allocation3 + $0x70] sm:$0xff]  ;;  %3567 = vrot.lane.b32.xlu1 %v3550_v13, %s5199_s23  ;;  %v3873_v48 = vld [vmem:[#allocation3 + $0xa0] sm:$0xff]  ;;  %v3876_v35 = vld [vmem:[#allocation3 + $0xb8] sm:$0xff] }
 0x620   :  { %3627 = vst.msk [vmem:[#allocation3 + $0x98] sm:$0xff] %vm53_vm0, %v3619_v19  ;;  %3404 = vst.msk [vmem:[#allocation3 + $0xa8] sm:$0xff] %vm53_vm0, %v7459_v45  ;;  %v3699_v44 = vld [vmem:[#allocation2 + $0x80] sm:$0xff]  ;;  %v3764_v1 = vld [vmem:[#allocation2 + $0x91] sm:$0xff] }
 0x621   :  { %3628 = vst.msk [vmem:[#allocation3 + $0xb0] sm:$0xff] %vm53_vm0, %v3620_v3  ;;  %v3776_v20 = vpack.c.bf16 %v3764_v1, %v7391_v41  ;;  %v3552_v29 = vpack.c.bf16 %v3699_v44, %v7368_v37  ;;  %v3637_v42 = vld [vmem:[#allocation2 + $0xb2] sm:$0xff]  ;;  %v3413_v14 = vld [vmem:[#allocation2 + $0xa1] sm:$0xff]  ;;  %v3777_v37 = vpack.c.bf16 %v7411_v62, %v7409_v5  ;;  %v3553_v41 = vpack.c.bf16 %v7397_v40, %v7413_v26 }
 0x622   :  { %5069 = vmatmul.mubr.bf16.gmra.mrb[84].mxu0 %v3864_v4  ;;  %3665 = vrot.lane.b32.xlu0 %v3647_v51, %s5197_s0  ;;  %v3649_v22 = vpack.c.bf16 %v7323_v27, %v3637_v42  ;;  %v3425_v0 = vpack.c.bf16 %v7393_v17, %v3413_v14  ;;  %v3477_v19 = vld [vmem:[#allocation2 + $0xa2] sm:$0xff]  ;;  %v3650_v27 = vpack.c.bf16 %v7339_v2, %v7325_v16  ;;  %v3708_v2 = vld [vmem:[#allocation2 + $0x130] sm:$0xff] }
 0x623   :  { %5072 = vmatprep.mubr.bf16.mxu0 %v3867_v59  ;;  %3441 = vrot.lane.b32.xlu1 %v3774_v56, %s5197_s0  ;;  %v3778_v17 = vpack.c.bf16 %v7434_v6, %v7432_v32  ;;  %v3554_v40 = vpack.c.bf16 %v7421_v63, %v7399_v21  ;;  %v3779_v16 = vpack.c.bf16 %v7451_v31, %v7449_v57  ;;  %v3772_v54 = vld [vmem:[#allocation2 + $0x131] sm:$0xff] }
 0x626   :  { %3729 = vrot.lane.b32.xlu0 %v7377_v52, %s5198_s22  ;;  %v3700_v52 = vld [vmem:[#allocation2 + $0x90] sm:$0xff] }
 0x627   :  { %3505 = vrot.lane.b32.xlu1 %v7304_v53, %s5198_s22  ;;  %v3712_v53 = vpack.c.bf16 %v3700_v52, %v3699_v44 }
 0x62a   :  { %5073 = vmatmul.mubr.bf16.gmra.mrb[88].mxu0 %v3870_v11  ;;  %3793 = vrot.lane.b32.xlu0 %v3775_v43, %s5199_s23 }
 0x62b   :  { %5076 = vmatprep.mubr.bf16.mxu0 %v3873_v48  ;;  %3569 = vrot.lane.b32.xlu1 %v3551_v24, %s5199_s23 }
 0x62e   :  { %3667 = vrot.lane.b32.xlu0 %v3648_v33, %s5197_s0 }
 0x62f   :  { %3443 = vrot.lane.b32.xlu1 %v3775_v43, %s5197_s0 }
 0x632   :  { %5077 = vmatmul.mubr.bf16.gmra.mrb[92].mxu0 %v3876_v35  ;;  %3731 = vrot.lane.b32.xlu0 %v3712_v53, %s5198_s22 }
 0x633   :  { %3507 = vrot.lane.b32.xlu1 %v7315_v28, %s5198_s22  ;;  %v3489_v28 = vpack.c.bf16 %v3637_v42, %v3477_v19 }
 0x636   :  { %3795 = vrot.lane.b32.xlu0 %v3776_v20, %s5199_s23 }
 0x637   :  { %3571 = vrot.lane.b32.xlu1 %v3552_v29, %s5199_s23 }
 0x63a   :  { %3669 = vrot.lane.b32.xlu0 %v3649_v22, %s5197_s0 }
 0x63b   :  { %3445 = vrot.lane.b32.xlu1 %v3425_v0, %s5197_s0 }
 0x63e   :  { %3733 = vrot.lane.b32.xlu0 %v7407_v61, %s5198_s22 }
 0x63f   :  { %3509 = vrot.lane.b32.xlu1 %v3489_v28, %s5198_s22 }
 0x642   :  { %3797 = vrot.lane.b32.xlu0 %v3777_v37, %s5199_s23 }
 0x643   :  { %3573 = vrot.lane.b32.xlu1 %v3553_v41, %s5199_s23 }
 0x646   :  { %3671 = vrot.lane.b32.xlu0 %v3650_v27, %s5197_s0 }
 0x647   :  { %3447 = vrot.lane.b32.xlu1 %v3777_v37, %s5197_s0 }
 0x64a   :  { %3735 = vrot.lane.b32.xlu0 %v7430_v50, %s5198_s22 }
 0x64b   :  { %3511 = vrot.lane.b32.xlu1 %v7333_v55, %s5198_s22  ;;  %v3707_v55 = vld [vmem:[#allocation2 + $0x120] sm:$0xff] }
 0x64c   :  { %v3716_v12 = vpack.c.bf16 %v3708_v2, %v3707_v55 }
 0x64e   :  { %3799 = vrot.lane.b32.xlu0 %v3778_v17, %s5199_s23 }
 0x64f   :  { %3575 = vrot.lane.b32.xlu1 %v3554_v40, %s5199_s23 }
 0x652   :  { %3673 = vrot.lane.b32.xlu0 %v3651_v60, %s5197_s0  ;;  %v3556_v60 = vpack.c.bf16 %v3707_v55, %v7447_v18 }
 0x653   :  { %3449 = vrot.lane.b32.xlu1 %v3778_v17, %s5197_s0 }
 0x656   :  { %3737 = vrot.lane.b32.xlu0 %v7459_v45, %s5198_s22 }
 0x657   :  { %3513 = vrot.lane.b32.xlu1 %v7360_v34, %s5198_s22  ;;  %v3780_v34 = vpack.c.bf16 %v3772_v54, %v7464_v47 }
 0x65a   :  { %3801 = vrot.lane.b32.xlu0 %v3779_v16, %s5199_s23 }
 0x65b   :  { %3577 = vrot.lane.b32.xlu1 %v3555_v36, %s5199_s23 }
 0x65e   :  { %3675 = vrot.lane.b32.xlu0 %v3652_v38, %s5197_s0 }
 0x65f   :  { %3451 = vrot.lane.b32.xlu1 %v3779_v16, %s5197_s0 }
 0x662   :  { %3739 = vrot.lane.b32.xlu0 %v3716_v12, %s5198_s22 }
 0x663   :  { %3515 = vrot.lane.b32.xlu1 %v7364_v15, %s5198_s22 }
 0x666   :  { %3803 = vrot.lane.b32.xlu0 %v3780_v34, %s5199_s23 }
 0x667   :  { %3579 = vrot.lane.b32.xlu1 %v3556_v60, %s5199_s23 }
 0x67c   :  { %v3662_v21 = vpop.permute.xlu0 %3661 }
 0x67d   :  { %v3438_v8 = vpop.permute.xlu1 %3437  ;;  %3685 = vst.msk [vmem:[#allocation3 + $0x8] sm:$0xff] %vm240_vm2, %v3662_v21 }
 0x67e   :  { %3461 = vst.msk [vmem:[#allocation3] sm:$0xff] %vm240_vm2, %v3438_v8 }
 0x680   :  { %v3726_v9 = vpop.permute.xlu0 %3725 }
 0x681   :  { %v3502_v61 = vpop.permute.xlu1 %3501  ;;  %3749 = vst.msk [vmem:[#allocation3 + $0x8] sm:$0xff] %vm305_vm3, %v3726_v9 }
 0x682   :  { %3525 = vst.msk [vmem:[#allocation3] sm:$0xff] %vm305_vm3, %v3502_v61 }
 0x684   :  { %v3790_v15 = vpop.permute.xlu0 %3789 }
 0x685   :  { %v3566_v5 = vpop.permute.xlu1 %3565  ;;  %3813 = vst.msk [vmem:[#allocation3 + $0x8] sm:$0xff] %vm370_vm4, %v3790_v15 }
 0x686   :  { %3589 = vst.msk [vmem:[#allocation3] sm:$0xff] %vm370_vm4, %v3566_v5 }
 0x688   :  { %v3664_v62 = vpop.permute.xlu0 %3663 }
 0x689   :  { %3686 = vst.msk [vmem:[#allocation3 + $0x20] sm:$0xff] %vm240_vm2, %v3664_v62  ;;  %v3440_v26 = vpop.permute.xlu1 %3439 }
 0x68a   :  { %3462 = vst.msk [vmem:[#allocation3 + $0x18] sm:$0xff] %vm240_vm2, %v3440_v26 }
 0x68c   :  { %v3728_v38 = vpop.permute.xlu0 %3727  ;;  %v3854_v63 = vld [vmem:[#allocation3 + $0x8] sm:$0xff] }
 0x68d   :  { %v3853_v46 = vld [vmem:[#allocation3] sm:$0xff]  ;;  %3750 = vst.msk [vmem:[#allocation3 + $0x20] sm:$0xff] %vm305_vm3, %v3728_v38  ;;  %v3504_v50 = vpop.permute.xlu1 %3503  ;;  %4101 = vmatprep.mubr.bf16.mxu1 %v3854_v63 }
 0x68e   :  { %3526 = vst.msk [vmem:[#allocation3 + $0x18] sm:$0xff] %vm305_vm3, %v3504_v50  ;;  %4102 = vmatmul.mubr.bf16.vlgmr.msra.gmra.mrb[64].mxu1 %v3853_v46 }
 0x690   :  { %v3792_v32 = vpop.permute.xlu0 %3791 }
 0x691   :  { %3814 = vst.msk [vmem:[#allocation3 + $0x20] sm:$0xff] %vm370_vm4, %v3792_v32  ;;  %v3568_v6 = vpop.permute.xlu1 %3567 }
 0x692   :  { %3590 = vst.msk [vmem:[#allocation3 + $0x18] sm:$0xff] %vm370_vm4, %v3568_v6 }
 0x694   :  { %v3666_v7 = vpop.permute.xlu0 %3665 }
 0x695   :  { %3687 = vst.msk [vmem:[#allocation3 + $0x38] sm:$0xff] %vm240_vm2, %v3666_v7  ;;  %v3442_v18 = vpop.permute.xlu1 %3441 }
 0x696   :  { %3463 = vst.msk [vmem:[#allocation3 + $0x30] sm:$0xff] %vm240_vm2, %v3442_v18 }
 0x698   :  { %v3730_v57 = vpop.permute.xlu0 %3729  ;;  %v3857_v31 = vld [vmem:[#allocation3 + $0x20] sm:$0xff] }
 0x699   :  { %3751 = vst.msk [vmem:[#allocation3 + $0x38] sm:$0xff] %vm305_vm3, %v3730_v57  ;;  %v3506_v36 = vpop.permute.xlu1 %3505  ;;  %4109 = vmatprep.mubr.bf16.mxu1 %v3857_v31  ;;  %v3856_v45 = vld [vmem:[#allocation3 + $0x18] sm:$0xff] }
 0x69a   :  { %3527 = vst.msk [vmem:[#allocation3 + $0x30] sm:$0xff] %vm305_vm3, %v3506_v36  ;;  %4110 = vmatmul.mubr.bf16.gmra.mrb[68].mxu1 %v3856_v45 }
 0x69c   :  { %v3794_v47 = vpop.permute.xlu0 %3793 }
 0x69d   :  { %3815 = vst.msk [vmem:[#allocation3 + $0x38] sm:$0xff] %vm370_vm4, %v3794_v47  ;;  %v3570_v23 = vpop.permute.xlu1 %3569 }
 0x69e   :  { %3591 = vst.msk [vmem:[#allocation3 + $0x30] sm:$0xff] %vm370_vm4, %v3570_v23 }
 0x6a0   :  { %v3668_v25 = vpop.permute.xlu0 %3667 }
 0x6a1   :  { %3688 = vst.msk [vmem:[#allocation3 + $0x50] sm:$0xff] %vm240_vm2, %v3668_v25  ;;  %v3444_v3 = vpop.permute.xlu1 %3443 }
 0x6a2   :  { %3464 = vst.msk [vmem:[#allocation3 + $0x48] sm:$0xff] %vm240_vm2, %v3444_v3 }
 0x6a4   :  { %v3732_v4 = vpop.permute.xlu0 %3731  ;;  %v3860_v56 = vld [vmem:[#allocation3 + $0x38] sm:$0xff] }
 0x6a5   :  { %3752 = vst.msk [vmem:[#allocation3 + $0x50] sm:$0xff] %vm305_vm3, %v3732_v4  ;;  %v3508_v59 = vpop.permute.xlu1 %3507  ;;  %4117 = vmatprep.mubr.bf16.mxu1 %v3860_v56  ;;  %v3859_v13 = vld [vmem:[#allocation3 + $0x30] sm:$0xff] }
 0x6a6   :  { %3528 = vst.msk [vmem:[#allocation3 + $0x48] sm:$0xff] %vm305_vm3, %v3508_v59  ;;  %4118 = vmatmul.mubr.bf16.gmra.mrb[72].mxu1 %v3859_v13 }
 0x6a8   :  { %v3796_v51 = vpop.permute.xlu0 %3795 }
 0x6a9   :  { %3816 = vst.msk [vmem:[#allocation3 + $0x50] sm:$0xff] %vm370_vm4, %v3796_v51  ;;  %v3572_v11 = vpop.permute.xlu1 %3571 }
 0x6aa   :  { %3592 = vst.msk [vmem:[#allocation3 + $0x48] sm:$0xff] %vm370_vm4, %v3572_v11 }
 0x6ac   :  { %v3670_v48 = vpop.permute.xlu0 %3669 }
 0x6ad   :  { %3689 = vst.msk [vmem:[#allocation3 + $0x68] sm:$0xff] %vm240_vm2, %v3670_v48  ;;  %v3446_v43 = vpop.permute.xlu1 %3445 }
 0x6ae   :  { %3465 = vst.msk [vmem:[#allocation3 + $0x60] sm:$0xff] %vm240_vm2, %v3446_v43 }
 0x6b0   :  { %v3734_v24 = vpop.permute.xlu0 %3733  ;;  %v3863_v35 = vld [vmem:[#allocation3 + $0x50] sm:$0xff] }
 0x6b1   :  { %3753 = vst.msk [vmem:[#allocation3 + $0x68] sm:$0xff] %vm305_vm3, %v3734_v24  ;;  %v3510_v33 = vpop.permute.xlu1 %3509  ;;  %4125 = vmatprep.mubr.bf16.mxu1 %v3863_v35  ;;  %v3862_v44 = vld [vmem:[#allocation3 + $0x48] sm:$0xff] }
 0x6b2   :  { %3529 = vst.msk [vmem:[#allocation3 + $0x60] sm:$0xff] %vm305_vm3, %v3510_v33  ;;  %4126 = vmatmul.mubr.bf16.gmra.mrb[76].mxu1 %v3862_v44 }
 0x6b4   :  { %v3798_v52 = vpop.permute.xlu0 %3797 }
 0x6b5   :  { %3817 = vst.msk [vmem:[#allocation3 + $0x68] sm:$0xff] %vm370_vm4, %v3798_v52  ;;  %v3574_v53 = vpop.permute.xlu1 %3573 }
 0x6b6   :  { %3593 = vst.msk [vmem:[#allocation3 + $0x60] sm:$0xff] %vm370_vm4, %v3574_v53 }
 0x6b8   :  { %v3672_v1 = vpop.permute.xlu0 %3671 }
 0x6b9   :  { %3690 = vst.msk [vmem:[#allocation3 + $0x80] sm:$0xff] %vm240_vm2, %v3672_v1  ;;  %v3448_v20 = vpop.permute.xlu1 %3447 }
 0x6ba   :  { %3466 = vst.msk [vmem:[#allocation3 + $0x78] sm:$0xff] %vm240_vm2, %v3448_v20 }
 0x6bc   :  { %v3736_v29 = vpop.permute.xlu0 %3735  ;;  %v3866_v42 = vld [vmem:[#allocation3 + $0x68] sm:$0xff] }
 0x6bd   :  { %3754 = vst.msk [vmem:[#allocation3 + $0x80] sm:$0xff] %vm305_vm3, %v3736_v29  ;;  %v3512_v14 = vpop.permute.xlu1 %3511  ;;  %4133 = vmatprep.mubr.bf16.mxu1 %v3866_v42  ;;  %v3865_v22 = vld [vmem:[#allocation3 + $0x60] sm:$0xff] }
 0x6be   :  { %3530 = vst.msk [vmem:[#allocation3 + $0x78] sm:$0xff] %vm305_vm3, %v3512_v14  ;;  %4134 = vmatmul.mubr.bf16.gmra.mrb[80].mxu1 %v3865_v22 }
 0x6c0   :  { %v3800_v0 = vpop.permute.xlu0 %3799 }
 0x6c1   :  { %3818 = vst.msk [vmem:[#allocation3 + $0x80] sm:$0xff] %vm370_vm4, %v3800_v0  ;;  %v3576_v19 = vpop.permute.xlu1 %3575 }
 0x6c2   :  { %3594 = vst.msk [vmem:[#allocation3 + $0x78] sm:$0xff] %vm370_vm4, %v3576_v19 }
 0x6c4   :  { %v3674_v28 = vpop.permute.xlu0 %3673 }
 0x6c5   :  { %3691 = vst.msk [vmem:[#allocation3 + $0x98] sm:$0xff] %vm240_vm2, %v3674_v28  ;;  %v3450_v37 = vpop.permute.xlu1 %3449 }
 0x6c6   :  { %3467 = vst.msk [vmem:[#allocation3 + $0x90] sm:$0xff] %vm240_vm2, %v3450_v37 }
 0x6c8   :  { %v3738_v41 = vpop.permute.xlu0 %3737  ;;  %v3869_v27 = vld [vmem:[#allocation3 + $0x80] sm:$0xff] }
 0x6c9   :  { %3755 = vst.msk [vmem:[#allocation3 + $0x98] sm:$0xff] %vm305_vm3, %v3738_v41  ;;  %v3514_v17 = vpop.permute.xlu1 %3513  ;;  %4141 = vmatprep.mubr.bf16.mxu1 %v3869_v27  ;;  %v3868_v40 = vld [vmem:[#allocation3 + $0x78] sm:$0xff] }
 0x6ca   :  { %3531 = vst.msk [vmem:[#allocation3 + $0x90] sm:$0xff] %vm305_vm3, %v3514_v17  ;;  %4142 = vmatmul.mubr.bf16.gmra.mrb[84].mxu1 %v3868_v40 }
 0x6cc   :  { %v3802_v16 = vpop.permute.xlu0 %3801 }
 0x6cd   :  { %3819 = vst.msk [vmem:[#allocation3 + $0x98] sm:$0xff] %vm370_vm4, %v3802_v16  ;;  %v3578_v55 = vpop.permute.xlu1 %3577 }
 0x6ce   :  { %3595 = vst.msk [vmem:[#allocation3 + $0x90] sm:$0xff] %vm370_vm4, %v3578_v55 }
 0x6d0   :  { %v3676_v2 = vpop.permute.xlu0 %3675 }
 0x6d1   :  { %3692 = vst.msk [vmem:[#allocation3 + $0xb0] sm:$0xff] %vm240_vm2, %v3676_v2  ;;  %v3452_v12 = vpop.permute.xlu1 %3451 }
 0x6d2   :  { %3468 = vst.msk [vmem:[#allocation3 + $0xa8] sm:$0xff] %vm240_vm2, %v3452_v12 }
 0x6d4   :  { %v3740_v54 = vpop.permute.xlu0 %3739  ;;  %v3872_v34 = vld [vmem:[#allocation3 + $0x98] sm:$0xff] }
 0x6d5   :  { %3756 = vst.msk [vmem:[#allocation3 + $0xb0] sm:$0xff] %vm305_vm3, %v3740_v54  ;;  %v3516_v60 = vpop.permute.xlu1 %3515  ;;  %4149 = vmatprep.mubr.bf16.mxu1 %v3872_v34  ;;  %v3871_v21 = vld [vmem:[#allocation3 + $0x90] sm:$0xff] }
 0x6d6   :  { %3532 = vst.msk [vmem:[#allocation3 + $0xa8] sm:$0xff] %vm305_vm3, %v3516_v60  ;;  %4150 = vmatmul.mubr.bf16.gmra.mrb[88].mxu1 %v3871_v21 }
 0x6d8   :  { %v3804_v8 = vpop.permute.xlu0 %3803 }
 0x6d9   :  { %3820 = vst.msk [vmem:[#allocation3 + $0xb0] sm:$0xff] %vm370_vm4, %v3804_v8  ;;  %v3580_v9 = vpop.permute.xlu1 %3579 }
 0x6da   :  { %3596 = vst.msk [vmem:[#allocation3 + $0xa8] sm:$0xff] %vm370_vm4, %v3580_v9 }
 0x6e0   :  { %v3875_v61 = vld [vmem:[#allocation3 + $0xb0] sm:$0xff] }
 0x6e1   :  { %4157 = vmatprep.mubr.bf16.mxu1 %v3875_v61  ;;  %v3874_v15 = vld [vmem:[#allocation3 + $0xa8] sm:$0xff] }
 0x6e2   :  { %4158 = vmatmul.mubr.bf16.gmra.mrb[92].mxu1 %v3874_v15 }
 0x6ed   :  { %v5066_v5 = vpop.f32.mrb[80].mxu0 }
 0x6ee   :  { %v4200_v62 = vpop.f32.mrb[81].mxu0 }
 0x6ef   :  { %v5067_v26 = vpop.f32.mrb[82].mxu0 }
 0x6f0   :  { %v4203_v38 = vpop.f32.mrb[83].mxu0 }
 0x6f5   :  { %v5070_v63 = vpop.f32.mrb[84].mxu0 }
 0x6f6   :  { %v4216_v46 = vpop.f32.mrb[85].mxu0 }
 0x6f7   :  { %v5071_v50 = vpop.f32.mrb[86].mxu0 }
 0x6f8   :  { %v4219_v32 = vpop.f32.mrb[87].mxu0 }
 0x6fd   :  { %v7616_v6 = vpop.f32.mrb[88].mxu0 }
 0x6fe   :  { %v7618_v7 = vpop.f32.mrb[89].mxu0 }
 0x6ff   :  { %v7620_v18 = vpop.f32.mrb[90].mxu0 }
 0x700   :  { %v7622_v57 = vpop.f32.mrb[91].mxu0 }
 0x705   :  { %v7624_v31 = vpop.f32.mrb[92].mxu0 }
 0x706   :  { %v7626_v36 = vpop.f32.mrb[93].mxu0 }
 0x707   :  { %v7628_v45 = vpop.f32.mrb[94].mxu0 }
 0x708   :  { %v7630_v47 = vpop.f32.mrb[95].mxu0 }
 0x761   :  { %v4888_v23 = vpop.f32.mrb[64].mxu1 }
 0x762   :  { %v4889_v25 = vpop.f32.mrb[65].mxu1 }
 0x763   :  { %v4890_v3 = vadd.f32 %v4889_v25, %v4888_v23  ;;  %v4891_v4 = vpop.f32.mrb[66].mxu1 }
 0x764   :  { %v4892_v56 = vpop.f32.mrb[67].mxu1 }
 0x765   :  { %v7632_v59 = vadd.f32 %v4890_v3, %v4200_v62  ;;  %v4893_v13 = vadd.f32 %v4892_v56, %v4891_v4 }
 0x767   :  { %v7634_v51 = vadd.f32 %v4893_v13, %v4203_v38  ;;  %v4303_v28 = vmul.f32 %v7632_v59, %v7632_v59  ;;  %v4265_v27 = vsel %vm53_vm0, %v7632_v59, 0.0 }
 0x769   :  { %v4304_v0 = vmul.f32 %v7634_v51, %v7634_v51  ;;  %v4266_v37 = vsel %vm53_vm0, %v7634_v51, 0.0  ;;  %v4319_v55 = vsel %vm53_vm0, %v4303_v28, 0.0 }
 0x76a   :  { %v4267_v16 = vadd.f32 %v4266_v37, %v4265_v27 }
 0x76b   :  { %v4320_v17 = vsel %vm53_vm0, %v4304_v0, 0.0 }
 0x76c   :  { %v4321_v34 = vadd.f32 %v4320_v17, %v4319_v55 }
 0x76d   :  { %v4894_v11 = vpop.f32.mrb[68].mxu1 }
 0x76e   :  { %v4895_v48 = vpop.f32.mrb[69].mxu1 }
 0x76f   :  { %v4896_v43 = vadd.f32 %v4895_v48, %v4894_v11  ;;  %v4897_v24 = vpop.f32.mrb[70].mxu1 }
 0x770   :  { %v4898_v35 = vpop.f32.mrb[71].mxu1 }
 0x771   :  { %v7636_v33 = vadd.f32 %v5066_v5, %v4896_v43  ;;  %v4899_v44 = vadd.f32 %v4898_v35, %v4897_v24 }
 0x773   :  { %v7638_v52 = vadd.f32 %v5067_v26, %v4899_v44  ;;  %v4305_v41 = vmul.f32 %v7636_v33, %v7636_v33  ;;  %v4268_v40 = vsel %vm53_vm0, %v7636_v33, 0.0 }
 0x774   :  { %v4269_v60 = vadd.f32 %v4268_v40, %v4267_v16 }
 0x775   :  { %v4322_v2 = vsel %vm53_vm0, %v4305_v41, 0.0  ;;  %v4306_v12 = vmul.f32 %v7638_v52, %v7638_v52  ;;  %v4270_v8 = vsel %vm53_vm0, %v7638_v52, 0.0 }
 0x776   :  { %v4323_v5 = vadd.f32 %v4322_v2, %v4321_v34  ;;  %v4271_v23 = vadd.f32 %v4270_v8, %v4269_v60  ;;  %v20_v34 = vstv %s7854_s14 }
 0x777   :  { %v4324_v26 = vsel %vm53_vm0, %v4306_v12, 0.0  ;;  %21 = vst [vmem:[#allocation4] sm:$0x1] %v20_v34 }
 0x778   :  { %v4325_v56 = vadd.f32 %v4324_v26, %v4323_v5 }
 0x779   :  { %v4900_v53 = vpop.f32.mrb[72].mxu1 }
 0x77a   :  { %v4901_v1 = vpop.f32.mrb[73].mxu1 }
 0x77b   :  { %v4902_v20 = vadd.f32 %v4901_v1, %v4900_v53  ;;  %v4903_v29 = vpop.f32.mrb[74].mxu1 }
 0x77c   :  { %v4904_v42 = vpop.f32.mrb[75].mxu1 }
 0x77d   :  { %v7640_v14 = vadd.f32 %v4902_v20, %v4216_v46  ;;  %v4905_v22 = vadd.f32 %v4904_v42, %v4903_v29 }
 0x77f   :  { %v7644_v19 = vadd.f32 %v4905_v22, %v4219_v32  ;;  %v4307_v9 = vmul.f32 %v7640_v14, %v7640_v14  ;;  %v4272_v38 = vsel %vm53_vm0, %v7640_v14, 0.0 }
 0x780   :  { %v4273_v13 = vadd.f32 %v4272_v38, %v4271_v23 }
 0x781   :  { %v4326_v25 = vsel %vm53_vm0, %v4307_v9, 0.0  ;;  %v4308_v3 = vmul.f32 %v7644_v19, %v7644_v19  ;;  %v4274_v11 = vsel %vm53_vm0, %v7644_v19, 0.0 }
 0x782   :  { %v4327_v43 = vadd.f32 %v4326_v25, %v4325_v56  ;;  %v4275_v35 = vadd.f32 %v4274_v11, %v4273_v13 }
 0x785   :  { %v4906_v54 = vpop.f32.mrb[76].mxu1 }
 0x786   :  { %v4907_v21 = vpop.f32.mrb[77].mxu1 }
 0x787   :  { %v4908_v61 = vadd.f32 %v4907_v21, %v4906_v54  ;;  %v4909_v15 = vpop.f32.mrb[78].mxu1 }
 0x788   :  { %v4910_v62 = vpop.f32.mrb[79].mxu1 }
 0x789   :  { %v7668_v46 = vadd.f32 %v5070_v63, %v4908_v61  ;;  %v4911_v32 = vadd.f32 %v4910_v62, %v4909_v15  ;;  %v4328_v63 = vsel %vm53_vm0, %v4308_v3, 0.0 }
 0x78a   :  { %v4329_v1 = vadd.f32 %v4328_v63, %v4327_v43 }
 0x78b   :  { %v7673_v4 = vadd.f32 %v5071_v50, %v4911_v32  ;;  %v4309_v48 = vmul.f32 %v7668_v46, %v7668_v46  ;;  %v4276_v24 = vsel %vm53_vm0, %v7668_v46, 0.0 }
 0x78c   :  { %v4277_v20 = vadd.f32 %v4276_v24, %v4275_v35 }
 0x78d   :  { %v4330_v44 = vsel %vm53_vm0, %v4309_v48, 0.0  ;;  %v4310_v50 = vmul.f32 %v7673_v4, %v7673_v4  ;;  %v4278_v42 = vsel %vm53_vm0, %v7673_v4, 0.0 }
 0x78e   :  { %v4331_v28 = vadd.f32 %v4330_v44, %v4329_v1  ;;  %v4279_v40 = vadd.f32 %v4278_v42, %v4277_v20 }
 0x78f   :  { %v4332_v41 = vsel %vm53_vm0, %v4310_v50, 0.0 }
 0x790   :  { %v4333_v12 = vadd.f32 %v4332_v41, %v4331_v28 }
 0x791   :  { %v4912_v53 = vpop.f32.mrb[80].mxu1 }
 0x792   :  { %v4913_v29 = vpop.f32.mrb[81].mxu1 }
 0x793   :  { %v4914_v22 = vadd.f32 %v4913_v29, %v4912_v53  ;;  %v4915_v0 = vpop.f32.mrb[82].mxu1 }
 0x794   :  { %v4916_v37 = vpop.f32.mrb[83].mxu1 }
 0x795   :  { %v7689_v27 = vadd.f32 %v4914_v22, %v7618_v7  ;;  %v4917_v17 = vadd.f32 %v4916_v37, %v4915_v0 }
 0x797   :  { %v4280_v16 = vsel %vm53_vm0, %v7689_v27, 0.0  ;;  %v4311_v55 = vmul.f32 %v7689_v27, %v7689_v27  ;;  %v7696_v2 = vadd.f32 %v4917_v17, %v7622_v57 }
 0x798   :  { %v4281_v54 = vadd.f32 %v4280_v16, %v4279_v40 }
 0x799   :  { %v4334_v7 = vsel %vm53_vm0, %v4311_v55, 0.0  ;;  %v4282_v60 = vsel %vm53_vm0, %v7696_v2, 0.0  ;;  %v4312_v21 = vmul.f32 %v7696_v2, %v7696_v2 }
 0x79a   :  { %v4335_v8 = vadd.f32 %v4334_v7, %v4333_v12  ;;  %v4283_v9 = vadd.f32 %v4282_v60, %v4281_v54 }
 0x79b   :  { %v4336_v57 = vsel %vm53_vm0, %v4312_v21, 0.0 }
 0x79c   :  { %v4337_v61 = vadd.f32 %v4336_v57, %v4335_v8 }
 0x79d   :  { %v4918_v15 = vpop.f32.mrb[84].mxu1 }
 0x79e   :  { %v4919_v5 = vpop.f32.mrb[85].mxu1 }
 0x79f   :  { %v4920_v62 = vadd.f32 %v4919_v5, %v4918_v15  ;;  %v4921_v26 = vpop.f32.mrb[86].mxu1 }
 0x7a0   :  { %v4922_v38 = vpop.f32.mrb[87].mxu1 }
 0x7a1   :  { %v7708_v32 = vadd.f32 %v7616_v6, %v4920_v62  ;;  %v4923_v23 = vadd.f32 %v4922_v38, %v4921_v26 }
 0x7a3   :  { %v4284_v25 = vsel %vm53_vm0, %v7708_v32, 0.0  ;;  %v4313_v3 = vmul.f32 %v7708_v32, %v7708_v32  ;;  %v7715_v56 = vadd.f32 %v7620_v18, %v4923_v23 }
 0x7a4   :  { %v4285_v13 = vadd.f32 %v4284_v25, %v4283_v9 }
 0x7a5   :  { %v4338_v11 = vsel %vm53_vm0, %v4313_v3, 0.0  ;;  %v4286_v48 = vsel %vm53_vm0, %v7715_v56, 0.0  ;;  %v4314_v6 = vmul.f32 %v7715_v56, %v7715_v56 }
 0x7a6   :  { %v4339_v43 = vadd.f32 %v4338_v11, %v4337_v61  ;;  %v4287_v63 = vadd.f32 %v4286_v48, %v4285_v13 }
 0x7a7   :  { %v4340_v24 = vsel %vm53_vm0, %v4314_v6, 0.0 }
 0x7a8   :  { %v4341_v35 = vadd.f32 %v4340_v24, %v4339_v43 }
 0x7a9   :  { %v4924_v44 = vpop.f32.mrb[88].mxu1 }
 0x7aa   :  { %v4925_v50 = vpop.f32.mrb[89].mxu1 }
 0x7ab   :  { %v4926_v53 = vadd.f32 %v4925_v50, %v4924_v44  ;;  %v4927_v1 = vpop.f32.mrb[90].mxu1 }
 0x7ac   :  { %v4928_v18 = vpop.f32.mrb[91].mxu1 }
 0x7ad   :  { %v7724_v20 = vadd.f32 %v4926_v53, %v7626_v36  ;;  %v4929_v29 = vadd.f32 %v4928_v18, %v4927_v1 }
 0x7af   :  { %v4288_v42 = vsel %vm53_vm0, %v7724_v20, 0.0  ;;  %v4315_v22 = vmul.f32 %v7724_v20, %v7724_v20  ;;  %v7731_v0 = vadd.f32 %v4929_v29, %v7630_v47 }
 0x7b0   :  { %v4289_v28 = vadd.f32 %v4288_v42, %v4287_v63  ;;  %v4263_v42 = vld [vmem:[%s7855_s11] sm:$0x1] }
 0x7b1   :  { %v4342_v37 = vsel %vm53_vm0, %v4315_v22, 0.0  ;;  %v4290_v41 = vsel %vm53_vm0, %v7731_v0, 0.0  ;;  %v4316_v36 = vmul.f32 %v7731_v0, %v7731_v0 }
 0x7b2   :  { %v4343_v17 = vadd.f32 %v4342_v37, %v4341_v35  ;;  %v4291_v40 = vadd.f32 %v4290_v41, %v4289_v28  ;;  %v4264_v37 = vld [vmem:[%s7856_s12] sm:$0x1] }
 0x7b3   :  { %v4344_v16 = vsel %vm53_vm0, %v4316_v36, 0.0 }
 0x7b4   :  { %v4345_v55 = vadd.f32 %v4344_v16, %v4343_v17 }
 0x7b5   :  { %v4930_v12 = vpop.f32.mrb[92].mxu1 }
 0x7b6   :  { %v4931_v54 = vpop.f32.mrb[93].mxu1 }
 0x7b7   :  { %v4932_v34 = vadd.f32 %v4931_v54, %v4930_v12  ;;  %v4933_v7 = vpop.f32.mrb[94].mxu1 }
 0x7b8   :  { %v4934_v47 = vpop.f32.mrb[95].mxu1 }
 0x7b9   :  { %v4257_v60 = vadd.f32 %v7624_v31, %v4932_v34  ;;  %v4935_v21 = vadd.f32 %v4934_v47, %v4933_v7 }
 0x7bb   :  { %v4292_v8 = vsel %vm53_vm0, %v4257_v60, 0.0  ;;  %v4317_v9 = vmul.f32 %v4257_v60, %v4257_v60  ;;  %v4260_v57 = vadd.f32 %v7628_v45, %v4935_v21 }
 0x7bc   :  { %v4293_v61 = vadd.f32 %v4292_v8, %v4291_v40 }
 0x7bd   :  { %v4346_v15 = vsel %vm53_vm0, %v4317_v9, 0.0  ;;  %v4294_v5 = vsel %vm53_vm0, %v4260_v57, 0.0  ;;  %v4318_v62 = vmul.f32 %v4260_v57, %v4260_v57 }
 0x7be   :  { %v4347_v26 = vadd.f32 %v4346_v15, %v4345_v55  ;;  %v4295_v38 = vadd.f32 %v4294_v5, %v4293_v61 }
 0x7bf   :  { %v4348_v23 = vsel %vm53_vm0, %v4318_v62, 0.0 }
 0x7c0   :  { %v4296_v25 = vrot.slane %v4295_v38, 4  ;;  %v4349_v3 = vadd.f32 %v4348_v23, %v4347_v26 }
 0x7c2   :  { %v4297_v13 = vadd.f32 %v4296_v25, %v4295_v38  ;;  %v4350_v31 = vrot.slane %v4349_v3, 4 }
 0x7c4   :  { %v4298_v11 = vrot.slane %v4297_v13, 2  ;;  %v4351_v48 = vadd.f32 %v4350_v31, %v4349_v3 }
 0x7c6   :  { %v4299_v6 = vadd.f32 %v4298_v11, %v4297_v13  ;;  %v4352_v43 = vrot.slane %v4351_v48, 2  ;;  %v7919_v13 = vmax.f32 %v6559_v30, 0.0  ;;  %v7920_v11 = vmax.f32 %v6657_v49, 0.0  ;;  %v4440_v30 = vld [vmem:[%s7857_s13] sm:$0xff]  ;;  %v4441_v49 = vld [vmem:[%s7857_s13 + $0x8] sm:$0xff] }
 0x7c8   :  { %v4300_v63 = vrot.slane %v4299_v6, 1  ;;  %v4353_v45 = vadd.f32 %v4352_v43, %v4351_v48 }
 0x7ca   :  { %v4301_v24 = vadd.f32 %v4300_v63, %v4299_v6  ;;  %v4354_v35 = vrot.slane %v4353_v45, 1  ;;  %v7921_v6 = vld [vmem:[#allocation11_spill] sm:$0xff] }
 0x7cb   :  { %v7922_v43 = vmax.f32 %v7921_v6, 0.0 }
 0x7cc   :  { %v4302_v44 = vmul.f32 0.0078125, %v4301_v24  ;;  %v4355_v50 = vadd.f32 %v4354_v35, %v4353_v45  ;;  %v7923_v45 = vld [vmem:[#allocation16_spill] sm:$0xff] }
 0x7cd   :  { %v7924_v24 = vmax.f32 %v7923_v45, 0.0 }
 0x7ce   :  { %v4356_v53 = vmul.f32 0.0078125, %v4355_v50  ;;  %v4357_v1 = vmul.f32 %v4302_v44, %v4302_v44 }
 0x7d0   :  { %v4358_v18 = vsub.f32 %v4356_v53, %v4357_v1 }
 0x7d2   :  { %v4359_v29 = vadd.f32 1e-05, %v4358_v18  ;;  %v7927_v18 = vld [vmem:[#allocation12_spill] sm:$0xff] }
 0x7d4   :  { %5187 = vrsqrt.f32 %v4359_v29 }
 0x7de   :  { %v5188_v22 = vpop.eup %5187 }
 0x7df   :  { %v4361_v28 = vmul.f32 %v5188_v22, %v4263_v42  ;;  %v7929_v22 = vld [vmem:[#allocation18_spill] sm:$0xff] }
 0x7e1   :  { %v4362_v41 = vmul.f32 %v4361_v28, %v4302_v44  ;;  %v4368_v36 = vrot.slane %v4361_v28, %v5960_v58  ;;  %v7925_v44 = vld [vmem:[#allocation17_spill] sm:$0xff]  ;;  %v7930_v28 = vmax.f32 %v7929_v22, 0.0 }
 0x7e2   :  { %v7926_v50 = vmax.f32 %v7925_v44, 0.0 }
 0x7e3   :  { %v4363_v17 = vsub.f32 %v4264_v37, %v4362_v41  ;;  %v4377_v40 = vmul.f32 %v4368_v36, %v7673_v4  ;;  %v4385_v16 = vmul.f32 %v4368_v36, %v4260_v57  ;;  %v4370_v55 = vmul.f32 %v4368_v36, %v7632_v59 }
 0x7e4   :  { %v4371_v12 = vmul.f32 %v4368_v36, %v7634_v51  ;;  %v4372_v54 = vmul.f32 %v4368_v36, %v7636_v33  ;;  %v4373_v34 = vmul.f32 %v4368_v36, %v7638_v52  ;;  %v4374_v7 = vmul.f32 %v4368_v36, %v7640_v14 }
 0x7e5   :  { %v4390_v47 = vrot.slane %v4363_v17, %v5960_v58  ;;  %v4375_v21 = vmul.f32 %v4368_v36, %v7644_v19  ;;  %v4376_v8 = vmul.f32 %v4368_v36, %v7668_v46  ;;  %v4378_v9 = vmul.f32 %v4368_v36, %v7689_v27  ;;  %v4442_v17 = vld [vmem:[%s7857_s13 + $0x10] sm:$0xff] }
 0x7e6   :  { %v4379_v4 = vmul.f32 %v4368_v36, %v7696_v2  ;;  %v4380_v59 = vmul.f32 %v4368_v36, %v7708_v32  ;;  %v4381_v51 = vmul.f32 %v4368_v36, %v7715_v56  ;;  %v4382_v33 = vmul.f32 %v4368_v36, %v7724_v20 }
 0x7e7   :  { %v4399_v57 = vadd.f32 %v4390_v47, %v4377_v40  ;;  %v4407_v52 = vadd.f32 %v4390_v47, %v4385_v16  ;;  %v4383_v14 = vmul.f32 %v4368_v36, %v7731_v0  ;;  %v4384_v61 = vmul.f32 %v4368_v36, %v4257_v60  ;;  %v7931_v40 = vld [vmem:[#allocation15_spill] sm:$0xff] }
 0x7e8   :  { %v4392_v58 = vadd.f32 %v4390_v47, %v4370_v55  ;;  %v4393_v15 = vadd.f32 %v4390_v47, %v4371_v12  ;;  %v4394_v19 = vadd.f32 %v4390_v47, %v4372_v54  ;;  %v4395_v5 = vadd.f32 %v4390_v47, %v4373_v34  ;;  %v7933_v12 = vld [vmem:[#allocation13_spill] sm:$0xff] }
 0x7e9   :  { %v4396_v46 = vadd.f32 %v4390_v47, %v4374_v7  ;;  %v4397_v62 = vadd.f32 %v4390_v47, %v4375_v21  ;;  %v4398_v27 = vadd.f32 %v4390_v47, %v4376_v8  ;;  %v4400_v26 = vadd.f32 %v4390_v47, %v4378_v9 }
 0x7ea   :  { %v4401_v2 = vadd.f32 %v4390_v47, %v4379_v4  ;;  %v4402_v38 = vadd.f32 %v4390_v47, %v4380_v59  ;;  %v4403_v32 = vadd.f32 %v4390_v47, %v4381_v51  ;;  %v4404_v23 = vadd.f32 %v4390_v47, %v4382_v33  ;;  %v4443_v4 = vld [vmem:[%s7857_s13 + $0x18] sm:$0xff]  ;;  %v7937_v33 = vld [vmem:[#allocation14_spill] sm:$0xff] }
 0x7eb   :  { %v4405_v56 = vadd.f32 %v4390_v47, %v4383_v14  ;;  %v4406_v25 = vadd.f32 %v4390_v47, %v4384_v61  ;;  %v7917_v20 = vmax.f32 %v6654_v39, 0.0  ;;  %v7918_v0 = vmax.f32 %v6556_v10, 0.0  ;;  %v7935_v47 = vld [vmem:[#allocation7_spill] sm:$0xff] }
 0x7ec   :  { %v4410_v31 = vadd.f32 %v4394_v19, %v7919_v13  ;;  %v4416_v48 = vadd.f32 %v4400_v26, %v7920_v11  ;;  %v4411_v63 = vadd.f32 %v4395_v5, %v7922_v43  ;;  %v4417_v35 = vadd.f32 %v4401_v2, %v7924_v24  ;;  %v7939_v19 = vld [vmem:[#allocation10_spill] sm:$0xff] }
 0x7ed   :  { %v4408_v3 = vadd.f32 %v4392_v58, %v7917_v20  ;;  %v4409_v60 = vadd.f32 %v4393_v15, %v7918_v0  ;;  %v4418_v53 = vadd.f32 %v4402_v38, %v7926_v50  ;;  %v7928_v10 = vmax.f32 %v7927_v18, 0.0 }
 0x7ee   :  { %v4426_v42 = vmax.f32 %v4410_v31, 0.0  ;;  %v4419_v37 = vadd.f32 %v4403_v32, %v7930_v28  ;;  %v4432_v41 = vmax.f32 %v4416_v48, 0.0  ;;  %v4433_v36 = vmax.f32 %v4417_v35, 0.0  ;;  %v4444_v32 = vld [vmem:[%s7857_s13 + $0x20] sm:$0xff]  ;;  %v4446_v35 = vld [vmem:[%s7857_s13 + $0x30] sm:$0xff] }
 0x7ef   :  { %v4424_v39 = vmax.f32 %v4408_v3, 0.0  ;;  %v4425_v1 = vmax.f32 %v4409_v60, 0.0  ;;  %v4412_v29 = vadd.f32 %v4396_v46, %v7928_v10  ;;  %v7932_v16 = vmax.f32 %v7931_v40, 0.0  ;;  %v7943_v60 = vld [vmem:[#allocation9_spill] sm:$0xff]  ;;  %v4447_v10 = vld [vmem:[%s7857_s13 + $0x38] sm:$0xff] }
 0x7f0   :  { %v7934_v54 = vmax.f32 %v7933_v12, 0.0  ;;  %v4427_v7 = vmax.f32 %v4411_v63, 0.0  ;;  %v7936_v21 = vmax.f32 %v7935_v47, 0.0  ;;  %v4434_v9 = vmax.f32 %v4418_v53, 0.0 }
 0x7f1   :  { %v4415_v55 = vadd.f32 %v4399_v57, %v7932_v16  ;;  %v4448_v59 = vmul.f32 %v4440_v30, %v4424_v39  ;;  %v4449_v51 = vmul.f32 %v4441_v49, %v4425_v1  ;;  %v7938_v14 = vmax.f32 %v7937_v33, 0.0 }
 0x7f2   :  { %v4413_v34 = vadd.f32 %v4397_v62, %v7934_v54  ;;  %v4420_v8 = vadd.f32 %v4404_v23, %v7936_v21  ;;  %v4428_v58 = vmax.f32 %v4412_v29, 0.0  ;;  %v4450_v15 = vmul.f32 %v4442_v17, %v4426_v42  ;;  %v7941_v62 = vld [vmem:[#allocation8_spill] sm:$0xff] }
 0x7f3   :  { %v4414_v61 = vadd.f32 %v4398_v27, %v7938_v14  ;;  %v4456_v57 = vmul.f32 %v4440_v30, %v4432_v41  ;;  %v7940_v5 = vmax.f32 %v7939_v19, 0.0  ;;  %v7942_v26 = vmax.f32 %v7941_v62, 0.0 }
 0x7f4   :  { %v4435_v38 = vmax.f32 %v4419_v37, 0.0  ;;  %v4457_v23 = vmul.f32 %v4441_v49, %v4433_v36  ;;  %v4429_v20 = vmax.f32 %v4413_v34, 0.0  ;;  %v4451_v3 = vmul.f32 %v4443_v4, %v4427_v7 }
 0x7f5   :  { %v4423_v46 = vadd.f32 %v4407_v52, %v7940_v5  ;;  %v4421_v2 = vadd.f32 %v4405_v56, %v7942_v26  ;;  %v4464_v0 = vsel %vm53_vm0, %v4448_v59, 0.0  ;;  %v4465_v27 = vsel %vm53_vm0, %v4449_v51, 0.0  ;;  %v4445_v52 = vld [vmem:[%s7857_s13 + $0x28] sm:$0xff] }
 0x7f6   :  { %v7944_v13 = vmax.f32 %v7943_v60, 0.0  ;;  %v4436_v11 = vmax.f32 %v4420_v8, 0.0  ;;  %v4458_v56 = vmul.f32 %v4442_v17, %v4434_v9  ;;  %v4466_v48 = vadd.f32 %v4465_v27, %v4464_v0  ;;  %v4630_v60 = vld [vmem:[#allocation4] ss:$0 sm:$0xff] }
 0x7f7   :  { %v4430_v6 = vmax.f32 %v4414_v61, 0.0  ;;  %v4452_v43 = vmul.f32 %v4444_v32, %v4428_v58  ;;  %v4467_v63 = vsel %vm53_vm0, %v4450_v15, 0.0  ;;  %v4485_v45 = vsel %vm53_vm0, %v4456_v57, 0.0 }
 0x7f8   :  { %v4422_v31 = vadd.f32 %v4406_v25, %v7944_v13  ;;  %v4437_v24 = vmax.f32 %v4421_v2, 0.0  ;;  %v4459_v44 = vmul.f32 %v4443_v4, %v4435_v38  ;;  %v4468_v25 = vadd.f32 %v4467_v63, %v4466_v48 }
 0x7f9   :  { %v4486_v50 = vsel %vm53_vm0, %v4457_v23, 0.0  ;;  %v4431_v53 = vmax.f32 %v4415_v55, 0.0  ;;  %v4453_v39 = vmul.f32 %v4445_v52, %v4429_v20  ;;  %v4469_v1 = vsel %vm53_vm0, %v4451_v3, 0.0 }
 0x7fa   :  { %v4487_v18 = vadd.f32 %v4486_v50, %v4485_v45  ;;  %v4438_v29 = vmax.f32 %v4422_v31, 0.0  ;;  %v4460_v42 = vmul.f32 %v4444_v32, %v4436_v11  ;;  %v4470_v30 = vadd.f32 %v4469_v1, %v4468_v25 }
 0x7fb   :  { %v4488_v49 = vsel %vm53_vm0, %v4458_v56, 0.0  ;;  %v4454_v22 = vmul.f32 %v4446_v35, %v4430_v6  ;;  %v4471_v28 = vsel %vm53_vm0, %v4452_v43, 0.0  ;;  %v4439_v41 = vmax.f32 %v4423_v46, 0.0 }
 0x7fc   :  { %v4489_v37 = vadd.f32 %v4488_v49, %v4487_v18  ;;  %v4461_v36 = vmul.f32 %v4445_v52, %v4437_v24  ;;  %v4472_v17 = vadd.f32 %v4471_v28, %v4470_v30  ;;  %v4490_v40 = vsel %vm53_vm0, %v4459_v44, 0.0 }
 0x7fd   :  { %v4455_v16 = vmul.f32 %v4447_v10, %v4431_v53  ;;  %v4473_v55 = vsel %vm53_vm0, %v4453_v39, 0.0  ;;  %v4462_v54 = vmul.f32 %v4446_v35, %v4438_v29  ;;  %v4492_v7 = vsel %vm53_vm0, %v4460_v42, 0.0 }
 0x7fe   :  { %v4491_v12 = vadd.f32 %v4490_v40, %v4489_v37  ;;  %v4474_v34 = vadd.f32 %v4473_v55, %v4472_v17  ;;  %v4475_v47 = vsel %vm53_vm0, %v4454_v22, 0.0  ;;  %v4463_v8 = vmul.f32 %v4447_v10, %v4439_v41 }
 0x7ff   :  { %v4494_v4 = vsel %vm53_vm0, %v4461_v36, 0.0  ;;  %v4477_v59 = vsel %vm53_vm0, %v4455_v16, 0.0  ;;  %v4496_v14 = vsel %vm53_vm0, %v4462_v54, 0.0 }
 0x800   :  { %v4493_v21 = vadd.f32 %v4492_v7, %v4491_v12  ;;  %v4476_v9 = vadd.f32 %v4475_v47, %v4474_v34  ;;  %v4498_v15 = vsel %vm53_vm0, %v4463_v8, 0.0 }
 0x802   :  { %v4495_v51 = vadd.f32 %v4494_v4, %v4493_v21  ;;  %v4478_v33 = vadd.f32 %v4477_v59, %v4476_v9 }
 0x804   :  { %v4497_v61 = vadd.f32 %v4496_v14, %v4495_v51  ;;  %v4479_v58 = vrot.slane %v4478_v33, 4 }
 0x806   :  { %v4499_v57 = vadd.f32 %v4498_v15, %v4497_v61  ;;  %v4480_v19 = vadd.f32 %v4479_v58, %v4478_v33 }
 0x808   :  { %v4500_v5 = vrot.slane %v4499_v57, 4  ;;  %v4481_v46 = vrot.slane %v4480_v19, 2 }
 0x80a   :  { %v4501_v62 = vadd.f32 %v4500_v5, %v4499_v57  ;;  %v4482_v26 = vadd.f32 %v4481_v46, %v4480_v19 }
 0x80c   :  { %v4502_v2 = vrot.slane %v4501_v62, 2  ;;  %v4483_v38 = vrot.slane %v4482_v26, 1 }
 0x80e   :  { %v4503_v32 = vadd.f32 %v4502_v2, %v4501_v62  ;;  %v4484_v23 = vadd.f32 %v4483_v38, %v4482_v26 }
 0x810   :  { %v4504_v20 = vrot.slane %v4503_v32, 1 }
 0x812   :  { %v4505_v3 = vadd.f32 %v4504_v20, %v4503_v32 }
 0x814   :  { %v4509_v0 = vsel %vm4508_vm5, %v4505_v3, %v4484_v23 }
 0x815   :  { %v4511_v27 = vsel %vm55_vm1, %v4509_v0, 0.0 }
 0x816   :  { %4512 = vadd.xlane.f32.xlu0 %v4511_v27 }
 0x8a3   :  { %v4513_v13 = vpop.xlane.xlu0 %4512 }
 0x8a4   :  { %v4521_v31 = vadd.f32 %v4630_v60, %v4513_v13 }
 0x8a6   :  { %v4631_v11 = vmul.f32 -1.442695, %v4521_v31 }
 0x8a8   :  { %5189 = vpow2.f32 %v4631_v11 }
 0x8b2   :  { %v5190_v52 = vpop.eup %5189 }
 0x8b3   :  { %v4525_v56 = vadd.f32 1.0, %v5190_v52 }
 0x8b5   :  { %5191 = vrcp.f32 %v4525_v56 }
 0x8bf   :  { %v5192_v48 = vpop.eup %5191 }
 0x8c0   :  { %4529 = vst.msk [vmem:[%s7858_s15] sm:$0x3] %vm4528_vm6, %v5192_v48 }

</bundles_post_ra>
